<compile_context>
chip_gen: v7x
topology: tpu7x:2x2x1
jax: 0.10.0
libtpu: 0.0.40
codegen_flags: <defaults>
</compile_context>

<pallas_src>
import math
import functools

import jax
import jax.numpy as jnp
from jax.experimental import pallas as pl
from jax.experimental.pallas import tpu as pltpu

NEG_INF = -1e30
LN_EPS = 1e-5


# ----------------------------- Pallas kernels ------------------------------

def _mha_block_kernel(xq_ref, xkv_ref, mask_ref, wqkv_ref, bqkv_ref,
                      wo_ref, bo_ref, g_ref, beta_ref, o_ref, *,
                      nhead, scale):
    """Fused attention block for one batch element:
       QKV proj -> per-head softmax attention -> out proj -> +residual -> LN."""
    xq = xq_ref[0]                       # (Lq, E) f32  (residual source)
    xkv = xkv_ref[0]                     # (Lk, E) f32
    Lq, E = xq.shape
    Dh = E // nhead

    wqkv = wqkv_ref[...]                 # (E, 3E) bf16
    bqkv = bqkv_ref[...]                 # (1, 3E) f32

    xq_b = xq.astype(jnp.bfloat16)
    xkv_b = xkv.astype(jnp.bfloat16)
    q = jnp.dot(xq_b, wqkv[:, :E],
                preferred_element_type=jnp.float32) + bqkv[:, :E]      # (Lq, E)
    kv = jnp.dot(xkv_b, wqkv[:, E:],
                 preferred_element_type=jnp.float32) + bqkv[:, E:]     # (Lk, 2E)
    k = kv[:, :E]
    v = kv[:, E:]
    mask = mask_ref[0]                   # (Lq, Lk) additive f32

    acc = jnp.zeros((Lq, E), jnp.float32)
    for h in range(nhead):               # static unrolled loop over heads
        sl = slice(h * Dh, (h + 1) * Dh)
        qh = q[:, sl].astype(jnp.bfloat16)
        kh = k[:, sl].astype(jnp.bfloat16)
        vh = v[:, sl].astype(jnp.bfloat16)
        s = jax.lax.dot_general(qh, kh, (((1,), (1,)), ((), ())),
                                preferred_element_type=jnp.float32)
        s = s * scale + mask
        s = s - jnp.max(s, axis=-1, keepdims=True)
        p = jnp.exp(s)
        p = p * pl.reciprocal(jnp.sum(p, axis=-1, keepdims=True), approx=True)
        oh = jnp.dot(p.astype(jnp.bfloat16), vh,
                     preferred_element_type=jnp.float32)               # (Lq, Dh)
        # Output projection accumulated per head: attn @ Wo == sum_h oh @ Wo_h
        acc = acc + jnp.dot(oh.astype(jnp.bfloat16), wo_ref[h],
                            preferred_element_type=jnp.float32)

    y = xq + acc + bo_ref[...]           # residual + out-proj bias
    mu = jnp.mean(y, axis=-1, keepdims=True)
    var = jnp.mean((y - mu) ** 2, axis=-1, keepdims=True)
    o_ref[0] = ((y - mu) * jax.lax.rsqrt(var + LN_EPS)
                * g_ref[...] + beta_ref[...])


def _ffn_block_kernel(x_ref, w1_ref, b1_ref, w2_ref, b2_ref,
                      g_ref, beta_ref, o_ref):
    """Fused FFN block: lin1 + ReLU + lin2 + residual + LayerNorm."""
    x = x_ref[0]                         # (L, E) f32
    h = jnp.dot(x.astype(jnp.bfloat16), w1_ref[...],
                preferred_element_type=jnp.float32) + b1_ref[...]
    h = jnp.maximum(h, 0.0)
    y = x + jnp.dot(h.astype(jnp.bfloat16), w2_ref[...],
                    preferred_element_type=jnp.float32) + b2_ref[...]
    mu = jnp.mean(y, axis=-1, keepdims=True)
    var = jnp.mean((y - mu) ** 2, axis=-1, keepdims=True)
    o_ref[0] = ((y - mu) * jax.lax.rsqrt(var + LN_EPS)
                * g_ref[...] + beta_ref[...])


def _ln_kernel(x_ref, g_ref, b_ref, o_ref):
    x = x_ref[0]
    mu = jnp.mean(x, axis=-1, keepdims=True)
    var = jnp.mean((x - mu) ** 2, axis=-1, keepdims=True)
    o_ref[0] = (x - mu) * jax.lax.rsqrt(var + LN_EPS) * g_ref[...] + b_ref[...]


def _ln_fc_kernel(x_ref, g_ref, b_ref, w_ref, fcb_ref, o_ref):
    """Final decoder LayerNorm fused with the output Linear (padded to 128 lanes)."""
    x = x_ref[0]                         # (T, E) f32
    mu = jnp.mean(x, axis=-1, keepdims=True)
    var = jnp.mean((x - mu) ** 2, axis=-1, keepdims=True)
    y = (x - mu) * jax.lax.rsqrt(var + LN_EPS) * g_ref[...] + b_ref[...]
    o_ref[0] = jnp.dot(y.astype(jnp.bfloat16), w_ref[...],
                       preferred_element_type=jnp.float32) + fcb_ref[...]


# ----------------------------- Pallas wrappers ------------------------------

_PARALLEL = pltpu.CompilerParams(dimension_semantics=("parallel",))


def mha_block(x_q, x_kv, mask, p, nhead):
    # x_q: (B, Lq, E); x_kv: (B, Lk, E); mask: (B, Lq, Lk) additive f32
    B, Lq, E = x_q.shape
    Lk = x_kv.shape[1]
    Dh = E // nhead
    scale = 1.0 / math.sqrt(Dh)
    kern = functools.partial(_mha_block_kernel, nhead=nhead, scale=scale)
    return pl.pallas_call(
        kern,
        out_shape=jax.ShapeDtypeStruct((B, Lq, E), jnp.float32),
        grid=(B,),
        in_specs=[
            pl.BlockSpec((1, Lq, E), lambda b: (b, 0, 0)),
            pl.BlockSpec((1, Lk, E), lambda b: (b, 0, 0)),
            pl.BlockSpec((1, Lq, Lk), lambda b: (b, 0, 0)),
            pl.BlockSpec((E, 3 * E), lambda b: (0, 0)),
            pl.BlockSpec((1, 3 * E), lambda b: (0, 0)),
            pl.BlockSpec((nhead, Dh, E), lambda b: (0, 0, 0)),
            pl.BlockSpec((1, E), lambda b: (0, 0)),
            pl.BlockSpec((1, E), lambda b: (0, 0)),
            pl.BlockSpec((1, E), lambda b: (0, 0)),
        ],
        out_specs=pl.BlockSpec((1, Lq, E), lambda b: (b, 0, 0)),
        compiler_params=_PARALLEL,
    )(x_q, x_kv, mask, p["wqkv"], p["bqkv"], p["wo"], p["bo"],
      p["ln_g"], p["ln_b"])


def ffn_block(x, p):
    B, L, E = x.shape
    F = p["lin1_w"].shape[1]
    return pl.pallas_call(
        _ffn_block_kernel,
        out_shape=jax.ShapeDtypeStruct((B, L, E), jnp.float32),
        grid=(B,),
        in_specs=[
            pl.BlockSpec((1, L, E), lambda b: (b, 0, 0)),
            pl.BlockSpec((E, F), lambda b: (0, 0)),
            pl.BlockSpec((1, F), lambda b: (0, 0)),
            pl.BlockSpec((F, E), lambda b: (0, 0)),
            pl.BlockSpec((1, E), lambda b: (0, 0)),
            pl.BlockSpec((1, E), lambda b: (0, 0)),
            pl.BlockSpec((1, E), lambda b: (0, 0)),
        ],
        out_specs=pl.BlockSpec((1, L, E), lambda b: (b, 0, 0)),
        compiler_params=_PARALLEL,
    )(x, p["lin1_w"], p["lin1_b"], p["lin2_w"], p["lin2_b"],
      p["ln_g"], p["ln_b"])


def layernorm(x, g, b):
    B, L, E = x.shape
    return pl.pallas_call(
        _ln_kernel,
        out_shape=jax.ShapeDtypeStruct((B, L, E), jnp.float32),
        grid=(B,),
        in_specs=[pl.BlockSpec((1, L, E), lambda i: (i, 0, 0)),
                  pl.BlockSpec((1, E), lambda i: (0, 0)),
                  pl.BlockSpec((1, E), lambda i: (0, 0))],
        out_specs=pl.BlockSpec((1, L, E), lambda i: (i, 0, 0)),
        compiler_params=_PARALLEL,
    )(x, g, b)


def ln_fc(x, g, b, w_pad, b_pad):
    # x: (B, T, E); w_pad: (E, P) with P a multiple of 128 (lane-dense output)
    B, T, E = x.shape
    P = w_pad.shape[1]
    return pl.pallas_call(
        _ln_fc_kernel,
        out_shape=jax.ShapeDtypeStruct((B, T, P), jnp.float32),
        grid=(B,),
        in_specs=[pl.BlockSpec((1, T, E), lambda i: (i, 0, 0)),
                  pl.BlockSpec((1, E), lambda i: (0, 0)),
                  pl.BlockSpec((1, E), lambda i: (0, 0)),
                  pl.BlockSpec((E, P), lambda i: (0, 0)),
                  pl.BlockSpec((1, P), lambda i: (0, 0))],
        out_specs=pl.BlockSpec((1, T, P), lambda i: (i, 0, 0)),
        compiler_params=_PARALLEL,
    )(x, g, b, w_pad, b_pad)


# ------------------------------ full forward --------------------------------

def transformer_translator_forward(params, src, src_pad_mask, tgt, tgt_mask,
                                   tgt_pad_mask, mem_mask, *,
                                   ninp, nhead, out_token):
    pe = params["pe"]

    # Embedding * sqrt(ninp) + positional encoding.
    # NOTE: reproduces the reference module exactly: PositionalEncoding is
    # applied while tensors are (batch, seq, embed), so pe is indexed by the
    # *batch* position and broadcast over the sequence axis (quirk preserved).
    src_e = params["enc_emb"][src] * math.sqrt(ninp)            # (N, S, E)
    src_e = src_e + pe[: src_e.shape[0]][:, None, :]
    tgt_e = params["dec_emb"][tgt] * math.sqrt(ninp)            # (N, T, E)
    tgt_e = tgt_e + pe[: tgt_e.shape[0]][:, None, :]

    N, S = src.shape
    T = tgt.shape[1]

    # Per-batch additive masks (shared across heads; no nhead duplication).
    pad_src = jnp.where(src_pad_mask, NEG_INF, 0.0).astype(jnp.float32)  # (N,S)
    pad_tgt = jnp.where(tgt_pad_mask, NEG_INF, 0.0).astype(jnp.float32)  # (N,T)
    pad_mem = jnp.where(mem_mask, NEG_INF, 0.0).astype(jnp.float32)      # (N,S)

    enc_self_mask = jnp.broadcast_to(pad_src[:, None, :], (N, S, S))
    dec_self_mask = jnp.maximum(
        pad_tgt[:, None, :] + tgt_mask[None, :, :].astype(jnp.float32), NEG_INF)
    dec_self_mask = jnp.broadcast_to(dec_self_mask, (N, T, T))
    dec_cross_mask = jnp.broadcast_to(pad_mem[:, None, :], (N, T, S))

    # Encoder stack.
    x = src_e
    for lp in params["enc_layers"]:
        x = mha_block(x, x, enc_self_mask, lp["self_attn"], nhead)
        x = ffn_block(x, lp)
    memory = layernorm(x, params["enc_norm_g"], params["enc_norm_b"])

    # Decoder stack.
    y = tgt_e
    for lp in params["dec_layers"]:
        y = mha_block(y, y, dec_self_mask, lp["self_attn"], nhead)
        y = mha_block(y, memory, dec_cross_mask, lp["cross_attn"], nhead)
        y = ffn_block(y, lp)

    # generate(): layout is already (N, T, E); fused final norm + fc.
    logits_pad = ln_fc(y, params["dec_norm_g"], params["dec_norm_b"],
                       params["fc_w"], params["fc_b"])          # (N, T, P)
    return logits_pad[:, :, :out_token]


# ------------------------------ parameter init ------------------------------

def _w(key, shape, scale=0.05):
    return jax.random.normal(key, shape, jnp.float32) * scale


def _mha_params(key, E, nhead):
    k1, k2 = jax.random.split(key, 2)
    Dh = E // nhead
    wqkv = _w(k1, (E, 3 * E))                       # fused q|k|v projection
    wo = _w(k2, (E, E))
    return {
        "wqkv": wqkv.astype(jnp.bfloat16),
        "bqkv": jnp.zeros((1, 3 * E), jnp.float32),
        "wo": wo.reshape(nhead, Dh, E).astype(jnp.bfloat16),
        "bo": jnp.zeros((1, E), jnp.float32),
        "ln_g": jnp.ones((1, E), jnp.float32),      # post-attention LayerNorm
        "ln_b": jnp.zeros((1, E), jnp.float32),
    }


def _enc_layer_params(key, E, F, nhead):
    k1, k2, k3 = jax.random.split(key, 3)
    return {
        "self_attn": _mha_params(k1, E, nhead),
        "lin1_w": _w(k2, (E, F)).astype(jnp.bfloat16),
        "lin1_b": jnp.zeros((1, F), jnp.float32),
        "lin2_w": _w(k3, (F, E)).astype(jnp.bfloat16),
        "lin2_b": jnp.zeros((1, E), jnp.float32),
        "ln_g": jnp.ones((1, E), jnp.float32),      # post-FFN LayerNorm
        "ln_b": jnp.zeros((1, E), jnp.float32),
    }


def _dec_layer_params(key, E, F, nhead):
    k1, k2, k3, k4 = jax.random.split(key, 4)
    return {
        "self_attn": _mha_params(k1, E, nhead),
        "cross_attn": _mha_params(k2, E, nhead),
        "lin1_w": _w(k3, (E, F)).astype(jnp.bfloat16),
        "lin1_b": jnp.zeros((1, F), jnp.float32),
        "lin2_w": _w(k4, (F, E)).astype(jnp.bfloat16),
        "lin2_b": jnp.zeros((1, E), jnp.float32),
        "ln_g": jnp.ones((1, E), jnp.float32),
        "ln_b": jnp.zeros((1, E), jnp.float32),
    }


def _positional_encoding(d_model, max_len=5000):
    position = jnp.arange(max_len, dtype=jnp.float32)[:, None]
    div_term = jnp.exp(jnp.arange(0, d_model, 2, dtype=jnp.float32)
                       * (-math.log(10000.0) / d_model))
    pe = jnp.zeros((max_len, d_model), jnp.float32)
    pe = pe.at[:, 0::2].set(jnp.sin(position * div_term))
    pe = pe.at[:, 1::2].set(jnp.cos(position * div_term))
    return pe  # (max_len, d_model); used as pe[:n, :] per the reference quirk


def init_params(key, in_token, out_token, ninp, nhead, nhid, nlayers):
    keys = jax.random.split(key, 3 + 2 * nlayers)
    pad = max(128, ((out_token + 127) // 128) * 128)   # lane-dense fc output
    fc_w = jnp.zeros((ninp, pad), jnp.float32)
    fc_w = fc_w.at[:, :out_token].set(_w(keys[2], (ninp, out_token)))
    params = {
        "enc_emb": _w(keys[0], (in_token, ninp), scale=1.0),
        "dec_emb": _w(keys[1], (out_token, ninp), scale=1.0),
        "pe": _positional_encoding(ninp),
        "enc_layers": [_enc_layer_params(keys[3 + i], ninp, nhid, nhead)
                       for i in range(nlayers)],
        "dec_layers": [_dec_layer_params(keys[3 + nlayers + i], ninp, nhid, nhead)
                       for i in range(nlayers)],
        "enc_norm_g": jnp.ones((1, ninp), jnp.float32),
        "enc_norm_b": jnp.zeros((1, ninp), jnp.float32),
        "dec_norm_g": jnp.ones((1, ninp), jnp.float32),
        "dec_norm_b": jnp.zeros((1, ninp), jnp.float32),
        "fc_w": fc_w.astype(jnp.bfloat16),
        "fc_b": jnp.zeros((1, pad), jnp.float32),
    }
    return params


# ----------------------------------- main ------------------------------------

if __name__ == "__main__":
    in_token, out_token = 13, 11
    ninp, nhead, nhid, nlayers = 32, 4, 64, 2
    N, S, T = 2, 8, 6

    root = jax.random.PRNGKey(0)
    pkey, dkey = jax.random.split(root)
    params = init_params(pkey, in_token, out_token, ninp, nhead, nhid, nlayers)

    k1, k2 = jax.random.split(dkey)
    src = jax.random.randint(k1, (N, S), 0, in_token, dtype=jnp.int32)
    tgt = jax.random.randint(k2, (N, T), 0, out_token, dtype=jnp.int32)

    src_lens = jnp.array([8, 6], dtype=jnp.int32)
    tgt_lens = jnp.array([6, 5], dtype=jnp.int32)
    src_pad_mask = jnp.arange(S)[None, :] >= src_lens[:, None]   # (N,S) True=pad
    tgt_pad_mask = jnp.arange(T)[None, :] >= tgt_lens[:, None]   # (N,T) True=pad
    mem_mask = src_pad_mask                                       # memory padding
    tgt_mask = jnp.where(jnp.triu(jnp.ones((T, T), jnp.bool_), k=1),
                         NEG_INF, 0.0).astype(jnp.float32)        # causal additive

    fwd = jax.jit(functools.partial(transformer_translator_forward,
                                    ninp=ninp, nhead=nhead, out_token=out_token))
    out = fwd(params, src, src_pad_mask, tgt, tgt_mask, tgt_pad_mask, mem_mask)
    out = jax.block_until_ready(out)

    assert out.shape == (N, T, out_token), out.shape
    assert bool(jnp.all(jnp.isfinite(out)))
    print("KERNEL_OK")
</pallas_src>

<mosaic_0001>
module attributes {stable_mosaic.version = 11 : i64} {
  func.func @_mha_block_kernel(%arg0: i32, %arg1: memref<1x8x32xf32, #tpu.memory_space<vmem>>, %arg2: memref<1x8x32xf32, #tpu.memory_space<vmem>>, %arg3: memref<1x8x8xf32, #tpu.memory_space<vmem>>, %arg4: memref<32x96xbf16, #tpu.memory_space<vmem>>, %arg5: memref<1x96xf32, #tpu.memory_space<vmem>>, %arg6: memref<4x8x32xbf16, #tpu.memory_space<vmem>>, %arg7: memref<1x32xf32, #tpu.memory_space<vmem>>, %arg8: memref<1x32xf32, #tpu.memory_space<vmem>>, %arg9: memref<1x32xf32, #tpu.memory_space<vmem>>, %arg10: memref<1x8x32xf32, #tpu.memory_space<vmem>>) attributes {dimension_semantics = [#tpu.dimension_semantics<parallel>], iteration_bounds = array<i64: 2>, scalar_prefetch = 0 : i64, scratch_operands = 0 : i64, tpu.core_type = #tpu.core_type<tc>, window_params = [{transform_indices = @transform_0, window_bounds = array<i64: 1, 8, 32>}, {transform_indices = @transform_1, window_bounds = array<i64: 1, 8, 32>}, {transform_indices = @transform_2, window_bounds = array<i64: 1, 8, 8>}, {pipeline_mode = #tpu.pipeline_mode<synchronous>, transform_indices = @transform_3, window_bounds = array<i64: 32, 96>}, {pipeline_mode = #tpu.pipeline_mode<synchronous>, transform_indices = @transform_4, window_bounds = array<i64: 1, 96>}, {pipeline_mode = #tpu.pipeline_mode<synchronous>, transform_indices = @transform_5, window_bounds = array<i64: 4, 8, 32>}, {pipeline_mode = #tpu.pipeline_mode<synchronous>, transform_indices = @transform_6, window_bounds = array<i64: 1, 32>}, {pipeline_mode = #tpu.pipeline_mode<synchronous>, transform_indices = @transform_7, window_bounds = array<i64: 1, 32>}, {pipeline_mode = #tpu.pipeline_mode<synchronous>, transform_indices = @transform_8, window_bounds = array<i64: 1, 32>}, {transform_indices = @transform_9, window_bounds = array<i64: 1, 8, 32>}]} {
    %c0 = arith.constant 0 : index
    %c0_0 = arith.constant 0 : index
    %c0_1 = arith.constant 0 : index
    %0 = vector.load %arg1[%c0, %c0_0, %c0_1] : memref<1x8x32xf32, #tpu.memory_space<vmem>>, vector<1x8x32xf32>
    %1 = vector.shape_cast %0 : vector<1x8x32xf32> to vector<8x32xf32>
    %c0_2 = arith.constant 0 : index
    %c0_3 = arith.constant 0 : index
    %c0_4 = arith.constant 0 : index
    %2 = vector.load %arg2[%c0_2, %c0_3, %c0_4] : memref<1x8x32xf32, #tpu.memory_space<vmem>>, vector<1x8x32xf32>
    %3 = vector.shape_cast %2 : vector<1x8x32xf32> to vector<8x32xf32>
    %c0_5 = arith.constant 0 : index
    %c0_6 = arith.constant 0 : index
    %4 = vector.load %arg4[%c0_5, %c0_6] : memref<32x96xbf16, #tpu.memory_space<vmem>>, vector<32x96xbf16>
    %c0_7 = arith.constant 0 : index
    %c0_8 = arith.constant 0 : index
    %5 = vector.load %arg5[%c0_7, %c0_8] : memref<1x96xf32, #tpu.memory_space<vmem>>, vector<1x96xf32>
    %6 = arith.truncf %1 : vector<8x32xf32> to vector<8x32xbf16>
    %7 = arith.truncf %3 : vector<8x32xf32> to vector<8x32xbf16>
    %8 = vector.extract_strided_slice %4 {offsets = [0, 0], sizes = [32, 32], strides = [1, 1]} : vector<32x96xbf16> to vector<32x32xbf16>
    %cst = arith.constant dense<0.000000e+00> : vector<8x32xf32>
    %9 = tpu.matmul %6, %8, %cst {dimension_numbers = #tpu.dot_dimension_numbers<[1], [0], [0], [1], [0, 0, 1, 1], [], []>} : vector<8x32xbf16>, vector<32x32xbf16>, vector<8x32xf32> -> vector<8x32xf32>
    %10 = vector.extract_strided_slice %5 {offsets = [0, 0], sizes = [1, 32], strides = [1, 1]} : vector<1x96xf32> to vector<1x32xf32>
    %11 = vector.broadcast %10 : vector<1x32xf32> to vector<8x32xf32>
    %12 = arith.addf %9, %11 : vector<8x32xf32>
    %13 = vector.extract_strided_slice %4 {offsets = [0, 32], sizes = [32, 64], strides = [1, 1]} : vector<32x96xbf16> to vector<32x64xbf16>
    %cst_9 = arith.constant dense<0.000000e+00> : vector<8x64xf32>
    %14 = tpu.matmul %7, %13, %cst_9 {dimension_numbers = #tpu.dot_dimension_numbers<[1], [0], [0], [1], [0, 0, 1, 1], [], []>} : vector<8x32xbf16>, vector<32x64xbf16>, vector<8x64xf32> -> vector<8x64xf32>
    %15 = vector.extract_strided_slice %5 {offsets = [0, 32], sizes = [1, 64], strides = [1, 1]} : vector<1x96xf32> to vector<1x64xf32>
    %16 = vector.broadcast %15 : vector<1x64xf32> to vector<8x64xf32>
    %17 = arith.addf %14, %16 : vector<8x64xf32>
    %18 = vector.extract_strided_slice %17 {offsets = [0, 0], sizes = [8, 32], strides = [1, 1]} : vector<8x64xf32> to vector<8x32xf32>
    %19 = vector.extract_strided_slice %17 {offsets = [0, 32], sizes = [8, 32], strides = [1, 1]} : vector<8x64xf32> to vector<8x32xf32>
    %c0_10 = arith.constant 0 : index
    %c0_11 = arith.constant 0 : index
    %c0_12 = arith.constant 0 : index
    %20 = vector.load %arg3[%c0_10, %c0_11, %c0_12] : memref<1x8x8xf32, #tpu.memory_space<vmem>>, vector<1x8x8xf32>
    %21 = vector.shape_cast %20 : vector<1x8x8xf32> to vector<8x8xf32>
    %cst_13 = arith.constant 0.000000e+00 : f32
    %22 = vector.broadcast %cst_13 : f32 to vector<8x32xf32>
    %23 = vector.extract_strided_slice %12 {offsets = [0, 0], sizes = [8, 8], strides = [1, 1]} : vector<8x32xf32> to vector<8x8xf32>
    %24 = arith.truncf %23 : vector<8x8xf32> to vector<8x8xbf16>
    %25 = vector.extract_strided_slice %18 {offsets = [0, 0], sizes = [8, 8], strides = [1, 1]} : vector<8x32xf32> to vector<8x8xf32>
    %26 = arith.truncf %25 : vector<8x8xf32> to vector<8x8xbf16>
    %27 = vector.extract_strided_slice %19 {offsets = [0, 0], sizes = [8, 8], strides = [1, 1]} : vector<8x32xf32> to vector<8x8xf32>
    %28 = arith.truncf %27 : vector<8x8xf32> to vector<8x8xbf16>
    %cst_14 = arith.constant dense<0.000000e+00> : vector<8x8xf32>
    %29 = tpu.matmul %24, %26, %cst_14 {dimension_numbers = #tpu.dot_dimension_numbers<[1], [1], [0], [0], [0, 0, 1, 0], [], []>} : vector<8x8xbf16>, vector<8x8xbf16>, vector<8x8xf32> -> vector<8x8xf32>
    %cst_15 = arith.constant 0.353553385 : f32
    %30 = vector.broadcast %cst_15 : f32 to vector<8x8xf32>
    %31 = arith.mulf %29, %30 : vector<8x8xf32>
    %32 = arith.addf %31, %21 : vector<8x8xf32>
    %cst_16 = arith.constant dense<0xFF800000> : vector<8xf32>
    %33 = vector.multi_reduction <maximumf>, %32, %cst_16 [1] : vector<8x8xf32> to vector<8xf32>
    %34 = vector.shape_cast %33 : vector<8xf32> to vector<8x1xf32>
    %35 = vector.broadcast %34 : vector<8x1xf32> to vector<8x8xf32>
    %36 = arith.subf %32, %35 : vector<8x8xf32>
    %37 = math.exp %36 : vector<8x8xf32>
    %cst_17 = arith.constant dense<0.000000e+00> : vector<8xf32>
    %38 = vector.multi_reduction <add>, %37, %cst_17 [1] : vector<8x8xf32> to vector<8xf32>
    %39 = vector.shape_cast %38 : vector<8xf32> to vector<8x1xf32>
    %40 = tpu.reciprocal %39 {approx = true} : vector<8x1xf32> -> vector<8x1xf32>
    %41 = vector.broadcast %40 : vector<8x1xf32> to vector<8x8xf32>
    %42 = arith.mulf %37, %41 : vector<8x8xf32>
    %43 = arith.truncf %42 : vector<8x8xf32> to vector<8x8xbf16>
    %cst_18 = arith.constant dense<0.000000e+00> : vector<8x8xf32>
    %44 = tpu.matmul %43, %28, %cst_18 {dimension_numbers = #tpu.dot_dimension_numbers<[1], [0], [0], [1], [0, 0, 1, 1], [], []>} : vector<8x8xbf16>, vector<8x8xbf16>, vector<8x8xf32> -> vector<8x8xf32>
    %45 = arith.truncf %44 : vector<8x8xf32> to vector<8x8xbf16>
    %c0_19 = arith.constant 0 : index
    %c0_20 = arith.constant 0 : index
    %c0_21 = arith.constant 0 : index
    %46 = vector.load %arg6[%c0_19, %c0_20, %c0_21] : memref<4x8x32xbf16, #tpu.memory_space<vmem>>, vector<1x8x32xbf16>
    %47 = vector.shape_cast %46 : vector<1x8x32xbf16> to vector<8x32xbf16>
    %cst_22 = arith.constant dense<0.000000e+00> : vector<8x32xf32>
    %48 = tpu.matmul %45, %47, %cst_22 {dimension_numbers = #tpu.dot_dimension_numbers<[1], [0], [0], [1], [0, 0, 1, 1], [], []>} : vector<8x8xbf16>, vector<8x32xbf16>, vector<8x32xf32> -> vector<8x32xf32>
    %49 = arith.addf %22, %48 : vector<8x32xf32>
    %50 = vector.extract_strided_slice %12 {offsets = [0, 8], sizes = [8, 8], strides = [1, 1]} : vector<8x32xf32> to vector<8x8xf32>
    %51 = arith.truncf %50 : vector<8x8xf32> to vector<8x8xbf16>
    %52 = vector.extract_strided_slice %18 {offsets = [0, 8], sizes = [8, 8], strides = [1, 1]} : vector<8x32xf32> to vector<8x8xf32>
    %53 = arith.truncf %52 : vector<8x8xf32> to vector<8x8xbf16>
    %54 = vector.extract_strided_slice %19 {offsets = [0, 8], sizes = [8, 8], strides = [1, 1]} : vector<8x32xf32> to vector<8x8xf32>
    %55 = arith.truncf %54 : vector<8x8xf32> to vector<8x8xbf16>
    %cst_23 = arith.constant dense<0.000000e+00> : vector<8x8xf32>
    %56 = tpu.matmul %51, %53, %cst_23 {dimension_numbers = #tpu.dot_dimension_numbers<[1], [1], [0], [0], [0, 0, 1, 0], [], []>} : vector<8x8xbf16>, vector<8x8xbf16>, vector<8x8xf32> -> vector<8x8xf32>
    %cst_24 = arith.constant 0.353553385 : f32
    %57 = vector.broadcast %cst_24 : f32 to vector<8x8xf32>
    %58 = arith.mulf %56, %57 : vector<8x8xf32>
    %59 = arith.addf %58, %21 : vector<8x8xf32>
    %cst_25 = arith.constant dense<0xFF800000> : vector<8xf32>
    %60 = vector.multi_reduction <maximumf>, %59, %cst_25 [1] : vector<8x8xf32> to vector<8xf32>
    %61 = vector.shape_cast %60 : vector<8xf32> to vector<8x1xf32>
    %62 = vector.broadcast %61 : vector<8x1xf32> to vector<8x8xf32>
    %63 = arith.subf %59, %62 : vector<8x8xf32>
    %64 = math.exp %63 : vector<8x8xf32>
    %cst_26 = arith.constant dense<0.000000e+00> : vector<8xf32>
    %65 = vector.multi_reduction <add>, %64, %cst_26 [1] : vector<8x8xf32> to vector<8xf32>
    %66 = vector.shape_cast %65 : vector<8xf32> to vector<8x1xf32>
    %67 = tpu.reciprocal %66 {approx = true} : vector<8x1xf32> -> vector<8x1xf32>
    %68 = vector.broadcast %67 : vector<8x1xf32> to vector<8x8xf32>
    %69 = arith.mulf %64, %68 : vector<8x8xf32>
    %70 = arith.truncf %69 : vector<8x8xf32> to vector<8x8xbf16>
    %cst_27 = arith.constant dense<0.000000e+00> : vector<8x8xf32>
    %71 = tpu.matmul %70, %55, %cst_27 {dimension_numbers = #tpu.dot_dimension_numbers<[1], [0], [0], [1], [0, 0, 1, 1], [], []>} : vector<8x8xbf16>, vector<8x8xbf16>, vector<8x8xf32> -> vector<8x8xf32>
    %72 = arith.truncf %71 : vector<8x8xf32> to vector<8x8xbf16>
    %c1 = arith.constant 1 : index
    %c0_28 = arith.constant 0 : index
    %c0_29 = arith.constant 0 : index
    %73 = vector.load %arg6[%c1, %c0_28, %c0_29] : memref<4x8x32xbf16, #tpu.memory_space<vmem>>, vector<1x8x32xbf16>
    %74 = vector.shape_cast %73 : vector<1x8x32xbf16> to vector<8x32xbf16>
    %cst_30 = arith.constant dense<0.000000e+00> : vector<8x32xf32>
    %75 = tpu.matmul %72, %74, %cst_30 {dimension_numbers = #tpu.dot_dimension_numbers<[1], [0], [0], [1], [0, 0, 1, 1], [], []>} : vector<8x8xbf16>, vector<8x32xbf16>, vector<8x32xf32> -> vector<8x32xf32>
    %76 = arith.addf %49, %75 : vector<8x32xf32>
    %77 = vector.extract_strided_slice %12 {offsets = [0, 16], sizes = [8, 8], strides = [1, 1]} : vector<8x32xf32> to vector<8x8xf32>
    %78 = arith.truncf %77 : vector<8x8xf32> to vector<8x8xbf16>
    %79 = vector.extract_strided_slice %18 {offsets = [0, 16], sizes = [8, 8], strides = [1, 1]} : vector<8x32xf32> to vector<8x8xf32>
    %80 = arith.truncf %79 : vector<8x8xf32> to vector<8x8xbf16>
    %81 = vector.extract_strided_slice %19 {offsets = [0, 16], sizes = [8, 8], strides = [1, 1]} : vector<8x32xf32> to vector<8x8xf32>
    %82 = arith.truncf %81 : vector<8x8xf32> to vector<8x8xbf16>
    %cst_31 = arith.constant dense<0.000000e+00> : vector<8x8xf32>
    %83 = tpu.matmul %78, %80, %cst_31 {dimension_numbers = #tpu.dot_dimension_numbers<[1], [1], [0], [0], [0, 0, 1, 0], [], []>} : vector<8x8xbf16>, vector<8x8xbf16>, vector<8x8xf32> -> vector<8x8xf32>
    %cst_32 = arith.constant 0.353553385 : f32
    %84 = vector.broadcast %cst_32 : f32 to vector<8x8xf32>
    %85 = arith.mulf %83, %84 : vector<8x8xf32>
    %86 = arith.addf %85, %21 : vector<8x8xf32>
    %cst_33 = arith.constant dense<0xFF800000> : vector<8xf32>
    %87 = vector.multi_reduction <maximumf>, %86, %cst_33 [1] : vector<8x8xf32> to vector<8xf32>
    %88 = vector.shape_cast %87 : vector<8xf32> to vector<8x1xf32>
    %89 = vector.broadcast %88 : vector<8x1xf32> to vector<8x8xf32>
    %90 = arith.subf %86, %89 : vector<8x8xf32>
    %91 = math.exp %90 : vector<8x8xf32>
    %cst_34 = arith.constant dense<0.000000e+00> : vector<8xf32>
    %92 = vector.multi_reduction <add>, %91, %cst_34 [1] : vector<8x8xf32> to vector<8xf32>
    %93 = vector.shape_cast %92 : vector<8xf32> to vector<8x1xf32>
    %94 = tpu.reciprocal %93 {approx = true} : vector<8x1xf32> -> vector<8x1xf32>
    %95 = vector.broadcast %94 : vector<8x1xf32> to vector<8x8xf32>
    %96 = arith.mulf %91, %95 : vector<8x8xf32>
    %97 = arith.truncf %96 : vector<8x8xf32> to vector<8x8xbf16>
    %cst_35 = arith.constant dense<0.000000e+00> : vector<8x8xf32>
    %98 = tpu.matmul %97, %82, %cst_35 {dimension_numbers = #tpu.dot_dimension_numbers<[1], [0], [0], [1], [0, 0, 1, 1], [], []>} : vector<8x8xbf16>, vector<8x8xbf16>, vector<8x8xf32> -> vector<8x8xf32>
    %99 = arith.truncf %98 : vector<8x8xf32> to vector<8x8xbf16>
    %c2 = arith.constant 2 : index
    %c0_36 = arith.constant 0 : index
    %c0_37 = arith.constant 0 : index
    %100 = vector.load %arg6[%c2, %c0_36, %c0_37] : memref<4x8x32xbf16, #tpu.memory_space<vmem>>, vector<1x8x32xbf16>
    %101 = vector.shape_cast %100 : vector<1x8x32xbf16> to vector<8x32xbf16>
    %cst_38 = arith.constant dense<0.000000e+00> : vector<8x32xf32>
    %102 = tpu.matmul %99, %101, %cst_38 {dimension_numbers = #tpu.dot_dimension_numbers<[1], [0], [0], [1], [0, 0, 1, 1], [], []>} : vector<8x8xbf16>, vector<8x32xbf16>, vector<8x32xf32> -> vector<8x32xf32>
    %103 = arith.addf %76, %102 : vector<8x32xf32>
    %104 = vector.extract_strided_slice %12 {offsets = [0, 24], sizes = [8, 8], strides = [1, 1]} : vector<8x32xf32> to vector<8x8xf32>
    %105 = arith.truncf %104 : vector<8x8xf32> to vector<8x8xbf16>
    %106 = vector.extract_strided_slice %18 {offsets = [0, 24], sizes = [8, 8], strides = [1, 1]} : vector<8x32xf32> to vector<8x8xf32>
    %107 = arith.truncf %106 : vector<8x8xf32> to vector<8x8xbf16>
    %108 = vector.extract_strided_slice %19 {offsets = [0, 24], sizes = [8, 8], strides = [1, 1]} : vector<8x32xf32> to vector<8x8xf32>
    %109 = arith.truncf %108 : vector<8x8xf32> to vector<8x8xbf16>
    %cst_39 = arith.constant dense<0.000000e+00> : vector<8x8xf32>
    %110 = tpu.matmul %105, %107, %cst_39 {dimension_numbers = #tpu.dot_dimension_numbers<[1], [1], [0], [0], [0, 0, 1, 0], [], []>} : vector<8x8xbf16>, vector<8x8xbf16>, vector<8x8xf32> -> vector<8x8xf32>
    %cst_40 = arith.constant 0.353553385 : f32
    %111 = vector.broadcast %cst_40 : f32 to vector<8x8xf32>
    %112 = arith.mulf %110, %111 : vector<8x8xf32>
    %113 = arith.addf %112, %21 : vector<8x8xf32>
    %cst_41 = arith.constant dense<0xFF800000> : vector<8xf32>
    %114 = vector.multi_reduction <maximumf>, %113, %cst_41 [1] : vector<8x8xf32> to vector<8xf32>
    %115 = vector.shape_cast %114 : vector<8xf32> to vector<8x1xf32>
    %116 = vector.broadcast %115 : vector<8x1xf32> to vector<8x8xf32>
    %117 = arith.subf %113, %116 : vector<8x8xf32>
    %118 = math.exp %117 : vector<8x8xf32>
    %cst_42 = arith.constant dense<0.000000e+00> : vector<8xf32>
    %119 = vector.multi_reduction <add>, %118, %cst_42 [1] : vector<8x8xf32> to vector<8xf32>
    %120 = vector.shape_cast %119 : vector<8xf32> to vector<8x1xf32>
    %121 = tpu.reciprocal %120 {approx = true} : vector<8x1xf32> -> vector<8x1xf32>
    %122 = vector.broadcast %121 : vector<8x1xf32> to vector<8x8xf32>
    %123 = arith.mulf %118, %122 : vector<8x8xf32>
    %124 = arith.truncf %123 : vector<8x8xf32> to vector<8x8xbf16>
    %cst_43 = arith.constant dense<0.000000e+00> : vector<8x8xf32>
    %125 = tpu.matmul %124, %109, %cst_43 {dimension_numbers = #tpu.dot_dimension_numbers<[1], [0], [0], [1], [0, 0, 1, 1], [], []>} : vector<8x8xbf16>, vector<8x8xbf16>, vector<8x8xf32> -> vector<8x8xf32>
    %126 = arith.truncf %125 : vector<8x8xf32> to vector<8x8xbf16>
    %c3 = arith.constant 3 : index
    %c0_44 = arith.constant 0 : index
    %c0_45 = arith.constant 0 : index
    %127 = vector.load %arg6[%c3, %c0_44, %c0_45] : memref<4x8x32xbf16, #tpu.memory_space<vmem>>, vector<1x8x32xbf16>
    %128 = vector.shape_cast %127 : vector<1x8x32xbf16> to vector<8x32xbf16>
    %cst_46 = arith.constant dense<0.000000e+00> : vector<8x32xf32>
    %129 = tpu.matmul %126, %128, %cst_46 {dimension_numbers = #tpu.dot_dimension_numbers<[1], [0], [0], [1], [0, 0, 1, 1], [], []>} : vector<8x8xbf16>, vector<8x32xbf16>, vector<8x32xf32> -> vector<8x32xf32>
    %130 = arith.addf %103, %129 : vector<8x32xf32>
    %131 = arith.addf %1, %130 : vector<8x32xf32>
    %c0_47 = arith.constant 0 : index
    %c0_48 = arith.constant 0 : index
    %132 = vector.load %arg7[%c0_47, %c0_48] : memref<1x32xf32, #tpu.memory_space<vmem>>, vector<1x32xf32>
    %133 = vector.broadcast %132 : vector<1x32xf32> to vector<8x32xf32>
    %134 = arith.addf %131, %133 : vector<8x32xf32>
    %cst_49 = arith.constant dense<0.000000e+00> : vector<8xf32>
    %135 = vector.multi_reduction <add>, %134, %cst_49 [1] : vector<8x32xf32> to vector<8xf32>
    %136 = vector.shape_cast %135 : vector<8xf32> to vector<8x1xf32>
    %cst_50 = arith.constant 3.200000e+01 : f32
    %137 = vector.broadcast %cst_50 : f32 to vector<8x1xf32>
    %138 = arith.divf %136, %137 : vector<8x1xf32>
    %139 = vector.broadcast %138 : vector<8x1xf32> to vector<8x32xf32>
    %140 = arith.subf %134, %139 : vector<8x32xf32>
    %141 = arith.mulf %140, %140 : vector<8x32xf32>
    %cst_51 = arith.constant dense<0.000000e+00> : vector<8xf32>
    %142 = vector.multi_reduction <add>, %141, %cst_51 [1] : vector<8x32xf32> to vector<8xf32>
    %143 = vector.shape_cast %142 : vector<8xf32> to vector<8x1xf32>
    %cst_52 = arith.constant 3.200000e+01 : f32
    %144 = vector.broadcast %cst_52 : f32 to vector<8x1xf32>
    %145 = arith.divf %143, %144 : vector<8x1xf32>
    %146 = vector.broadcast %138 : vector<8x1xf32> to vector<8x32xf32>
    %147 = arith.subf %134, %146 : vector<8x32xf32>
    %cst_53 = arith.constant 9.99999974E-6 : f32
    %148 = vector.broadcast %cst_53 : f32 to vector<8x1xf32>
    %149 = arith.addf %145, %148 : vector<8x1xf32>
    %150 = math.rsqrt %149 : vector<8x1xf32>
    %151 = vector.broadcast %150 : vector<8x1xf32> to vector<8x32xf32>
    %152 = arith.mulf %147, %151 : vector<8x32xf32>
    %c0_54 = arith.constant 0 : index
    %c0_55 = arith.constant 0 : index
    %153 = vector.load %arg8[%c0_54, %c0_55] : memref<1x32xf32, #tpu.memory_space<vmem>>, vector<1x32xf32>
    %154 = vector.broadcast %153 : vector<1x32xf32> to vector<8x32xf32>
    %155 = arith.mulf %152, %154 : vector<8x32xf32>
    %c0_56 = arith.constant 0 : index
    %c0_57 = arith.constant 0 : index
    %156 = vector.load %arg9[%c0_56, %c0_57] : memref<1x32xf32, #tpu.memory_space<vmem>>, vector<1x32xf32>
    %157 = vector.broadcast %156 : vector<1x32xf32> to vector<8x32xf32>
    %158 = arith.addf %155, %157 : vector<8x32xf32>
    %c0_58 = arith.constant 0 : index
    %c0_59 = arith.constant 0 : index
    %c0_60 = arith.constant 0 : index
    %159 = vector.load %arg10[%c0_58, %c0_59, %c0_60] : memref<1x8x32xf32, #tpu.memory_space<vmem>>, vector<1x8x32xf32>
    %160 = vector.shape_cast %159 : vector<1x8x32xf32> to vector<8x32xf32>
    %161 = vector.shape_cast %158 : vector<8x32xf32> to vector<1x8x32xf32>
    tpu.vector_store %arg10[%c0_58, %c0_59, %c0_60], %161 {strides = array<i32>} : memref<1x8x32xf32, #tpu.memory_space<vmem>>, vector<1x8x32xf32>,
    return
  }
  func.func @transform_0(%arg0: i32) -> (i32, i32, i32) {
    %c0_i32 = arith.constant 0 : i32
    %c0_i32_0 = arith.constant 0 : i32
    %c0_i32_1 = arith.constant 0 : i32
    return %arg0, %c0_i32, %c0_i32_0 : i32, i32, i32
  }
  func.func @transform_1(%arg0: i32) -> (i32, i32, i32) {
    %c0_i32 = arith.constant 0 : i32
    %c0_i32_0 = arith.constant 0 : i32
    %c0_i32_1 = arith.constant 0 : i32
    return %arg0, %c0_i32, %c0_i32_0 : i32, i32, i32
  }
  func.func @transform_2(%arg0: i32) -> (i32, i32, i32) {
    %c0_i32 = arith.constant 0 : i32
    %c0_i32_0 = arith.constant 0 : i32
    %c0_i32_1 = arith.constant 0 : i32
    return %arg0, %c0_i32, %c0_i32_0 : i32, i32, i32
  }
  func.func @transform_3(%arg0: i32) -> (i32, i32) {
    %c0_i32 = arith.constant 0 : i32
    %c0_i32_0 = arith.constant 0 : i32
    %c0_i32_1 = arith.constant 0 : i32
    return %c0_i32, %c0_i32_0 : i32, i32
  }
  func.func @transform_4(%arg0: i32) -> (i32, i32) {
    %c0_i32 = arith.constant 0 : i32
    %c0_i32_0 = arith.constant 0 : i32
    %c0_i32_1 = arith.constant 0 : i32
    return %c0_i32, %c0_i32_0 : i32, i32
  }
  func.func @transform_5(%arg0: i32) -> (i32, i32, i32) {
    %c0_i32 = arith.constant 0 : i32
    %c0_i32_0 = arith.constant 0 : i32
    %c0_i32_1 = arith.constant 0 : i32
    %c0_i32_2 = arith.constant 0 : i32
    return %c0_i32, %c0_i32_0, %c0_i32_1 : i32, i32, i32
  }
  func.func @transform_6(%arg0: i32) -> (i32, i32) {
    %c0_i32 = arith.constant 0 : i32
    %c0_i32_0 = arith.constant 0 : i32
    %c0_i32_1 = arith.constant 0 : i32
    return %c0_i32, %c0_i32_0 : i32, i32
  }
  func.func @transform_7(%arg0: i32) -> (i32, i32) {
    %c0_i32 = arith.constant 0 : i32
    %c0_i32_0 = arith.constant 0 : i32
    %c0_i32_1 = arith.constant 0 : i32
    return %c0_i32, %c0_i32_0 : i32, i32
  }
  func.func @transform_8(%arg0: i32) -> (i32, i32) {
    %c0_i32 = arith.constant 0 : i32
    %c0_i32_0 = arith.constant 0 : i32
    %c0_i32_1 = arith.constant 0 : i32
    return %c0_i32, %c0_i32_0 : i32, i32
  }
  func.func @transform_9(%arg0: i32) -> (i32, i32, i32) {
    %c0_i32 = arith.constant 0 : i32
    %c0_i32_0 = arith.constant 0 : i32
    %c0_i32_1 = arith.constant 0 : i32
    return %arg0, %c0_i32, %c0_i32_0 : i32, i32, i32
  }
}

module attributes {stable_mosaic.version = 11 : i64} {
  func.func @_ffn_block_kernel(%arg0: i32, %arg1: memref<1x8x32xf32, #tpu.memory_space<vmem>>, %arg2: memref<32x64xbf16, #tpu.memory_space<vmem>>, %arg3: memref<1x64xf32, #tpu.memory_space<vmem>>, %arg4: memref<64x32xbf16, #tpu.memory_space<vmem>>, %arg5: memref<1x32xf32, #tpu.memory_space<vmem>>, %arg6: memref<1x32xf32, #tpu.memory_space<vmem>>, %arg7: memref<1x32xf32, #tpu.memory_space<vmem>>, %arg8: memref<1x8x32xf32, #tpu.memory_space<vmem>>) attributes {dimension_semantics = [#tpu.dimension_semantics<parallel>], iteration_bounds = array<i64: 2>, scalar_prefetch = 0 : i64, scratch_operands = 0 : i64, tpu.core_type = #tpu.core_type<tc>, window_params = [{transform_indices = @transform_0, window_bounds = array<i64: 1, 8, 32>}, {pipeline_mode = #tpu.pipeline_mode<synchronous>, transform_indices = @transform_1, window_bounds = array<i64: 32, 64>}, {pipeline_mode = #tpu.pipeline_mode<synchronous>, transform_indices = @transform_2, window_bounds = array<i64: 1, 64>}, {pipeline_mode = #tpu.pipeline_mode<synchronous>, transform_indices = @transform_3, window_bounds = array<i64: 64, 32>}, {pipeline_mode = #tpu.pipeline_mode<synchronous>, transform_indices = @transform_4, window_bounds = array<i64: 1, 32>}, {pipeline_mode = #tpu.pipeline_mode<synchronous>, transform_indices = @transform_5, window_bounds = array<i64: 1, 32>}, {pipeline_mode = #tpu.pipeline_mode<synchronous>, transform_indices = @transform_6, window_bounds = array<i64: 1, 32>}, {transform_indices = @transform_7, window_bounds = array<i64: 1, 8, 32>}]} {
    %c0 = arith.constant 0 : index
    %c0_0 = arith.constant 0 : index
    %c0_1 = arith.constant 0 : index
    %0 = vector.load %arg1[%c0, %c0_0, %c0_1] : memref<1x8x32xf32, #tpu.memory_space<vmem>>, vector<1x8x32xf32>
    %1 = vector.shape_cast %0 : vector<1x8x32xf32> to vector<8x32xf32>
    %2 = arith.truncf %1 : vector<8x32xf32> to vector<8x32xbf16>
    %c0_2 = arith.constant 0 : index
    %c0_3 = arith.constant 0 : index
    %3 = vector.load %arg2[%c0_2, %c0_3] : memref<32x64xbf16, #tpu.memory_space<vmem>>, vector<32x64xbf16>
    %cst = arith.constant dense<0.000000e+00> : vector<8x64xf32>
    %4 = tpu.matmul %2, %3, %cst {dimension_numbers = #tpu.dot_dimension_numbers<[1], [0], [0], [1], [0, 0, 1, 1], [], []>} : vector<8x32xbf16>, vector<32x64xbf16>, vector<8x64xf32> -> vector<8x64xf32>
    %c0_4 = arith.constant 0 : index
    %c0_5 = arith.constant 0 : index
    %5 = vector.load %arg3[%c0_4, %c0_5] : memref<1x64xf32, #tpu.memory_space<vmem>>, vector<1x64xf32>
    %6 = vector.broadcast %5 : vector<1x64xf32> to vector<8x64xf32>
    %7 = arith.addf %4, %6 : vector<8x64xf32>
    %cst_6 = arith.constant 0.000000e+00 : f32
    %8 = vector.broadcast %cst_6 : f32 to vector<8x64xf32>
    %9 = arith.maximumf %7, %8 : vector<8x64xf32>
    %10 = arith.truncf %9 : vector<8x64xf32> to vector<8x64xbf16>
    %c0_7 = arith.constant 0 : index
    %c0_8 = arith.constant 0 : index
    %11 = vector.load %arg4[%c0_7, %c0_8] : memref<64x32xbf16, #tpu.memory_space<vmem>>, vector<64x32xbf16>
    %cst_9 = arith.constant dense<0.000000e+00> : vector<8x32xf32>
    %12 = tpu.matmul %10, %11, %cst_9 {dimension_numbers = #tpu.dot_dimension_numbers<[1], [0], [0], [1], [0, 0, 1, 1], [], []>} : vector<8x64xbf16>, vector<64x32xbf16>, vector<8x32xf32> -> vector<8x32xf32>
    %13 = arith.addf %1, %12 : vector<8x32xf32>
    %c0_10 = arith.constant 0 : index
    %c0_11 = arith.constant 0 : index
    %14 = vector.load %arg5[%c0_10, %c0_11] : memref<1x32xf32, #tpu.memory_space<vmem>>, vector<1x32xf32>
    %15 = vector.broadcast %14 : vector<1x32xf32> to vector<8x32xf32>
    %16 = arith.addf %13, %15 : vector<8x32xf32>
    %cst_12 = arith.constant dense<0.000000e+00> : vector<8xf32>
    %17 = vector.multi_reduction <add>, %16, %cst_12 [1] : vector<8x32xf32> to vector<8xf32>
    %18 = vector.shape_cast %17 : vector<8xf32> to vector<8x1xf32>
    %cst_13 = arith.constant 3.200000e+01 : f32
    %19 = vector.broadcast %cst_13 : f32 to vector<8x1xf32>
    %20 = arith.divf %18, %19 : vector<8x1xf32>
    %21 = vector.broadcast %20 : vector<8x1xf32> to vector<8x32xf32>
    %22 = arith.subf %16, %21 : vector<8x32xf32>
    %23 = arith.mulf %22, %22 : vector<8x32xf32>
    %cst_14 = arith.constant dense<0.000000e+00> : vector<8xf32>
    %24 = vector.multi_reduction <add>, %23, %cst_14 [1] : vector<8x32xf32> to vector<8xf32>
    %25 = vector.shape_cast %24 : vector<8xf32> to vector<8x1xf32>
    %cst_15 = arith.constant 3.200000e+01 : f32
    %26 = vector.broadcast %cst_15 : f32 to vector<8x1xf32>
    %27 = arith.divf %25, %26 : vector<8x1xf32>
    %28 = vector.broadcast %20 : vector<8x1xf32> to vector<8x32xf32>
    %29 = arith.subf %16, %28 : vector<8x32xf32>
    %cst_16 = arith.constant 9.99999974E-6 : f32
    %30 = vector.broadcast %cst_16 : f32 to vector<8x1xf32>
    %31 = arith.addf %27, %30 : vector<8x1xf32>
    %32 = math.rsqrt %31 : vector<8x1xf32>
    %33 = vector.broadcast %32 : vector<8x1xf32> to vector<8x32xf32>
    %34 = arith.mulf %29, %33 : vector<8x32xf32>
    %c0_17 = arith.constant 0 : index
    %c0_18 = arith.constant 0 : index
    %35 = vector.load %arg6[%c0_17, %c0_18] : memref<1x32xf32, #tpu.memory_space<vmem>>, vector<1x32xf32>
    %36 = vector.broadcast %35 : vector<1x32xf32> to vector<8x32xf32>
    %37 = arith.mulf %34, %36 : vector<8x32xf32>
    %c0_19 = arith.constant 0 : index
    %c0_20 = arith.constant 0 : index
    %38 = vector.load %arg7[%c0_19, %c0_20] : memref<1x32xf32, #tpu.memory_space<vmem>>, vector<1x32xf32>
    %39 = vector.broadcast %38 : vector<1x32xf32> to vector<8x32xf32>
    %40 = arith.addf %37, %39 : vector<8x32xf32>
    %c0_21 = arith.constant 0 : index
    %c0_22 = arith.constant 0 : index
    %c0_23 = arith.constant 0 : index
    %41 = vector.load %arg8[%c0_21, %c0_22, %c0_23] : memref<1x8x32xf32, #tpu.memory_space<vmem>>, vector<1x8x32xf32>
    %42 = vector.shape_cast %41 : vector<1x8x32xf32> to vector<8x32xf32>
    %43 = vector.shape_cast %40 : vector<8x32xf32> to vector<1x8x32xf32>
    tpu.vector_store %arg8[%c0_21, %c0_22, %c0_23], %43 {strides = array<i32>} : memref<1x8x32xf32, #tpu.memory_space<vmem>>, vector<1x8x32xf32>,
    return
  }
  func.func @transform_0(%arg0: i32) -> (i32, i32, i32) {
    %c0_i32 = arith.constant 0 : i32
    %c0_i32_0 = arith.constant 0 : i32
    %c0_i32_1 = arith.constant 0 : i32
    return %arg0, %c0_i32, %c0_i32_0 : i32, i32, i32
  }
  func.func @transform_1(%arg0: i32) -> (i32, i32) {
    %c0_i32 = arith.constant 0 : i32
    %c0_i32_0 = arith.constant 0 : i32
    %c0_i32_1 = arith.constant 0 : i32
    return %c0_i32, %c0_i32_0 : i32, i32
  }
  func.func @transform_2(%arg0: i32) -> (i32, i32) {
    %c0_i32 = arith.constant 0 : i32
    %c0_i32_0 = arith.constant 0 : i32
    %c0_i32_1 = arith.constant 0 : i32
    return %c0_i32, %c0_i32_0 : i32, i32
  }
  func.func @transform_3(%arg0: i32) -> (i32, i32) {
    %c0_i32 = arith.constant 0 : i32
    %c0_i32_0 = arith.constant 0 : i32
    %c0_i32_1 = arith.constant 0 : i32
    return %c0_i32, %c0_i32_0 : i32, i32
  }
  func.func @transform_4(%arg0: i32) -> (i32, i32) {
    %c0_i32 = arith.constant 0 : i32
    %c0_i32_0 = arith.constant 0 : i32
    %c0_i32_1 = arith.constant 0 : i32
    return %c0_i32, %c0_i32_0 : i32, i32
  }
  func.func @transform_5(%arg0: i32) -> (i32, i32) {
    %c0_i32 = arith.constant 0 : i32
    %c0_i32_0 = arith.constant 0 : i32
    %c0_i32_1 = arith.constant 0 : i32
    return %c0_i32, %c0_i32_0 : i32, i32
  }
  func.func @transform_6(%arg0: i32) -> (i32, i32) {
    %c0_i32 = arith.constant 0 : i32
    %c0_i32_0 = arith.constant 0 : i32
    %c0_i32_1 = arith.constant 0 : i32
    return %c0_i32, %c0_i32_0 : i32, i32
  }
  func.func @transform_7(%arg0: i32) -> (i32, i32, i32) {
    %c0_i32 = arith.constant 0 : i32
    %c0_i32_0 = arith.constant 0 : i32
    %c0_i32_1 = arith.constant 0 : i32
    return %arg0, %c0_i32, %c0_i32_0 : i32, i32, i32
  }
}

module attributes {stable_mosaic.version = 11 : i64} {
  func.func @_ln_kernel(%arg0: i32, %arg1: memref<1x8x32xf32, #tpu.memory_space<vmem>>, %arg2: memref<1x32xf32, #tpu.memory_space<vmem>>, %arg3: memref<1x32xf32, #tpu.memory_space<vmem>>, %arg4: memref<1x8x32xf32, #tpu.memory_space<vmem>>) attributes {dimension_semantics = [#tpu.dimension_semantics<parallel>], iteration_bounds = array<i64: 2>, scalar_prefetch = 0 : i64, scratch_operands = 0 : i64, tpu.core_type = #tpu.core_type<tc>, window_params = [{transform_indices = @transform_0, window_bounds = array<i64: 1, 8, 32>}, {pipeline_mode = #tpu.pipeline_mode<synchronous>, transform_indices = @transform_1, window_bounds = array<i64: 1, 32>}, {pipeline_mode = #tpu.pipeline_mode<synchronous>, transform_indices = @transform_2, window_bounds = array<i64: 1, 32>}, {transform_indices = @transform_3, window_bounds = array<i64: 1, 8, 32>}]} {
    %c0 = arith.constant 0 : index
    %c0_0 = arith.constant 0 : index
    %c0_1 = arith.constant 0 : index
    %0 = vector.load %arg1[%c0, %c0_0, %c0_1] : memref<1x8x32xf32, #tpu.memory_space<vmem>>, vector<1x8x32xf32>
    %1 = vector.shape_cast %0 : vector<1x8x32xf32> to vector<8x32xf32>
    %cst = arith.constant dense<0.000000e+00> : vector<8xf32>
    %2 = vector.multi_reduction <add>, %1, %cst [1] : vector<8x32xf32> to vector<8xf32>
    %3 = vector.shape_cast %2 : vector<8xf32> to vector<8x1xf32>
    %cst_2 = arith.constant 3.200000e+01 : f32
    %4 = vector.broadcast %cst_2 : f32 to vector<8x1xf32>
    %5 = arith.divf %3, %4 : vector<8x1xf32>
    %6 = vector.broadcast %5 : vector<8x1xf32> to vector<8x32xf32>
    %7 = arith.subf %1, %6 : vector<8x32xf32>
    %8 = arith.mulf %7, %7 : vector<8x32xf32>
    %cst_3 = arith.constant dense<0.000000e+00> : vector<8xf32>
    %9 = vector.multi_reduction <add>, %8, %cst_3 [1] : vector<8x32xf32> to vector<8xf32>
    %10 = vector.shape_cast %9 : vector<8xf32> to vector<8x1xf32>
    %cst_4 = arith.constant 3.200000e+01 : f32
    %11 = vector.broadcast %cst_4 : f32 to vector<8x1xf32>
    %12 = arith.divf %10, %11 : vector<8x1xf32>
    %13 = vector.broadcast %5 : vector<8x1xf32> to vector<8x32xf32>
    %14 = arith.subf %1, %13 : vector<8x32xf32>
    %cst_5 = arith.constant 9.99999974E-6 : f32
    %15 = vector.broadcast %cst_5 : f32 to vector<8x1xf32>
    %16 = arith.addf %12, %15 : vector<8x1xf32>
    %17 = math.rsqrt %16 : vector<8x1xf32>
    %18 = vector.broadcast %17 : vector<8x1xf32> to vector<8x32xf32>
    %19 = arith.mulf %14, %18 : vector<8x32xf32>
    %c0_6 = arith.constant 0 : index
    %c0_7 = arith.constant 0 : index
    %20 = vector.load %arg2[%c0_6, %c0_7] : memref<1x32xf32, #tpu.memory_space<vmem>>, vector<1x32xf32>
    %21 = vector.broadcast %20 : vector<1x32xf32> to vector<8x32xf32>
    %22 = arith.mulf %19, %21 : vector<8x32xf32>
    %c0_8 = arith.constant 0 : index
    %c0_9 = arith.constant 0 : index
    %23 = vector.load %arg3[%c0_8, %c0_9] : memref<1x32xf32, #tpu.memory_space<vmem>>, vector<1x32xf32>
    %24 = vector.broadcast %23 : vector<1x32xf32> to vector<8x32xf32>
    %25 = arith.addf %22, %24 : vector<8x32xf32>
    %c0_10 = arith.constant 0 : index
    %c0_11 = arith.constant 0 : index
    %c0_12 = arith.constant 0 : index
    %26 = vector.load %arg4[%c0_10, %c0_11, %c0_12] : memref<1x8x32xf32, #tpu.memory_space<vmem>>, vector<1x8x32xf32>
    %27 = vector.shape_cast %26 : vector<1x8x32xf32> to vector<8x32xf32>
    %28 = vector.shape_cast %25 : vector<8x32xf32> to vector<1x8x32xf32>
    tpu.vector_store %arg4[%c0_10, %c0_11, %c0_12], %28 {strides = array<i32>} : memref<1x8x32xf32, #tpu.memory_space<vmem>>, vector<1x8x32xf32>,
    return
  }
  func.func @transform_0(%arg0: i32) -> (i32, i32, i32) {
    %c0_i32 = arith.constant 0 : i32
    %c0_i32_0 = arith.constant 0 : i32
    %c0_i32_1 = arith.constant 0 : i32
    return %arg0, %c0_i32, %c0_i32_0 : i32, i32, i32
  }
  func.func @transform_1(%arg0: i32) -> (i32, i32) {
    %c0_i32 = arith.constant 0 : i32
    %c0_i32_0 = arith.constant 0 : i32
    %c0_i32_1 = arith.constant 0 : i32
    return %c0_i32, %c0_i32_0 : i32, i32
  }
  func.func @transform_2(%arg0: i32) -> (i32, i32) {
    %c0_i32 = arith.constant 0 : i32
    %c0_i32_0 = arith.constant 0 : i32
    %c0_i32_1 = arith.constant 0 : i32
    return %c0_i32, %c0_i32_0 : i32, i32
  }
  func.func @transform_3(%arg0: i32) -> (i32, i32, i32) {
    %c0_i32 = arith.constant 0 : i32
    %c0_i32_0 = arith.constant 0 : i32
    %c0_i32_1 = arith.constant 0 : i32
    return %arg0, %c0_i32, %c0_i32_0 : i32, i32, i32
  }
}

module attributes {stable_mosaic.version = 11 : i64} {
  func.func @_mha_block_kernel(%arg0: i32, %arg1: memref<1x6x32xf32, #tpu.memory_space<vmem>>, %arg2: memref<1x6x32xf32, #tpu.memory_space<vmem>>, %arg3: memref<1x6x6xf32, #tpu.memory_space<vmem>>, %arg4: memref<32x96xbf16, #tpu.memory_space<vmem>>, %arg5: memref<1x96xf32, #tpu.memory_space<vmem>>, %arg6: memref<4x8x32xbf16, #tpu.memory_space<vmem>>, %arg7: memref<1x32xf32, #tpu.memory_space<vmem>>, %arg8: memref<1x32xf32, #tpu.memory_space<vmem>>, %arg9: memref<1x32xf32, #tpu.memory_space<vmem>>, %arg10: memref<1x6x32xf32, #tpu.memory_space<vmem>>) attributes {dimension_semantics = [#tpu.dimension_semantics<parallel>], iteration_bounds = array<i64: 2>, scalar_prefetch = 0 : i64, scratch_operands = 0 : i64, tpu.core_type = #tpu.core_type<tc>, window_params = [{transform_indices = @transform_0, window_bounds = array<i64: 1, 6, 32>}, {transform_indices = @transform_1, window_bounds = array<i64: 1, 6, 32>}, {transform_indices = @transform_2, window_bounds = array<i64: 1, 6, 6>}, {pipeline_mode = #tpu.pipeline_mode<synchronous>, transform_indices = @transform_3, window_bounds = array<i64: 32, 96>}, {pipeline_mode = #tpu.pipeline_mode<synchronous>, transform_indices = @transform_4, window_bounds = array<i64: 1, 96>}, {pipeline_mode = #tpu.pipeline_mode<synchronous>, transform_indices = @transform_5, window_bounds = array<i64: 4, 8, 32>}, {pipeline_mode = #tpu.pipeline_mode<synchronous>, transform_indices = @transform_6, window_bounds = array<i64: 1, 32>}, {pipeline_mode = #tpu.pipeline_mode<synchronous>, transform_indices = @transform_7, window_bounds = array<i64: 1, 32>}, {pipeline_mode = #tpu.pipeline_mode<synchronous>, transform_indices = @transform_8, window_bounds = array<i64: 1, 32>}, {transform_indices = @transform_9, window_bounds = array<i64: 1, 6, 32>}]} {
    %c0 = arith.constant 0 : index
    %c0_0 = arith.constant 0 : index
    %c0_1 = arith.constant 0 : index
    %0 = vector.load %arg1[%c0, %c0_0, %c0_1] : memref<1x6x32xf32, #tpu.memory_space<vmem>>, vector<1x6x32xf32>
    %1 = vector.shape_cast %0 : vector<1x6x32xf32> to vector<6x32xf32>
    %c0_2 = arith.constant 0 : index
    %c0_3 = arith.constant 0 : index
    %c0_4 = arith.constant 0 : index
    %2 = vector.load %arg2[%c0_2, %c0_3, %c0_4] : memref<1x6x32xf32, #tpu.memory_space<vmem>>, vector<1x6x32xf32>
    %3 = vector.shape_cast %2 : vector<1x6x32xf32> to vector<6x32xf32>
    %c0_5 = arith.constant 0 : index
    %c0_6 = arith.constant 0 : index
    %4 = vector.load %arg4[%c0_5, %c0_6] : memref<32x96xbf16, #tpu.memory_space<vmem>>, vector<32x96xbf16>
    %c0_7 = arith.constant 0 : index
    %c0_8 = arith.constant 0 : index
    %5 = vector.load %arg5[%c0_7, %c0_8] : memref<1x96xf32, #tpu.memory_space<vmem>>, vector<1x96xf32>
    %6 = arith.truncf %1 : vector<6x32xf32> to vector<6x32xbf16>
    %7 = arith.truncf %3 : vector<6x32xf32> to vector<6x32xbf16>
    %8 = vector.extract_strided_slice %4 {offsets = [0, 0], sizes = [32, 32], strides = [1, 1]} : vector<32x96xbf16> to vector<32x32xbf16>
    %cst = arith.constant dense<0.000000e+00> : vector<6x32xf32>
    %9 = tpu.matmul %6, %8, %cst {dimension_numbers = #tpu.dot_dimension_numbers<[1], [0], [0], [1], [0, 0, 1, 1], [], []>} : vector<6x32xbf16>, vector<32x32xbf16>, vector<6x32xf32> -> vector<6x32xf32>
    %10 = vector.extract_strided_slice %5 {offsets = [0, 0], sizes = [1, 32], strides = [1, 1]} : vector<1x96xf32> to vector<1x32xf32>
    %11 = vector.broadcast %10 : vector<1x32xf32> to vector<6x32xf32>
    %12 = arith.addf %9, %11 : vector<6x32xf32>
    %13 = vector.extract_strided_slice %4 {offsets = [0, 32], sizes = [32, 64], strides = [1, 1]} : vector<32x96xbf16> to vector<32x64xbf16>
    %cst_9 = arith.constant dense<0.000000e+00> : vector<6x64xf32>
    %14 = tpu.matmul %7, %13, %cst_9 {dimension_numbers = #tpu.dot_dimension_numbers<[1], [0], [0], [1], [0, 0, 1, 1], [], []>} : vector<6x32xbf16>, vector<32x64xbf16>, vector<6x64xf32> -> vector<6x64xf32>
    %15 = vector.extract_strided_slice %5 {offsets = [0, 32], sizes = [1, 64], strides = [1, 1]} : vector<1x96xf32> to vector<1x64xf32>
    %16 = vector.broadcast %15 : vector<1x64xf32> to vector<6x64xf32>
    %17 = arith.addf %14, %16 : vector<6x64xf32>
    %18 = vector.extract_strided_slice %17 {offsets = [0, 0], sizes = [6, 32], strides = [1, 1]} : vector<6x64xf32> to vector<6x32xf32>
    %19 = vector.extract_strided_slice %17 {offsets = [0, 32], sizes = [6, 32], strides = [1, 1]} : vector<6x64xf32> to vector<6x32xf32>
    %c0_10 = arith.constant 0 : index
    %c0_11 = arith.constant 0 : index
    %c0_12 = arith.constant 0 : index
    %20 = vector.load %arg3[%c0_10, %c0_11, %c0_12] : memref<1x6x6xf32, #tpu.memory_space<vmem>>, vector<1x6x6xf32>
    %21 = vector.shape_cast %20 : vector<1x6x6xf32> to vector<6x6xf32>
    %cst_13 = arith.constant 0.000000e+00 : f32
    %22 = vector.broadcast %cst_13 : f32 to vector<6x32xf32>
    %23 = vector.extract_strided_slice %12 {offsets = [0, 0], sizes = [6, 8], strides = [1, 1]} : vector<6x32xf32> to vector<6x8xf32>
    %24 = arith.truncf %23 : vector<6x8xf32> to vector<6x8xbf16>
    %25 = vector.extract_strided_slice %18 {offsets = [0, 0], sizes = [6, 8], strides = [1, 1]} : vector<6x32xf32> to vector<6x8xf32>
    %26 = arith.truncf %25 : vector<6x8xf32> to vector<6x8xbf16>
    %27 = vector.extract_strided_slice %19 {offsets = [0, 0], sizes = [6, 8], strides = [1, 1]} : vector<6x32xf32> to vector<6x8xf32>
    %28 = arith.truncf %27 : vector<6x8xf32> to vector<6x8xbf16>
    %cst_14 = arith.constant dense<0.000000e+00> : vector<6x6xf32>
    %29 = tpu.matmul %24, %26, %cst_14 {dimension_numbers = #tpu.dot_dimension_numbers<[1], [1], [0], [0], [0, 0, 1, 0], [], []>} : vector<6x8xbf16>, vector<6x8xbf16>, vector<6x6xf32> -> vector<6x6xf32>
    %cst_15 = arith.constant 0.353553385 : f32
    %30 = vector.broadcast %cst_15 : f32 to vector<6x6xf32>
    %31 = arith.mulf %29, %30 : vector<6x6xf32>
    %32 = arith.addf %31, %21 : vector<6x6xf32>
    %cst_16 = arith.constant dense<0xFF800000> : vector<6xf32>
    %33 = vector.multi_reduction <maximumf>, %32, %cst_16 [1] : vector<6x6xf32> to vector<6xf32>
    %34 = vector.shape_cast %33 : vector<6xf32> to vector<6x1xf32>
    %35 = vector.broadcast %34 : vector<6x1xf32> to vector<6x6xf32>
    %36 = arith.subf %32, %35 : vector<6x6xf32>
    %37 = math.exp %36 : vector<6x6xf32>
    %cst_17 = arith.constant dense<0.000000e+00> : vector<6xf32>
    %38 = vector.multi_reduction <add>, %37, %cst_17 [1] : vector<6x6xf32> to vector<6xf32>
    %39 = vector.shape_cast %38 : vector<6xf32> to vector<6x1xf32>
    %40 = tpu.reciprocal %39 {approx = true} : vector<6x1xf32> -> vector<6x1xf32>
    %41 = vector.broadcast %40 : vector<6x1xf32> to vector<6x6xf32>
    %42 = arith.mulf %37, %41 : vector<6x6xf32>
    %43 = arith.truncf %42 : vector<6x6xf32> to vector<6x6xbf16>
    %cst_18 = arith.constant dense<0.000000e+00> : vector<6x8xf32>
    %44 = tpu.matmul %43, %28, %cst_18 {dimension_numbers = #tpu.dot_dimension_numbers<[1], [0], [0], [1], [0, 0, 1, 1], [], []>} : vector<6x6xbf16>, vector<6x8xbf16>, vector<6x8xf32> -> vector<6x8xf32>
    %45 = arith.truncf %44 : vector<6x8xf32> to vector<6x8xbf16>
    %c0_19 = arith.constant 0 : index
    %c0_20 = arith.constant 0 : index
    %c0_21 = arith.constant 0 : index
    %46 = vector.load %arg6[%c0_19, %c0_20, %c0_21] : memref<4x8x32xbf16, #tpu.memory_space<vmem>>, vector<1x8x32xbf16>
    %47 = vector.shape_cast %46 : vector<1x8x32xbf16> to vector<8x32xbf16>
    %cst_22 = arith.constant dense<0.000000e+00> : vector<6x32xf32>
    %48 = tpu.matmul %45, %47, %cst_22 {dimension_numbers = #tpu.dot_dimension_numbers<[1], [0], [0], [1], [0, 0, 1, 1], [], []>} : vector<6x8xbf16>, vector<8x32xbf16>, vector<6x32xf32> -> vector<6x32xf32>
    %49 = arith.addf %22, %48 : vector<6x32xf32>
    %50 = vector.extract_strided_slice %12 {offsets = [0, 8], sizes = [6, 8], strides = [1, 1]} : vector<6x32xf32> to vector<6x8xf32>
    %51 = arith.truncf %50 : vector<6x8xf32> to vector<6x8xbf16>
    %52 = vector.extract_strided_slice %18 {offsets = [0, 8], sizes = [6, 8], strides = [1, 1]} : vector<6x32xf32> to vector<6x8xf32>
    %53 = arith.truncf %52 : vector<6x8xf32> to vector<6x8xbf16>
    %54 = vector.extract_strided_slice %19 {offsets = [0, 8], sizes = [6, 8], strides = [1, 1]} : vector<6x32xf32> to vector<6x8xf32>
    %55 = arith.truncf %54 : vector<6x8xf32> to vector<6x8xbf16>
    %cst_23 = arith.constant dense<0.000000e+00> : vector<6x6xf32>
    %56 = tpu.matmul %51, %53, %cst_23 {dimension_numbers = #tpu.dot_dimension_numbers<[1], [1], [0], [0], [0, 0, 1, 0], [], []>} : vector<6x8xbf16>, vector<6x8xbf16>, vector<6x6xf32> -> vector<6x6xf32>
    %cst_24 = arith.constant 0.353553385 : f32
    %57 = vector.broadcast %cst_24 : f32 to vector<6x6xf32>
    %58 = arith.mulf %56, %57 : vector<6x6xf32>
    %59 = arith.addf %58, %21 : vector<6x6xf32>
    %cst_25 = arith.constant dense<0xFF800000> : vector<6xf32>
    %60 = vector.multi_reduction <maximumf>, %59, %cst_25 [1] : vector<6x6xf32> to vector<6xf32>
    %61 = vector.shape_cast %60 : vector<6xf32> to vector<6x1xf32>
    %62 = vector.broadcast %61 : vector<6x1xf32> to vector<6x6xf32>
    %63 = arith.subf %59, %62 : vector<6x6xf32>
    %64 = math.exp %63 : vector<6x6xf32>
    %cst_26 = arith.constant dense<0.000000e+00> : vector<6xf32>
    %65 = vector.multi_reduction <add>, %64, %cst_26 [1] : vector<6x6xf32> to vector<6xf32>
    %66 = vector.shape_cast %65 : vector<6xf32> to vector<6x1xf32>
    %67 = tpu.reciprocal %66 {approx = true} : vector<6x1xf32> -> vector<6x1xf32>
    %68 = vector.broadcast %67 : vector<6x1xf32> to vector<6x6xf32>
    %69 = arith.mulf %64, %68 : vector<6x6xf32>
    %70 = arith.truncf %69 : vector<6x6xf32> to vector<6x6xbf16>
    %cst_27 = arith.constant dense<0.000000e+00> : vector<6x8xf32>
    %71 = tpu.matmul %70, %55, %cst_27 {dimension_numbers = #tpu.dot_dimension_numbers<[1], [0], [0], [1], [0, 0, 1, 1], [], []>} : vector<6x6xbf16>, vector<6x8xbf16>, vector<6x8xf32> -> vector<6x8xf32>
    %72 = arith.truncf %71 : vector<6x8xf32> to vector<6x8xbf16>
    %c1 = arith.constant 1 : index
    %c0_28 = arith.constant 0 : index
    %c0_29 = arith.constant 0 : index
    %73 = vector.load %arg6[%c1, %c0_28, %c0_29] : memref<4x8x32xbf16, #tpu.memory_space<vmem>>, vector<1x8x32xbf16>
    %74 = vector.shape_cast %73 : vector<1x8x32xbf16> to vector<8x32xbf16>
    %cst_30 = arith.constant dense<0.000000e+00> : vector<6x32xf32>
    %75 = tpu.matmul %72, %74, %cst_30 {dimension_numbers = #tpu.dot_dimension_numbers<[1], [0], [0], [1], [0, 0, 1, 1], [], []>} : vector<6x8xbf16>, vector<8x32xbf16>, vector<6x32xf32> -> vector<6x32xf32>
    %76 = arith.addf %49, %75 : vector<6x32xf32>
    %77 = vector.extract_strided_slice %12 {offsets = [0, 16], sizes = [6, 8], strides = [1, 1]} : vector<6x32xf32> to vector<6x8xf32>
    %78 = arith.truncf %77 : vector<6x8xf32> to vector<6x8xbf16>
    %79 = vector.extract_strided_slice %18 {offsets = [0, 16], sizes = [6, 8], strides = [1, 1]} : vector<6x32xf32> to vector<6x8xf32>
    %80 = arith.truncf %79 : vector<6x8xf32> to vector<6x8xbf16>
    %81 = vector.extract_strided_slice %19 {offsets = [0, 16], sizes = [6, 8], strides = [1, 1]} : vector<6x32xf32> to vector<6x8xf32>
    %82 = arith.truncf %81 : vector<6x8xf32> to vector<6x8xbf16>
    %cst_31 = arith.constant dense<0.000000e+00> : vector<6x6xf32>
    %83 = tpu.matmul %78, %80, %cst_31 {dimension_numbers = #tpu.dot_dimension_numbers<[1], [1], [0], [0], [0, 0, 1, 0], [], []>} : vector<6x8xbf16>, vector<6x8xbf16>, vector<6x6xf32> -> vector<6x6xf32>
    %cst_32 = arith.constant 0.353553385 : f32
    %84 = vector.broadcast %cst_32 : f32 to vector<6x6xf32>
    %85 = arith.mulf %83, %84 : vector<6x6xf32>
    %86 = arith.addf %85, %21 : vector<6x6xf32>
    %cst_33 = arith.constant dense<0xFF800000> : vector<6xf32>
    %87 = vector.multi_reduction <maximumf>, %86, %cst_33 [1] : vector<6x6xf32> to vector<6xf32>
    %88 = vector.shape_cast %87 : vector<6xf32> to vector<6x1xf32>
    %89 = vector.broadcast %88 : vector<6x1xf32> to vector<6x6xf32>
    %90 = arith.subf %86, %89 : vector<6x6xf32>
    %91 = math.exp %90 : vector<6x6xf32>
    %cst_34 = arith.constant dense<0.000000e+00> : vector<6xf32>
    %92 = vector.multi_reduction <add>, %91, %cst_34 [1] : vector<6x6xf32> to vector<6xf32>
    %93 = vector.shape_cast %92 : vector<6xf32> to vector<6x1xf32>
    %94 = tpu.reciprocal %93 {approx = true} : vector<6x1xf32> -> vector<6x1xf32>
    %95 = vector.broadcast %94 : vector<6x1xf32> to vector<6x6xf32>
    %96 = arith.mulf %91, %95 : vector<6x6xf32>
    %97 = arith.truncf %96 : vector<6x6xf32> to vector<6x6xbf16>
    %cst_35 = arith.constant dense<0.000000e+00> : vector<6x8xf32>
    %98 = tpu.matmul %97, %82, %cst_35 {dimension_numbers = #tpu.dot_dimension_numbers<[1], [0], [0], [1], [0, 0, 1, 1], [], []>} : vector<6x6xbf16>, vector<6x8xbf16>, vector<6x8xf32> -> vector<6x8xf32>
    %99 = arith.truncf %98 : vector<6x8xf32> to vector<6x8xbf16>
    %c2 = arith.constant 2 : index
    %c0_36 = arith.constant 0 : index
    %c0_37 = arith.constant 0 : index
    %100 = vector.load %arg6[%c2, %c0_36, %c0_37] : memref<4x8x32xbf16, #tpu.memory_space<vmem>>, vector<1x8x32xbf16>
    %101 = vector.shape_cast %100 : vector<1x8x32xbf16> to vector<8x32xbf16>
    %cst_38 = arith.constant dense<0.000000e+00> : vector<6x32xf32>
    %102 = tpu.matmul %99, %101, %cst_38 {dimension_numbers = #tpu.dot_dimension_numbers<[1], [0], [0], [1], [0, 0, 1, 1], [], []>} : vector<6x8xbf16>, vector<8x32xbf16>, vector<6x32xf32> -> vector<6x32xf32>
    %103 = arith.addf %76, %102 : vector<6x32xf32>
    %104 = vector.extract_strided_slice %12 {offsets = [0, 24], sizes = [6, 8], strides = [1, 1]} : vector<6x32xf32> to vector<6x8xf32>
    %105 = arith.truncf %104 : vector<6x8xf32> to vector<6x8xbf16>
    %106 = vector.extract_strided_slice %18 {offsets = [0, 24], sizes = [6, 8], strides = [1, 1]} : vector<6x32xf32> to vector<6x8xf32>
    %107 = arith.truncf %106 : vector<6x8xf32> to vector<6x8xbf16>
    %108 = vector.extract_strided_slice %19 {offsets = [0, 24], sizes = [6, 8], strides = [1, 1]} : vector<6x32xf32> to vector<6x8xf32>
    %109 = arith.truncf %108 : vector<6x8xf32> to vector<6x8xbf16>
    %cst_39 = arith.constant dense<0.000000e+00> : vector<6x6xf32>
    %110 = tpu.matmul %105, %107, %cst_39 {dimension_numbers = #tpu.dot_dimension_numbers<[1], [1], [0], [0], [0, 0, 1, 0], [], []>} : vector<6x8xbf16>, vector<6x8xbf16>, vector<6x6xf32> -> vector<6x6xf32>
    %cst_40 = arith.constant 0.353553385 : f32
    %111 = vector.broadcast %cst_40 : f32 to vector<6x6xf32>
    %112 = arith.mulf %110, %111 : vector<6x6xf32>
    %113 = arith.addf %112, %21 : vector<6x6xf32>
    %cst_41 = arith.constant dense<0xFF800000> : vector<6xf32>
    %114 = vector.multi_reduction <maximumf>, %113, %cst_41 [1] : vector<6x6xf32> to vector<6xf32>
    %115 = vector.shape_cast %114 : vector<6xf32> to vector<6x1xf32>
    %116 = vector.broadcast %115 : vector<6x1xf32> to vector<6x6xf32>
    %117 = arith.subf %113, %116 : vector<6x6xf32>
    %118 = math.exp %117 : vector<6x6xf32>
    %cst_42 = arith.constant dense<0.000000e+00> : vector<6xf32>
    %119 = vector.multi_reduction <add>, %118, %cst_42 [1] : vector<6x6xf32> to vector<6xf32>
    %120 = vector.shape_cast %119 : vector<6xf32> to vector<6x1xf32>
    %121 = tpu.reciprocal %120 {approx = true} : vector<6x1xf32> -> vector<6x1xf32>
    %122 = vector.broadcast %121 : vector<6x1xf32> to vector<6x6xf32>
    %123 = arith.mulf %118, %122 : vector<6x6xf32>
    %124 = arith.truncf %123 : vector<6x6xf32> to vector<6x6xbf16>
    %cst_43 = arith.constant dense<0.000000e+00> : vector<6x8xf32>
    %125 = tpu.matmul %124, %109, %cst_43 {dimension_numbers = #tpu.dot_dimension_numbers<[1], [0], [0], [1], [0, 0, 1, 1], [], []>} : vector<6x6xbf16>, vector<6x8xbf16>, vector<6x8xf32> -> vector<6x8xf32>
    %126 = arith.truncf %125 : vector<6x8xf32> to vector<6x8xbf16>
    %c3 = arith.constant 3 : index
    %c0_44 = arith.constant 0 : index
    %c0_45 = arith.constant 0 : index
    %127 = vector.load %arg6[%c3, %c0_44, %c0_45] : memref<4x8x32xbf16, #tpu.memory_space<vmem>>, vector<1x8x32xbf16>
    %128 = vector.shape_cast %127 : vector<1x8x32xbf16> to vector<8x32xbf16>
    %cst_46 = arith.constant dense<0.000000e+00> : vector<6x32xf32>
    %129 = tpu.matmul %126, %128, %cst_46 {dimension_numbers = #tpu.dot_dimension_numbers<[1], [0], [0], [1], [0, 0, 1, 1], [], []>} : vector<6x8xbf16>, vector<8x32xbf16>, vector<6x32xf32> -> vector<6x32xf32>
    %130 = arith.addf %103, %129 : vector<6x32xf32>
    %131 = arith.addf %1, %130 : vector<6x32xf32>
    %c0_47 = arith.constant 0 : index
    %c0_48 = arith.constant 0 : index
    %132 = vector.load %arg7[%c0_47, %c0_48] : memref<1x32xf32, #tpu.memory_space<vmem>>, vector<1x32xf32>
    %133 = vector.broadcast %132 : vector<1x32xf32> to vector<6x32xf32>
    %134 = arith.addf %131, %133 : vector<6x32xf32>
    %cst_49 = arith.constant dense<0.000000e+00> : vector<6xf32>
    %135 = vector.multi_reduction <add>, %134, %cst_49 [1] : vector<6x32xf32> to vector<6xf32>
    %136 = vector.shape_cast %135 : vector<6xf32> to vector<6x1xf32>
    %cst_50 = arith.constant 3.200000e+01 : f32
    %137 = vector.broadcast %cst_50 : f32 to vector<6x1xf32>
    %138 = arith.divf %136, %137 : vector<6x1xf32>
    %139 = vector.broadcast %138 : vector<6x1xf32> to vector<6x32xf32>
    %140 = arith.subf %134, %139 : vector<6x32xf32>
    %141 = arith.mulf %140, %140 : vector<6x32xf32>
    %cst_51 = arith.constant dense<0.000000e+00> : vector<6xf32>
    %142 = vector.multi_reduction <add>, %141, %cst_51 [1] : vector<6x32xf32> to vector<6xf32>
    %143 = vector.shape_cast %142 : vector<6xf32> to vector<6x1xf32>
    %cst_52 = arith.constant 3.200000e+01 : f32
    %144 = vector.broadcast %cst_52 : f32 to vector<6x1xf32>
    %145 = arith.divf %143, %144 : vector<6x1xf32>
    %146 = vector.broadcast %138 : vector<6x1xf32> to vector<6x32xf32>
    %147 = arith.subf %134, %146 : vector<6x32xf32>
    %cst_53 = arith.constant 9.99999974E-6 : f32
    %148 = vector.broadcast %cst_53 : f32 to vector<6x1xf32>
    %149 = arith.addf %145, %148 : vector<6x1xf32>
    %150 = math.rsqrt %149 : vector<6x1xf32>
    %151 = vector.broadcast %150 : vector<6x1xf32> to vector<6x32xf32>
    %152 = arith.mulf %147, %151 : vector<6x32xf32>
    %c0_54 = arith.constant 0 : index
    %c0_55 = arith.constant 0 : index
    %153 = vector.load %arg8[%c0_54, %c0_55] : memref<1x32xf32, #tpu.memory_space<vmem>>, vector<1x32xf32>
    %154 = vector.broadcast %153 : vector<1x32xf32> to vector<6x32xf32>
    %155 = arith.mulf %152, %154 : vector<6x32xf32>
    %c0_56 = arith.constant 0 : index
    %c0_57 = arith.constant 0 : index
    %156 = vector.load %arg9[%c0_56, %c0_57] : memref<1x32xf32, #tpu.memory_space<vmem>>, vector<1x32xf32>
    %157 = vector.broadcast %156 : vector<1x32xf32> to vector<6x32xf32>
    %158 = arith.addf %155, %157 : vector<6x32xf32>
    %c0_58 = arith.constant 0 : index
    %c0_59 = arith.constant 0 : index
    %c0_60 = arith.constant 0 : index
    %159 = vector.load %arg10[%c0_58, %c0_59, %c0_60] : memref<1x6x32xf32, #tpu.memory_space<vmem>>, vector<1x6x32xf32>
    %160 = vector.shape_cast %159 : vector<1x6x32xf32> to vector<6x32xf32>
    %161 = vector.shape_cast %158 : vector<6x32xf32> to vector<1x6x32xf32>
    tpu.vector_store %arg10[%c0_58, %c0_59, %c0_60], %161 {strides = array<i32>} : memref<1x6x32xf32, #tpu.memory_space<vmem>>, vector<1x6x32xf32>,
    return
  }
  func.func @transform_0(%arg0: i32) -> (i32, i32, i32) {
    %c0_i32 = arith.constant 0 : i32
    %c0_i32_0 = arith.constant 0 : i32
    %c0_i32_1 = arith.constant 0 : i32
    return %arg0, %c0_i32, %c0_i32_0 : i32, i32, i32
  }
  func.func @transform_1(%arg0: i32) -> (i32, i32, i32) {
    %c0_i32 = arith.constant 0 : i32
    %c0_i32_0 = arith.constant 0 : i32
    %c0_i32_1 = arith.constant 0 : i32
    return %arg0, %c0_i32, %c0_i32_0 : i32, i32, i32
  }
  func.func @transform_2(%arg0: i32) -> (i32, i32, i32) {
    %c0_i32 = arith.constant 0 : i32
    %c0_i32_0 = arith.constant 0 : i32
    %c0_i32_1 = arith.constant 0 : i32
    return %arg0, %c0_i32, %c0_i32_0 : i32, i32, i32
  }
  func.func @transform_3(%arg0: i32) -> (i32, i32) {
    %c0_i32 = arith.constant 0 : i32
    %c0_i32_0 = arith.constant 0 : i32
    %c0_i32_1 = arith.constant 0 : i32
    return %c0_i32, %c0_i32_0 : i32, i32
  }
  func.func @transform_4(%arg0: i32) -> (i32, i32) {
    %c0_i32 = arith.constant 0 : i32
    %c0_i32_0 = arith.constant 0 : i32
    %c0_i32_1 = arith.constant 0 : i32
    return %c0_i32, %c0_i32_0 : i32, i32
  }
  func.func @transform_5(%arg0: i32) -> (i32, i32, i32) {
    %c0_i32 = arith.constant 0 : i32
    %c0_i32_0 = arith.constant 0 : i32
    %c0_i32_1 = arith.constant 0 : i32
    %c0_i32_2 = arith.constant 0 : i32
    return %c0_i32, %c0_i32_0, %c0_i32_1 : i32, i32, i32
  }
  func.func @transform_6(%arg0: i32) -> (i32, i32) {
    %c0_i32 = arith.constant 0 : i32
    %c0_i32_0 = arith.constant 0 : i32
    %c0_i32_1 = arith.constant 0 : i32
    return %c0_i32, %c0_i32_0 : i32, i32
  }
  func.func @transform_7(%arg0: i32) -> (i32, i32) {
    %c0_i32 = arith.constant 0 : i32
    %c0_i32_0 = arith.constant 0 : i32
    %c0_i32_1 = arith.constant 0 : i32
    return %c0_i32, %c0_i32_0 : i32, i32
  }
  func.func @transform_8(%arg0: i32) -> (i32, i32) {
    %c0_i32 = arith.constant 0 : i32
    %c0_i32_0 = arith.constant 0 : i32
    %c0_i32_1 = arith.constant 0 : i32
    return %c0_i32, %c0_i32_0 : i32, i32
  }
  func.func @transform_9(%arg0: i32) -> (i32, i32, i32) {
    %c0_i32 = arith.constant 0 : i32
    %c0_i32_0 = arith.constant 0 : i32
    %c0_i32_1 = arith.constant 0 : i32
    return %arg0, %c0_i32, %c0_i32_0 : i32, i32, i32
  }
}

module attributes {stable_mosaic.version = 11 : i64} {
  func.func @_mha_block_kernel(%arg0: i32, %arg1: memref<1x6x32xf32, #tpu.memory_space<vmem>>, %arg2: memref<1x8x32xf32, #tpu.memory_space<vmem>>, %arg3: memref<1x6x8xf32, #tpu.memory_space<vmem>>, %arg4: memref<32x96xbf16, #tpu.memory_space<vmem>>, %arg5: memref<1x96xf32, #tpu.memory_space<vmem>>, %arg6: memref<4x8x32xbf16, #tpu.memory_space<vmem>>, %arg7: memref<1x32xf32, #tpu.memory_space<vmem>>, %arg8: memref<1x32xf32, #tpu.memory_space<vmem>>, %arg9: memref<1x32xf32, #tpu.memory_space<vmem>>, %arg10: memref<1x6x32xf32, #tpu.memory_space<vmem>>) attributes {dimension_semantics = [#tpu.dimension_semantics<parallel>], iteration_bounds = array<i64: 2>, scalar_prefetch = 0 : i64, scratch_operands = 0 : i64, tpu.core_type = #tpu.core_type<tc>, window_params = [{transform_indices = @transform_0, window_bounds = array<i64: 1, 6, 32>}, {transform_indices = @transform_1, window_bounds = array<i64: 1, 8, 32>}, {transform_indices = @transform_2, window_bounds = array<i64: 1, 6, 8>}, {pipeline_mode = #tpu.pipeline_mode<synchronous>, transform_indices = @transform_3, window_bounds = array<i64: 32, 96>}, {pipeline_mode = #tpu.pipeline_mode<synchronous>, transform_indices = @transform_4, window_bounds = array<i64: 1, 96>}, {pipeline_mode = #tpu.pipeline_mode<synchronous>, transform_indices = @transform_5, window_bounds = array<i64: 4, 8, 32>}, {pipeline_mode = #tpu.pipeline_mode<synchronous>, transform_indices = @transform_6, window_bounds = array<i64: 1, 32>}, {pipeline_mode = #tpu.pipeline_mode<synchronous>, transform_indices = @transform_7, window_bounds = array<i64: 1, 32>}, {pipeline_mode = #tpu.pipeline_mode<synchronous>, transform_indices = @transform_8, window_bounds = array<i64: 1, 32>}, {transform_indices = @transform_9, window_bounds = array<i64: 1, 6, 32>}]} {
    %c0 = arith.constant 0 : index
    %c0_0 = arith.constant 0 : index
    %c0_1 = arith.constant 0 : index
    %0 = vector.load %arg1[%c0, %c0_0, %c0_1] : memref<1x6x32xf32, #tpu.memory_space<vmem>>, vector<1x6x32xf32>
    %1 = vector.shape_cast %0 : vector<1x6x32xf32> to vector<6x32xf32>
    %c0_2 = arith.constant 0 : index
    %c0_3 = arith.constant 0 : index
    %c0_4 = arith.constant 0 : index
    %2 = vector.load %arg2[%c0_2, %c0_3, %c0_4] : memref<1x8x32xf32, #tpu.memory_space<vmem>>, vector<1x8x32xf32>
    %3 = vector.shape_cast %2 : vector<1x8x32xf32> to vector<8x32xf32>
    %c0_5 = arith.constant 0 : index
    %c0_6 = arith.constant 0 : index
    %4 = vector.load %arg4[%c0_5, %c0_6] : memref<32x96xbf16, #tpu.memory_space<vmem>>, vector<32x96xbf16>
    %c0_7 = arith.constant 0 : index
    %c0_8 = arith.constant 0 : index
    %5 = vector.load %arg5[%c0_7, %c0_8] : memref<1x96xf32, #tpu.memory_space<vmem>>, vector<1x96xf32>
    %6 = arith.truncf %1 : vector<6x32xf32> to vector<6x32xbf16>
    %7 = arith.truncf %3 : vector<8x32xf32> to vector<8x32xbf16>
    %8 = vector.extract_strided_slice %4 {offsets = [0, 0], sizes = [32, 32], strides = [1, 1]} : vector<32x96xbf16> to vector<32x32xbf16>
    %cst = arith.constant dense<0.000000e+00> : vector<6x32xf32>
    %9 = tpu.matmul %6, %8, %cst {dimension_numbers = #tpu.dot_dimension_numbers<[1], [0], [0], [1], [0, 0, 1, 1], [], []>} : vector<6x32xbf16>, vector<32x32xbf16>, vector<6x32xf32> -> vector<6x32xf32>
    %10 = vector.extract_strided_slice %5 {offsets = [0, 0], sizes = [1, 32], strides = [1, 1]} : vector<1x96xf32> to vector<1x32xf32>
    %11 = vector.broadcast %10 : vector<1x32xf32> to vector<6x32xf32>
    %12 = arith.addf %9, %11 : vector<6x32xf32>
    %13 = vector.extract_strided_slice %4 {offsets = [0, 32], sizes = [32, 64], strides = [1, 1]} : vector<32x96xbf16> to vector<32x64xbf16>
    %cst_9 = arith.constant dense<0.000000e+00> : vector<8x64xf32>
    %14 = tpu.matmul %7, %13, %cst_9 {dimension_numbers = #tpu.dot_dimension_numbers<[1], [0], [0], [1], [0, 0, 1, 1], [], []>} : vector<8x32xbf16>, vector<32x64xbf16>, vector<8x64xf32> -> vector<8x64xf32>
    %15 = vector.extract_strided_slice %5 {offsets = [0, 32], sizes = [1, 64], strides = [1, 1]} : vector<1x96xf32> to vector<1x64xf32>
    %16 = vector.broadcast %15 : vector<1x64xf32> to vector<8x64xf32>
    %17 = arith.addf %14, %16 : vector<8x64xf32>
    %18 = vector.extract_strided_slice %17 {offsets = [0, 0], sizes = [8, 32], strides = [1, 1]} : vector<8x64xf32> to vector<8x32xf32>
    %19 = vector.extract_strided_slice %17 {offsets = [0, 32], sizes = [8, 32], strides = [1, 1]} : vector<8x64xf32> to vector<8x32xf32>
    %c0_10 = arith.constant 0 : index
    %c0_11 = arith.constant 0 : index
    %c0_12 = arith.constant 0 : index
    %20 = vector.load %arg3[%c0_10, %c0_11, %c0_12] : memref<1x6x8xf32, #tpu.memory_space<vmem>>, vector<1x6x8xf32>
    %21 = vector.shape_cast %20 : vector<1x6x8xf32> to vector<6x8xf32>
    %cst_13 = arith.constant 0.000000e+00 : f32
    %22 = vector.broadcast %cst_13 : f32 to vector<6x32xf32>
    %23 = vector.extract_strided_slice %12 {offsets = [0, 0], sizes = [6, 8], strides = [1, 1]} : vector<6x32xf32> to vector<6x8xf32>
    %24 = arith.truncf %23 : vector<6x8xf32> to vector<6x8xbf16>
    %25 = vector.extract_strided_slice %18 {offsets = [0, 0], sizes = [8, 8], strides = [1, 1]} : vector<8x32xf32> to vector<8x8xf32>
    %26 = arith.truncf %25 : vector<8x8xf32> to vector<8x8xbf16>
    %27 = vector.extract_strided_slice %19 {offsets = [0, 0], sizes = [8, 8], strides = [1, 1]} : vector<8x32xf32> to vector<8x8xf32>
    %28 = arith.truncf %27 : vector<8x8xf32> to vector<8x8xbf16>
    %cst_14 = arith.constant dense<0.000000e+00> : vector<6x8xf32>
    %29 = tpu.matmul %24, %26, %cst_14 {dimension_numbers = #tpu.dot_dimension_numbers<[1], [1], [0], [0], [0, 0, 1, 0], [], []>} : vector<6x8xbf16>, vector<8x8xbf16>, vector<6x8xf32> -> vector<6x8xf32>
    %cst_15 = arith.constant 0.353553385 : f32
    %30 = vector.broadcast %cst_15 : f32 to vector<6x8xf32>
    %31 = arith.mulf %29, %30 : vector<6x8xf32>
    %32 = arith.addf %31, %21 : vector<6x8xf32>
    %cst_16 = arith.constant dense<0xFF800000> : vector<6xf32>
    %33 = vector.multi_reduction <maximumf>, %32, %cst_16 [1] : vector<6x8xf32> to vector<6xf32>
    %34 = vector.shape_cast %33 : vector<6xf32> to vector<6x1xf32>
    %35 = vector.broadcast %34 : vector<6x1xf32> to vector<6x8xf32>
    %36 = arith.subf %32, %35 : vector<6x8xf32>
    %37 = math.exp %36 : vector<6x8xf32>
    %cst_17 = arith.constant dense<0.000000e+00> : vector<6xf32>
    %38 = vector.multi_reduction <add>, %37, %cst_17 [1] : vector<6x8xf32> to vector<6xf32>
    %39 = vector.shape_cast %38 : vector<6xf32> to vector<6x1xf32>
    %40 = tpu.reciprocal %39 {approx = true} : vector<6x1xf32> -> vector<6x1xf32>
    %41 = vector.broadcast %40 : vector<6x1xf32> to vector<6x8xf32>
    %42 = arith.mulf %37, %41 : vector<6x8xf32>
    %43 = arith.truncf %42 : vector<6x8xf32> to vector<6x8xbf16>
    %cst_18 = arith.constant dense<0.000000e+00> : vector<6x8xf32>
    %44 = tpu.matmul %43, %28, %cst_18 {dimension_numbers = #tpu.dot_dimension_numbers<[1], [0], [0], [1], [0, 0, 1, 1], [], []>} : vector<6x8xbf16>, vector<8x8xbf16>, vector<6x8xf32> -> vector<6x8xf32>
    %45 = arith.truncf %44 : vector<6x8xf32> to vector<6x8xbf16>
    %c0_19 = arith.constant 0 : index
    %c0_20 = arith.constant 0 : index
    %c0_21 = arith.constant 0 : index
    %46 = vector.load %arg6[%c0_19, %c0_20, %c0_21] : memref<4x8x32xbf16, #tpu.memory_space<vmem>>, vector<1x8x32xbf16>
    %47 = vector.shape_cast %46 : vector<1x8x32xbf16> to vector<8x32xbf16>
    %cst_22 = arith.constant dense<0.000000e+00> : vector<6x32xf32>
    %48 = tpu.matmul %45, %47, %cst_22 {dimension_numbers = #tpu.dot_dimension_numbers<[1], [0], [0], [1], [0, 0, 1, 1], [], []>} : vector<6x8xbf16>, vector<8x32xbf16>, vector<6x32xf32> -> vector<6x32xf32>
    %49 = arith.addf %22, %48 : vector<6x32xf32>
    %50 = vector.extract_strided_slice %12 {offsets = [0, 8], sizes = [6, 8], strides = [1, 1]} : vector<6x32xf32> to vector<6x8xf32>
    %51 = arith.truncf %50 : vector<6x8xf32> to vector<6x8xbf16>
    %52 = vector.extract_strided_slice %18 {offsets = [0, 8], sizes = [8, 8], strides = [1, 1]} : vector<8x32xf32> to vector<8x8xf32>
    %53 = arith.truncf %52 : vector<8x8xf32> to vector<8x8xbf16>
    %54 = vector.extract_strided_slice %19 {offsets = [0, 8], sizes = [8, 8], strides = [1, 1]} : vector<8x32xf32> to vector<8x8xf32>
    %55 = arith.truncf %54 : vector<8x8xf32> to vector<8x8xbf16>
    %cst_23 = arith.constant dense<0.000000e+00> : vector<6x8xf32>
    %56 = tpu.matmul %51, %53, %cst_23 {dimension_numbers = #tpu.dot_dimension_numbers<[1], [1], [0], [0], [0, 0, 1, 0], [], []>} : vector<6x8xbf16>, vector<8x8xbf16>, vector<6x8xf32> -> vector<6x8xf32>
    %cst_24 = arith.constant 0.353553385 : f32
    %57 = vector.broadcast %cst_24 : f32 to vector<6x8xf32>
    %58 = arith.mulf %56, %57 : vector<6x8xf32>
    %59 = arith.addf %58, %21 : vector<6x8xf32>
    %cst_25 = arith.constant dense<0xFF800000> : vector<6xf32>
    %60 = vector.multi_reduction <maximumf>, %59, %cst_25 [1] : vector<6x8xf32> to vector<6xf32>
    %61 = vector.shape_cast %60 : vector<6xf32> to vector<6x1xf32>
    %62 = vector.broadcast %61 : vector<6x1xf32> to vector<6x8xf32>
    %63 = arith.subf %59, %62 : vector<6x8xf32>
    %64 = math.exp %63 : vector<6x8xf32>
    %cst_26 = arith.constant dense<0.000000e+00> : vector<6xf32>
    %65 = vector.multi_reduction <add>, %64, %cst_26 [1] : vector<6x8xf32> to vector<6xf32>
    %66 = vector.shape_cast %65 : vector<6xf32> to vector<6x1xf32>
    %67 = tpu.reciprocal %66 {approx = true} : vector<6x1xf32> -> vector<6x1xf32>
    %68 = vector.broadcast %67 : vector<6x1xf32> to vector<6x8xf32>
    %69 = arith.mulf %64, %68 : vector<6x8xf32>
    %70 = arith.truncf %69 : vector<6x8xf32> to vector<6x8xbf16>
    %cst_27 = arith.constant dense<0.000000e+00> : vector<6x8xf32>
    %71 = tpu.matmul %70, %55, %cst_27 {dimension_numbers = #tpu.dot_dimension_numbers<[1], [0], [0], [1], [0, 0, 1, 1], [], []>} : vector<6x8xbf16>, vector<8x8xbf16>, vector<6x8xf32> -> vector<6x8xf32>
    %72 = arith.truncf %71 : vector<6x8xf32> to vector<6x8xbf16>
    %c1 = arith.constant 1 : index
    %c0_28 = arith.constant 0 : index
    %c0_29 = arith.constant 0 : index
    %73 = vector.load %arg6[%c1, %c0_28, %c0_29] : memref<4x8x32xbf16, #tpu.memory_space<vmem>>, vector<1x8x32xbf16>
    %74 = vector.shape_cast %73 : vector<1x8x32xbf16> to vector<8x32xbf16>
    %cst_30 = arith.constant dense<0.000000e+00> : vector<6x32xf32>
    %75 = tpu.matmul %72, %74, %cst_30 {dimension_numbers = #tpu.dot_dimension_numbers<[1], [0], [0], [1], [0, 0, 1, 1], [], []>} : vector<6x8xbf16>, vector<8x32xbf16>, vector<6x32xf32> -> vector<6x32xf32>
    %76 = arith.addf %49, %75 : vector<6x32xf32>
    %77 = vector.extract_strided_slice %12 {offsets = [0, 16], sizes = [6, 8], strides = [1, 1]} : vector<6x32xf32> to vector<6x8xf32>
    %78 = arith.truncf %77 : vector<6x8xf32> to vector<6x8xbf16>
    %79 = vector.extract_strided_slice %18 {offsets = [0, 16], sizes = [8, 8], strides = [1, 1]} : vector<8x32xf32> to vector<8x8xf32>
    %80 = arith.truncf %79 : vector<8x8xf32> to vector<8x8xbf16>
    %81 = vector.extract_strided_slice %19 {offsets = [0, 16], sizes = [8, 8], strides = [1, 1]} : vector<8x32xf32> to vector<8x8xf32>
    %82 = arith.truncf %81 : vector<8x8xf32> to vector<8x8xbf16>
    %cst_31 = arith.constant dense<0.000000e+00> : vector<6x8xf32>
    %83 = tpu.matmul %78, %80, %cst_31 {dimension_numbers = #tpu.dot_dimension_numbers<[1], [1], [0], [0], [0, 0, 1, 0], [], []>} : vector<6x8xbf16>, vector<8x8xbf16>, vector<6x8xf32> -> vector<6x8xf32>
    %cst_32 = arith.constant 0.353553385 : f32
    %84 = vector.broadcast %cst_32 : f32 to vector<6x8xf32>
    %85 = arith.mulf %83, %84 : vector<6x8xf32>
    %86 = arith.addf %85, %21 : vector<6x8xf32>
    %cst_33 = arith.constant dense<0xFF800000> : vector<6xf32>
    %87 = vector.multi_reduction <maximumf>, %86, %cst_33 [1] : vector<6x8xf32> to vector<6xf32>
    %88 = vector.shape_cast %87 : vector<6xf32> to vector<6x1xf32>
    %89 = vector.broadcast %88 : vector<6x1xf32> to vector<6x8xf32>
    %90 = arith.subf %86, %89 : vector<6x8xf32>
    %91 = math.exp %90 : vector<6x8xf32>
    %cst_34 = arith.constant dense<0.000000e+00> : vector<6xf32>
    %92 = vector.multi_reduction <add>, %91, %cst_34 [1] : vector<6x8xf32> to vector<6xf32>
    %93 = vector.shape_cast %92 : vector<6xf32> to vector<6x1xf32>
    %94 = tpu.reciprocal %93 {approx = true} : vector<6x1xf32> -> vector<6x1xf32>
    %95 = vector.broadcast %94 : vector<6x1xf32> to vector<6x8xf32>
    %96 = arith.mulf %91, %95 : vector<6x8xf32>
    %97 = arith.truncf %96 : vector<6x8xf32> to vector<6x8xbf16>
    %cst_35 = arith.constant dense<0.000000e+00> : vector<6x8xf32>
    %98 = tpu.matmul %97, %82, %cst_35 {dimension_numbers = #tpu.dot_dimension_numbers<[1], [0], [0], [1], [0, 0, 1, 1], [], []>} : vector<6x8xbf16>, vector<8x8xbf16>, vector<6x8xf32> -> vector<6x8xf32>
    %99 = arith.truncf %98 : vector<6x8xf32> to vector<6x8xbf16>
    %c2 = arith.constant 2 : index
    %c0_36 = arith.constant 0 : index
    %c0_37 = arith.constant 0 : index
    %100 = vector.load %arg6[%c2, %c0_36, %c0_37] : memref<4x8x32xbf16, #tpu.memory_space<vmem>>, vector<1x8x32xbf16>
    %101 = vector.shape_cast %100 : vector<1x8x32xbf16> to vector<8x32xbf16>
    %cst_38 = arith.constant dense<0.000000e+00> : vector<6x32xf32>
    %102 = tpu.matmul %99, %101, %cst_38 {dimension_numbers = #tpu.dot_dimension_numbers<[1], [0], [0], [1], [0, 0, 1, 1], [], []>} : vector<6x8xbf16>, vector<8x32xbf16>, vector<6x32xf32> -> vector<6x32xf32>
    %103 = arith.addf %76, %102 : vector<6x32xf32>
    %104 = vector.extract_strided_slice %12 {offsets = [0, 24], sizes = [6, 8], strides = [1, 1]} : vector<6x32xf32> to vector<6x8xf32>
    %105 = arith.truncf %104 : vector<6x8xf32> to vector<6x8xbf16>
    %106 = vector.extract_strided_slice %18 {offsets = [0, 24], sizes = [8, 8], strides = [1, 1]} : vector<8x32xf32> to vector<8x8xf32>
    %107 = arith.truncf %106 : vector<8x8xf32> to vector<8x8xbf16>
    %108 = vector.extract_strided_slice %19 {offsets = [0, 24], sizes = [8, 8], strides = [1, 1]} : vector<8x32xf32> to vector<8x8xf32>
    %109 = arith.truncf %108 : vector<8x8xf32> to vector<8x8xbf16>
    %cst_39 = arith.constant dense<0.000000e+00> : vector<6x8xf32>
    %110 = tpu.matmul %105, %107, %cst_39 {dimension_numbers = #tpu.dot_dimension_numbers<[1], [1], [0], [0], [0, 0, 1, 0], [], []>} : vector<6x8xbf16>, vector<8x8xbf16>, vector<6x8xf32> -> vector<6x8xf32>
    %cst_40 = arith.constant 0.353553385 : f32
    %111 = vector.broadcast %cst_40 : f32 to vector<6x8xf32>
    %112 = arith.mulf %110, %111 : vector<6x8xf32>
    %113 = arith.addf %112, %21 : vector<6x8xf32>
    %cst_41 = arith.constant dense<0xFF800000> : vector<6xf32>
    %114 = vector.multi_reduction <maximumf>, %113, %cst_41 [1] : vector<6x8xf32> to vector<6xf32>
    %115 = vector.shape_cast %114 : vector<6xf32> to vector<6x1xf32>
    %116 = vector.broadcast %115 : vector<6x1xf32> to vector<6x8xf32>
    %117 = arith.subf %113, %116 : vector<6x8xf32>
    %118 = math.exp %117 : vector<6x8xf32>
    %cst_42 = arith.constant dense<0.000000e+00> : vector<6xf32>
    %119 = vector.multi_reduction <add>, %118, %cst_42 [1] : vector<6x8xf32> to vector<6xf32>
    %120 = vector.shape_cast %119 : vector<6xf32> to vector<6x1xf32>
    %121 = tpu.reciprocal %120 {approx = true} : vector<6x1xf32> -> vector<6x1xf32>
    %122 = vector.broadcast %121 : vector<6x1xf32> to vector<6x8xf32>
    %123 = arith.mulf %118, %122 : vector<6x8xf32>
    %124 = arith.truncf %123 : vector<6x8xf32> to vector<6x8xbf16>
    %cst_43 = arith.constant dense<0.000000e+00> : vector<6x8xf32>
    %125 = tpu.matmul %124, %109, %cst_43 {dimension_numbers = #tpu.dot_dimension_numbers<[1], [0], [0], [1], [0, 0, 1, 1], [], []>} : vector<6x8xbf16>, vector<8x8xbf16>, vector<6x8xf32> -> vector<6x8xf32>
    %126 = arith.truncf %125 : vector<6x8xf32> to vector<6x8xbf16>
    %c3 = arith.constant 3 : index
    %c0_44 = arith.constant 0 : index
    %c0_45 = arith.constant 0 : index
    %127 = vector.load %arg6[%c3, %c0_44, %c0_45] : memref<4x8x32xbf16, #tpu.memory_space<vmem>>, vector<1x8x32xbf16>
    %128 = vector.shape_cast %127 : vector<1x8x32xbf16> to vector<8x32xbf16>
    %cst_46 = arith.constant dense<0.000000e+00> : vector<6x32xf32>
    %129 = tpu.matmul %126, %128, %cst_46 {dimension_numbers = #tpu.dot_dimension_numbers<[1], [0], [0], [1], [0, 0, 1, 1], [], []>} : vector<6x8xbf16>, vector<8x32xbf16>, vector<6x32xf32> -> vector<6x32xf32>
    %130 = arith.addf %103, %129 : vector<6x32xf32>
    %131 = arith.addf %1, %130 : vector<6x32xf32>
    %c0_47 = arith.constant 0 : index
    %c0_48 = arith.constant 0 : index
    %132 = vector.load %arg7[%c0_47, %c0_48] : memref<1x32xf32, #tpu.memory_space<vmem>>, vector<1x32xf32>
    %133 = vector.broadcast %132 : vector<1x32xf32> to vector<6x32xf32>
    %134 = arith.addf %131, %133 : vector<6x32xf32>
    %cst_49 = arith.constant dense<0.000000e+00> : vector<6xf32>
    %135 = vector.multi_reduction <add>, %134, %cst_49 [1] : vector<6x32xf32> to vector<6xf32>
    %136 = vector.shape_cast %135 : vector<6xf32> to vector<6x1xf32>
    %cst_50 = arith.constant 3.200000e+01 : f32
    %137 = vector.broadcast %cst_50 : f32 to vector<6x1xf32>
    %138 = arith.divf %136, %137 : vector<6x1xf32>
    %139 = vector.broadcast %138 : vector<6x1xf32> to vector<6x32xf32>
    %140 = arith.subf %134, %139 : vector<6x32xf32>
    %141 = arith.mulf %140, %140 : vector<6x32xf32>
    %cst_51 = arith.constant dense<0.000000e+00> : vector<6xf32>
    %142 = vector.multi_reduction <add>, %141, %cst_51 [1] : vector<6x32xf32> to vector<6xf32>
    %143 = vector.shape_cast %142 : vector<6xf32> to vector<6x1xf32>
    %cst_52 = arith.constant 3.200000e+01 : f32
    %144 = vector.broadcast %cst_52 : f32 to vector<6x1xf32>
    %145 = arith.divf %143, %144 : vector<6x1xf32>
    %146 = vector.broadcast %138 : vector<6x1xf32> to vector<6x32xf32>
    %147 = arith.subf %134, %146 : vector<6x32xf32>
    %cst_53 = arith.constant 9.99999974E-6 : f32
    %148 = vector.broadcast %cst_53 : f32 to vector<6x1xf32>
    %149 = arith.addf %145, %148 : vector<6x1xf32>
    %150 = math.rsqrt %149 : vector<6x1xf32>
    %151 = vector.broadcast %150 : vector<6x1xf32> to vector<6x32xf32>
    %152 = arith.mulf %147, %151 : vector<6x32xf32>
    %c0_54 = arith.constant 0 : index
    %c0_55 = arith.constant 0 : index
    %153 = vector.load %arg8[%c0_54, %c0_55] : memref<1x32xf32, #tpu.memory_space<vmem>>, vector<1x32xf32>
    %154 = vector.broadcast %153 : vector<1x32xf32> to vector<6x32xf32>
    %155 = arith.mulf %152, %154 : vector<6x32xf32>
    %c0_56 = arith.constant 0 : index
    %c0_57 = arith.constant 0 : index
    %156 = vector.load %arg9[%c0_56, %c0_57] : memref<1x32xf32, #tpu.memory_space<vmem>>, vector<1x32xf32>
    %157 = vector.broadcast %156 : vector<1x32xf32> to vector<6x32xf32>
    %158 = arith.addf %155, %157 : vector<6x32xf32>
    %c0_58 = arith.constant 0 : index
    %c0_59 = arith.constant 0 : index
    %c0_60 = arith.constant 0 : index
    %159 = vector.load %arg10[%c0_58, %c0_59, %c0_60] : memref<1x6x32xf32, #tpu.memory_space<vmem>>, vector<1x6x32xf32>
    %160 = vector.shape_cast %159 : vector<1x6x32xf32> to vector<6x32xf32>
    %161 = vector.shape_cast %158 : vector<6x32xf32> to vector<1x6x32xf32>
    tpu.vector_store %arg10[%c0_58, %c0_59, %c0_60], %161 {strides = array<i32>} : memref<1x6x32xf32, #tpu.memory_space<vmem>>, vector<1x6x32xf32>,
    return
  }
  func.func @transform_0(%arg0: i32) -> (i32, i32, i32) {
    %c0_i32 = arith.constant 0 : i32
    %c0_i32_0 = arith.constant 0 : i32
    %c0_i32_1 = arith.constant 0 : i32
    return %arg0, %c0_i32, %c0_i32_0 : i32, i32, i32
  }
  func.func @transform_1(%arg0: i32) -> (i32, i32, i32) {
    %c0_i32 = arith.constant 0 : i32
    %c0_i32_0 = arith.constant 0 : i32
    %c0_i32_1 = arith.constant 0 : i32
    return %arg0, %c0_i32, %c0_i32_0 : i32, i32, i32
  }
  func.func @transform_2(%arg0: i32) -> (i32, i32, i32) {
    %c0_i32 = arith.constant 0 : i32
    %c0_i32_0 = arith.constant 0 : i32
    %c0_i32_1 = arith.constant 0 : i32
    return %arg0, %c0_i32, %c0_i32_0 : i32, i32, i32
  }
  func.func @transform_3(%arg0: i32) -> (i32, i32) {
    %c0_i32 = arith.constant 0 : i32
    %c0_i32_0 = arith.constant 0 : i32
    %c0_i32_1 = arith.constant 0 : i32
    return %c0_i32, %c0_i32_0 : i32, i32
  }
  func.func @transform_4(%arg0: i32) -> (i32, i32) {
    %c0_i32 = arith.constant 0 : i32
    %c0_i32_0 = arith.constant 0 : i32
    %c0_i32_1 = arith.constant 0 : i32
    return %c0_i32, %c0_i32_0 : i32, i32
  }
  func.func @transform_5(%arg0: i32) -> (i32, i32, i32) {
    %c0_i32 = arith.constant 0 : i32
    %c0_i32_0 = arith.constant 0 : i32
    %c0_i32_1 = arith.constant 0 : i32
    %c0_i32_2 = arith.constant 0 : i32
    return %c0_i32, %c0_i32_0, %c0_i32_1 : i32, i32, i32
  }
  func.func @transform_6(%arg0: i32) -> (i32, i32) {
    %c0_i32 = arith.constant 0 : i32
    %c0_i32_0 = arith.constant 0 : i32
    %c0_i32_1 = arith.constant 0 : i32
    return %c0_i32, %c0_i32_0 : i32, i32
  }
  func.func @transform_7(%arg0: i32) -> (i32, i32) {
    %c0_i32 = arith.constant 0 : i32
    %c0_i32_0 = arith.constant 0 : i32
    %c0_i32_1 = arith.constant 0 : i32
    return %c0_i32, %c0_i32_0 : i32, i32
  }
  func.func @transform_8(%arg0: i32) -> (i32, i32) {
    %c0_i32 = arith.constant 0 : i32
    %c0_i32_0 = arith.constant 0 : i32
    %c0_i32_1 = arith.constant 0 : i32
    return %c0_i32, %c0_i32_0 : i32, i32
  }
  func.func @transform_9(%arg0: i32) -> (i32, i32, i32) {
    %c0_i32 = arith.constant 0 : i32
    %c0_i32_0 = arith.constant 0 : i32
    %c0_i32_1 = arith.constant 0 : i32
    return %arg0, %c0_i32, %c0_i32_0 : i32, i32, i32
  }
}

module attributes {stable_mosaic.version = 11 : i64} {
  func.func @_ffn_block_kernel(%arg0: i32, %arg1: memref<1x6x32xf32, #tpu.memory_space<vmem>>, %arg2: memref<32x64xbf16, #tpu.memory_space<vmem>>, %arg3: memref<1x64xf32, #tpu.memory_space<vmem>>, %arg4: memref<64x32xbf16, #tpu.memory_space<vmem>>, %arg5: memref<1x32xf32, #tpu.memory_space<vmem>>, %arg6: memref<1x32xf32, #tpu.memory_space<vmem>>, %arg7: memref<1x32xf32, #tpu.memory_space<vmem>>, %arg8: memref<1x6x32xf32, #tpu.memory_space<vmem>>) attributes {dimension_semantics = [#tpu.dimension_semantics<parallel>], iteration_bounds = array<i64: 2>, scalar_prefetch = 0 : i64, scratch_operands = 0 : i64, tpu.core_type = #tpu.core_type<tc>, window_params = [{transform_indices = @transform_0, window_bounds = array<i64: 1, 6, 32>}, {pipeline_mode = #tpu.pipeline_mode<synchronous>, transform_indices = @transform_1, window_bounds = array<i64: 32, 64>}, {pipeline_mode = #tpu.pipeline_mode<synchronous>, transform_indices = @transform_2, window_bounds = array<i64: 1, 64>}, {pipeline_mode = #tpu.pipeline_mode<synchronous>, transform_indices = @transform_3, window_bounds = array<i64: 64, 32>}, {pipeline_mode = #tpu.pipeline_mode<synchronous>, transform_indices = @transform_4, window_bounds = array<i64: 1, 32>}, {pipeline_mode = #tpu.pipeline_mode<synchronous>, transform_indices = @transform_5, window_bounds = array<i64: 1, 32>}, {pipeline_mode = #tpu.pipeline_mode<synchronous>, transform_indices = @transform_6, window_bounds = array<i64: 1, 32>}, {transform_indices = @transform_7, window_bounds = array<i64: 1, 6, 32>}]} {
    %c0 = arith.constant 0 : index
    %c0_0 = arith.constant 0 : index
    %c0_1 = arith.constant 0 : index
    %0 = vector.load %arg1[%c0, %c0_0, %c0_1] : memref<1x6x32xf32, #tpu.memory_space<vmem>>, vector<1x6x32xf32>
    %1 = vector.shape_cast %0 : vector<1x6x32xf32> to vector<6x32xf32>
    %2 = arith.truncf %1 : vector<6x32xf32> to vector<6x32xbf16>
    %c0_2 = arith.constant 0 : index
    %c0_3 = arith.constant 0 : index
    %3 = vector.load %arg2[%c0_2, %c0_3] : memref<32x64xbf16, #tpu.memory_space<vmem>>, vector<32x64xbf16>
    %cst = arith.constant dense<0.000000e+00> : vector<6x64xf32>
    %4 = tpu.matmul %2, %3, %cst {dimension_numbers = #tpu.dot_dimension_numbers<[1], [0], [0], [1], [0, 0, 1, 1], [], []>} : vector<6x32xbf16>, vector<32x64xbf16>, vector<6x64xf32> -> vector<6x64xf32>
    %c0_4 = arith.constant 0 : index
    %c0_5 = arith.constant 0 : index
    %5 = vector.load %arg3[%c0_4, %c0_5] : memref<1x64xf32, #tpu.memory_space<vmem>>, vector<1x64xf32>
    %6 = vector.broadcast %5 : vector<1x64xf32> to vector<6x64xf32>
    %7 = arith.addf %4, %6 : vector<6x64xf32>
    %cst_6 = arith.constant 0.000000e+00 : f32
    %8 = vector.broadcast %cst_6 : f32 to vector<6x64xf32>
    %9 = arith.maximumf %7, %8 : vector<6x64xf32>
    %10 = arith.truncf %9 : vector<6x64xf32> to vector<6x64xbf16>
    %c0_7 = arith.constant 0 : index
    %c0_8 = arith.constant 0 : index
    %11 = vector.load %arg4[%c0_7, %c0_8] : memref<64x32xbf16, #tpu.memory_space<vmem>>, vector<64x32xbf16>
    %cst_9 = arith.constant dense<0.000000e+00> : vector<6x32xf32>
    %12 = tpu.matmul %10, %11, %cst_9 {dimension_numbers = #tpu.dot_dimension_numbers<[1], [0], [0], [1], [0, 0, 1, 1], [], []>} : vector<6x64xbf16>, vector<64x32xbf16>, vector<6x32xf32> -> vector<6x32xf32>
    %13 = arith.addf %1, %12 : vector<6x32xf32>
    %c0_10 = arith.constant 0 : index
    %c0_11 = arith.constant 0 : index
    %14 = vector.load %arg5[%c0_10, %c0_11] : memref<1x32xf32, #tpu.memory_space<vmem>>, vector<1x32xf32>
    %15 = vector.broadcast %14 : vector<1x32xf32> to vector<6x32xf32>
    %16 = arith.addf %13, %15 : vector<6x32xf32>
    %cst_12 = arith.constant dense<0.000000e+00> : vector<6xf32>
    %17 = vector.multi_reduction <add>, %16, %cst_12 [1] : vector<6x32xf32> to vector<6xf32>
    %18 = vector.shape_cast %17 : vector<6xf32> to vector<6x1xf32>
    %cst_13 = arith.constant 3.200000e+01 : f32
    %19 = vector.broadcast %cst_13 : f32 to vector<6x1xf32>
    %20 = arith.divf %18, %19 : vector<6x1xf32>
    %21 = vector.broadcast %20 : vector<6x1xf32> to vector<6x32xf32>
    %22 = arith.subf %16, %21 : vector<6x32xf32>
    %23 = arith.mulf %22, %22 : vector<6x32xf32>
    %cst_14 = arith.constant dense<0.000000e+00> : vector<6xf32>
    %24 = vector.multi_reduction <add>, %23, %cst_14 [1] : vector<6x32xf32> to vector<6xf32>
    %25 = vector.shape_cast %24 : vector<6xf32> to vector<6x1xf32>
    %cst_15 = arith.constant 3.200000e+01 : f32
    %26 = vector.broadcast %cst_15 : f32 to vector<6x1xf32>
    %27 = arith.divf %25, %26 : vector<6x1xf32>
    %28 = vector.broadcast %20 : vector<6x1xf32> to vector<6x32xf32>
    %29 = arith.subf %16, %28 : vector<6x32xf32>
    %cst_16 = arith.constant 9.99999974E-6 : f32
    %30 = vector.broadcast %cst_16 : f32 to vector<6x1xf32>
    %31 = arith.addf %27, %30 : vector<6x1xf32>
    %32 = math.rsqrt %31 : vector<6x1xf32>
    %33 = vector.broadcast %32 : vector<6x1xf32> to vector<6x32xf32>
    %34 = arith.mulf %29, %33 : vector<6x32xf32>
    %c0_17 = arith.constant 0 : index
    %c0_18 = arith.constant 0 : index
    %35 = vector.load %arg6[%c0_17, %c0_18] : memref<1x32xf32, #tpu.memory_space<vmem>>, vector<1x32xf32>
    %36 = vector.broadcast %35 : vector<1x32xf32> to vector<6x32xf32>
    %37 = arith.mulf %34, %36 : vector<6x32xf32>
    %c0_19 = arith.constant 0 : index
    %c0_20 = arith.constant 0 : index
    %38 = vector.load %arg7[%c0_19, %c0_20] : memref<1x32xf32, #tpu.memory_space<vmem>>, vector<1x32xf32>
    %39 = vector.broadcast %38 : vector<1x32xf32> to vector<6x32xf32>
    %40 = arith.addf %37, %39 : vector<6x32xf32>
    %c0_21 = arith.constant 0 : index
    %c0_22 = arith.constant 0 : index
    %c0_23 = arith.constant 0 : index
    %41 = vector.load %arg8[%c0_21, %c0_22, %c0_23] : memref<1x6x32xf32, #tpu.memory_space<vmem>>, vector<1x6x32xf32>
    %42 = vector.shape_cast %41 : vector<1x6x32xf32> to vector<6x32xf32>
    %43 = vector.shape_cast %40 : vector<6x32xf32> to vector<1x6x32xf32>
    tpu.vector_store %arg8[%c0_21, %c0_22, %c0_23], %43 {strides = array<i32>} : memref<1x6x32xf32, #tpu.memory_space<vmem>>, vector<1x6x32xf32>,
    return
  }
  func.func @transform_0(%arg0: i32) -> (i32, i32, i32) {
    %c0_i32 = arith.constant 0 : i32
    %c0_i32_0 = arith.constant 0 : i32
    %c0_i32_1 = arith.constant 0 : i32
    return %arg0, %c0_i32, %c0_i32_0 : i32, i32, i32
  }
  func.func @transform_1(%arg0: i32) -> (i32, i32) {
    %c0_i32 = arith.constant 0 : i32
    %c0_i32_0 = arith.constant 0 : i32
    %c0_i32_1 = arith.constant 0 : i32
    return %c0_i32, %c0_i32_0 : i32, i32
  }
  func.func @transform_2(%arg0: i32) -> (i32, i32) {
    %c0_i32 = arith.constant 0 : i32
    %c0_i32_0 = arith.constant 0 : i32
    %c0_i32_1 = arith.constant 0 : i32
    return %c0_i32, %c0_i32_0 : i32, i32
  }
  func.func @transform_3(%arg0: i32) -> (i32, i32) {
    %c0_i32 = arith.constant 0 : i32
    %c0_i32_0 = arith.constant 0 : i32
    %c0_i32_1 = arith.constant 0 : i32
    return %c0_i32, %c0_i32_0 : i32, i32
  }
  func.func @transform_4(%arg0: i32) -> (i32, i32) {
    %c0_i32 = arith.constant 0 : i32
    %c0_i32_0 = arith.constant 0 : i32
    %c0_i32_1 = arith.constant 0 : i32
    return %c0_i32, %c0_i32_0 : i32, i32
  }
  func.func @transform_5(%arg0: i32) -> (i32, i32) {
    %c0_i32 = arith.constant 0 : i32
    %c0_i32_0 = arith.constant 0 : i32
    %c0_i32_1 = arith.constant 0 : i32
    return %c0_i32, %c0_i32_0 : i32, i32
  }
  func.func @transform_6(%arg0: i32) -> (i32, i32) {
    %c0_i32 = arith.constant 0 : i32
    %c0_i32_0 = arith.constant 0 : i32
    %c0_i32_1 = arith.constant 0 : i32
    return %c0_i32, %c0_i32_0 : i32, i32
  }
  func.func @transform_7(%arg0: i32) -> (i32, i32, i32) {
    %c0_i32 = arith.constant 0 : i32
    %c0_i32_0 = arith.constant 0 : i32
    %c0_i32_1 = arith.constant 0 : i32
    return %arg0, %c0_i32, %c0_i32_0 : i32, i32, i32
  }
}

module attributes {stable_mosaic.version = 11 : i64} {
  func.func @_ln_fc_kernel(%arg0: i32, %arg1: memref<1x6x32xf32, #tpu.memory_space<vmem>>, %arg2: memref<1x32xf32, #tpu.memory_space<vmem>>, %arg3: memref<1x32xf32, #tpu.memory_space<vmem>>, %arg4: memref<32x128xbf16, #tpu.memory_space<vmem>>, %arg5: memref<1x128xf32, #tpu.memory_space<vmem>>, %arg6: memref<1x6x128xf32, #tpu.memory_space<vmem>>) attributes {dimension_semantics = [#tpu.dimension_semantics<parallel>], iteration_bounds = array<i64: 2>, scalar_prefetch = 0 : i64, scratch_operands = 0 : i64, tpu.core_type = #tpu.core_type<tc>, window_params = [{transform_indices = @transform_0, window_bounds = array<i64: 1, 6, 32>}, {pipeline_mode = #tpu.pipeline_mode<synchronous>, transform_indices = @transform_1, window_bounds = array<i64: 1, 32>}, {pipeline_mode = #tpu.pipeline_mode<synchronous>, transform_indices = @transform_2, window_bounds = array<i64: 1, 32>}, {pipeline_mode = #tpu.pipeline_mode<synchronous>, transform_indices = @transform_3, window_bounds = array<i64: 32, 128>}, {pipeline_mode = #tpu.pipeline_mode<synchronous>, transform_indices = @transform_4, window_bounds = array<i64: 1, 128>}, {transform_indices = @transform_5, window_bounds = array<i64: 1, 6, 128>}]} {
    %c0 = arith.constant 0 : index
    %c0_0 = arith.constant 0 : index
    %c0_1 = arith.constant 0 : index
    %0 = vector.load %arg1[%c0, %c0_0, %c0_1] : memref<1x6x32xf32, #tpu.memory_space<vmem>>, vector<1x6x32xf32>
    %1 = vector.shape_cast %0 : vector<1x6x32xf32> to vector<6x32xf32>
    %cst = arith.constant dense<0.000000e+00> : vector<6xf32>
    %2 = vector.multi_reduction <add>, %1, %cst [1] : vector<6x32xf32> to vector<6xf32>
    %3 = vector.shape_cast %2 : vector<6xf32> to vector<6x1xf32>
    %cst_2 = arith.constant 3.200000e+01 : f32
    %4 = vector.broadcast %cst_2 : f32 to vector<6x1xf32>
    %5 = arith.divf %3, %4 : vector<6x1xf32>
    %6 = vector.broadcast %5 : vector<6x1xf32> to vector<6x32xf32>
    %7 = arith.subf %1, %6 : vector<6x32xf32>
    %8 = arith.mulf %7, %7 : vector<6x32xf32>
    %cst_3 = arith.constant dense<0.000000e+00> : vector<6xf32>
    %9 = vector.multi_reduction <add>, %8, %cst_3 [1] : vector<6x32xf32> to vector<6xf32>
    %10 = vector.shape_cast %9 : vector<6xf32> to vector<6x1xf32>
    %cst_4 = arith.constant 3.200000e+01 : f32
    %11 = vector.broadcast %cst_4 : f32 to vector<6x1xf32>
    %12 = arith.divf %10, %11 : vector<6x1xf32>
    %13 = vector.broadcast %5 : vector<6x1xf32> to vector<6x32xf32>
    %14 = arith.subf %1, %13 : vector<6x32xf32>
    %cst_5 = arith.constant 9.99999974E-6 : f32
    %15 = vector.broadcast %cst_5 : f32 to vector<6x1xf32>
    %16 = arith.addf %12, %15 : vector<6x1xf32>
    %17 = math.rsqrt %16 : vector<6x1xf32>
    %18 = vector.broadcast %17 : vector<6x1xf32> to vector<6x32xf32>
    %19 = arith.mulf %14, %18 : vector<6x32xf32>
    %c0_6 = arith.constant 0 : index
    %c0_7 = arith.constant 0 : index
    %20 = vector.load %arg2[%c0_6, %c0_7] : memref<1x32xf32, #tpu.memory_space<vmem>>, vector<1x32xf32>
    %21 = vector.broadcast %20 : vector<1x32xf32> to vector<6x32xf32>
    %22 = arith.mulf %19, %21 : vector<6x32xf32>
    %c0_8 = arith.constant 0 : index
    %c0_9 = arith.constant 0 : index
    %23 = vector.load %arg3[%c0_8, %c0_9] : memref<1x32xf32, #tpu.memory_space<vmem>>, vector<1x32xf32>
    %24 = vector.broadcast %23 : vector<1x32xf32> to vector<6x32xf32>
    %25 = arith.addf %22, %24 : vector<6x32xf32>
    %26 = arith.truncf %25 : vector<6x32xf32> to vector<6x32xbf16>
    %c0_10 = arith.constant 0 : index
    %c0_11 = arith.constant 0 : index
    %27 = vector.load %arg4[%c0_10, %c0_11] : memref<32x128xbf16, #tpu.memory_space<vmem>>, vector<32x128xbf16>
    %cst_12 = arith.constant dense<0.000000e+00> : vector<6x128xf32>
    %28 = tpu.matmul %26, %27, %cst_12 {dimension_numbers = #tpu.dot_dimension_numbers<[1], [0], [0], [1], [0, 0, 1, 1], [], []>} : vector<6x32xbf16>, vector<32x128xbf16>, vector<6x128xf32> -> vector<6x128xf32>
    %c0_13 = arith.constant 0 : index
    %c0_14 = arith.constant 0 : index
    %29 = vector.load %arg5[%c0_13, %c0_14] : memref<1x128xf32, #tpu.memory_space<vmem>>, vector<1x128xf32>
    %30 = vector.broadcast %29 : vector<1x128xf32> to vector<6x128xf32>
    %31 = arith.addf %28, %30 : vector<6x128xf32>
    %c0_15 = arith.constant 0 : index
    %c0_16 = arith.constant 0 : index
    %c0_17 = arith.constant 0 : index
    %32 = vector.load %arg6[%c0_15, %c0_16, %c0_17] : memref<1x6x128xf32, #tpu.memory_space<vmem>>, vector<1x6x128xf32>
    %33 = vector.shape_cast %32 : vector<1x6x128xf32> to vector<6x128xf32>
    %34 = vector.shape_cast %31 : vector<6x128xf32> to vector<1x6x128xf32>
    tpu.vector_store %arg6[%c0_15, %c0_16, %c0_17], %34 {strides = array<i32>} : memref<1x6x128xf32, #tpu.memory_space<vmem>>, vector<1x6x128xf32>,
    return
  }
  func.func @transform_0(%arg0: i32) -> (i32, i32, i32) {
    %c0_i32 = arith.constant 0 : i32
    %c0_i32_0 = arith.constant 0 : i32
    %c0_i32_1 = arith.constant 0 : i32
    return %arg0, %c0_i32, %c0_i32_0 : i32, i32, i32
  }
  func.func @transform_1(%arg0: i32) -> (i32, i32) {
    %c0_i32 = arith.constant 0 : i32
    %c0_i32_0 = arith.constant 0 : i32
    %c0_i32_1 = arith.constant 0 : i32
    return %c0_i32, %c0_i32_0 : i32, i32
  }
  func.func @transform_2(%arg0: i32) -> (i32, i32) {
    %c0_i32 = arith.constant 0 : i32
    %c0_i32_0 = arith.constant 0 : i32
    %c0_i32_1 = arith.constant 0 : i32
    return %c0_i32, %c0_i32_0 : i32, i32
  }
  func.func @transform_3(%arg0: i32) -> (i32, i32) {
    %c0_i32 = arith.constant 0 : i32
    %c0_i32_0 = arith.constant 0 : i32
    %c0_i32_1 = arith.constant 0 : i32
    return %c0_i32, %c0_i32_0 : i32, i32
  }
  func.func @transform_4(%arg0: i32) -> (i32, i32) {
    %c0_i32 = arith.constant 0 : i32
    %c0_i32_0 = arith.constant 0 : i32
    %c0_i32_1 = arith.constant 0 : i32
    return %c0_i32, %c0_i32_0 : i32, i32
  }
  func.func @transform_5(%arg0: i32) -> (i32, i32, i32) {
    %c0_i32 = arith.constant 0 : i32
    %c0_i32_0 = arith.constant 0 : i32
    %c0_i32_1 = arith.constant 0 : i32
    return %arg0, %c0_i32, %c0_i32_0 : i32, i32, i32
  }
}

</mosaic_0001>

<bundles_post_ra>
// kernel: transformer_translator_forward.16
= control target key start
LH: loop header
LB: loop body
LE: loop exit
PB: predicated region body
PF: predicated region fallthrough
CT: control target
= control target key end

     0   :  { %s301_s12 = smov 0   ;;  %s327_s0 = inlined_call_operand.vmem [shape: f32[2,8,32], index: 0, kind: input, shape index: {}]   ;;  %s328_s1 = inlined_call_operand.vmem [shape: f32[1,32], index: 1, kind: input, shape index: {}]   ;;  %s329_s2 = inlined_call_operand.vmem [shape: f32[1,32], index: 2, kind: input, shape index: {}]   ;;  %s330_s3 = inlined_call_operand.vmem [shape: f32[2,8,32], index: 3, kind: output, shape index: {}]  }
   0x1 LB: > { %s252_s13 = sadd.s32 4294967295, %s279_s12   ;;  %p256_p0 = scmp.ge.s32.totalorder %s279_s12, 1  ;;  %s279_s12 = sphi %s301_s12, %s13_s12  }
   0x2   : > { %p136_p1 = scmp.lt.s32.totalorder %s279_s12, 3 }
   0x4   : > { %p137_p2 = pnand %p256_p0, %p136_p1 }
   0x5   : > { %p158_p3 = scmp.lt.s32.totalorder (!%p137_p2), %s252_s13, 1  ;;  %vm167_vm0 = vcmask (!%p137_p2), 261120   ;;  %v259_v11 = vld [vmem:[%s328_s1] ss:$0 sm:$0xff] (!%p137_p2) }
   0x6   : > { %140 = sbr.rel (%p137_p2) target bundleno = 331 (0x14b), region = 32  ;;  %v260_v13 = vld [vmem:[%s329_s2] ss:$0 sm:$0xff] (!%p137_p2) }
   0xd   : > { %s332_s13 = smov (!%p158_p3, %s252_s13), 1 }
   0xe   : > { %s257_s14 = sshll.u32 %s332_s13, 3 }
   0xf   : > { %s161_s17 = scalar_lea.vmem %s327_s0, %s257_s14  ;;  %s165_s24 = scalar_lea.vmem %s330_s3, %s257_s14 }
  0x10   : > { %v166_v0 = vld [vmem:[%s161_s17] sm:$0xff] }
  0x11   : > { %v168_v1 = vsel %vm167_vm0, %v166_v0, 0.0 }
  0x12   : > { %169 = vadd.xlane.f32.xlu0 %v168_v1 }
  0x9f   : > { %v170_v2 = vpop.xlane.xlu0 %169 }
  0xa0   : > { %v172_v3 = vmul.f32 0.03125, %v170_v2 }
  0xa2   : > { %v173_v4 = vsub.f32 %v166_v0, %v172_v3 }
  0xa4   : > { %v174_v5 = vmul.f32 %v173_v4, %v173_v4 }
  0xa6   : > { %v175_v6 = vsel %vm167_vm0, %v174_v5, 0.0 }
  0xa7   : > { %176 = vadd.xlane.f32.xlu0 %v175_v6 }
 0x134   : > { %v177_v7 = vpop.xlane.xlu0 %176 }
 0x135   : > { %v178_v8 = vmul.f32 0.03125, %v177_v7 }
 0x137   : > { %v179_v9 = vadd.f32 1e-05, %v178_v8 }
 0x139   : > { %271 = vrsqrt.f32 %v179_v9 }
 0x143   : > { %v272_v10 = vpop.eup %271 }
 0x144   : > { %v181_v12 = vmul.f32 %v272_v10, %v173_v4 }
 0x146   : > { %v189_v14 = vmul.f32 %v259_v11, %v181_v12 }
 0x148   : > { %v197_v15 = vadd.f32 %v260_v13, %v189_v14 }
 0x14a   : > { %198 = vst.msk [vmem:[%s165_s24] sm:$0xff] %vm167_vm0, %v197_v15 }
 0x14b PF: > { %s13_s12 = sadd.s32 1, %s279_s12  }
 0x14c   : > { %p10_p4 = scmp.ge.s32.totalorder %s13_s12, 4  }
 0x14e   :  { %12 = sbr.rel (!%p10_p4) target bundleno = 1 (0x1), region = 62 }

// kernel: transformer_translator_forward.13
= control target key start
LH: loop header
LB: loop body
LE: loop exit
PB: predicated region body
PF: predicated region fallthrough
CT: control target
= control target key end

     0   :  { %s632_s24 = smov 0   ;;  %s690_s0 = inlined_call_operand.vmem [shape: f32[2,8,32], index: 0, kind: input, shape index: {}]   ;;  %s691_s1 = inlined_call_operand.vmem [shape: bf16[32,64], index: 1, kind: input, shape index: {}]   ;;  %s692_s2 = inlined_call_operand.vmem [shape: f32[1,64], index: 2, kind: input, shape index: {}]   ;;  %s693_s3 = inlined_call_operand.vmem [shape: bf16[64,32], index: 3, kind: input, shape index: {}]   ;;  %s694_s4 = inlined_call_operand.vmem [shape: f32[1,32], index: 4, kind: input, shape index: {}]   ;;  %s695_s5 = inlined_call_operand.vmem [shape: f32[1,32], index: 5, kind: input, shape index: {}]   ;;  %s696_s6 = inlined_call_operand.vmem [shape: f32[1,32], index: 6, kind: input, shape index: {}]   ;;  %s697_s7 = inlined_call_operand.vmem [shape: f32[2,8,32], index: 7, kind: output, shape index: {}]  }
   0x1 LB: > { %s515_s25 = sadd.s32 4294967295, %s588_s24   ;;  %p519_p0 = scmp.ge.s32.totalorder %s588_s24, 1  ;;  %s588_s24 = sphi %s632_s24, %s17_s24  }
   0x2   : > { %p236_p1 = scmp.lt.s32.totalorder %s588_s24, 3 }
   0x4   : > { %p237_p2 = pnand %p519_p0, %p236_p1 }
   0x5   : > { %v574_v0 = vld [vmem:[%s691_s1] sm:$0xff] (!%p237_p2)   ;;  %v590_v1 = vmov (!%p237_p2), 0.0   ;;  %v575_v2 = vld [vmem:[%s691_s1 + $0x8] sm:$0xff] (!%p237_p2)   ;;  %vm591_vm0 = vmmov (!%p237_p2), 0   ;;  %p266_p3 = scmp.lt.s32.totalorder (!%p237_p2), %s515_s25, 1  ;;  %vm300_vm1 = vcmask (!%p237_p2), 261120  }
   0x6   : > { %240 = sbr.rel (%p237_p2) target bundleno = 767 (0x2ff), region = 48  ;;  %544 = vmatprep.subr.bf16.mxu0 (!%p237_p2), %v590_v1  ;;  %552 = vmatprep.subr.bf16.mxu1 (!%p237_p2), %v590_v1  ;;  %v576_v3 = vld [vmem:[%s693_s3] sm:$0xff] (!%p237_p2)   ;;  %v577_v4 = vld [vmem:[%s693_s3 + $0x8] sm:$0xff] (!%p237_p2)   ;;  %v578_v7 = vld [vmem:[%s693_s3 + $0x10] sm:$0xff] (!%p237_p2)   ;;  %vm378_vm2 = vcmask (!%p237_p2), 523264  }
   0x7   : > { %545 = vmatpush3.bf16.msra.mxu0 (!%p237_p2), %v574_v0  ;;  %548 = vmatprep.mubr.msk.bf16.mxu0 (!%p237_p2), %vm591_vm0, %v590_v1  ;;  %v579_v8 = vld [vmem:[%s693_s3 + $0x18] sm:$0xff] (!%p237_p2)   ;;  %v522_v9 = vld [vmem:[%s692_s2] ss:$0 sm:$0xff] (!%p237_p2) }
   0x8   : > { %546 = vmatprep.subr.bf16.mxu0 (!%p237_p2), %v590_v1  ;;  %560 = vmatprep.mubr.msk.bf16.mxu1 (!%p237_p2), %vm591_vm0, %v590_v1  ;;  %v531_v18 = vld [vmem:[%s694_s4] ss:$0 sm:$0xff] (!%p237_p2) }
   0x9   : > { %553 = vmatpush3.bf16.msra.mxu1 (!%p237_p2), %v576_v3  ;;  %v532_v34 = vld [vmem:[%s695_s5] ss:$0 sm:$0xff] (!%p237_p2) }
   0xa   : > { %554 = vmatprep.subr.bf16.mxu1 (!%p237_p2), %v590_v1  ;;  %v533_v36 = vld [vmem:[%s696_s6] ss:$0 sm:$0xff] (!%p237_p2) }
   0xb   : > { %547 = vmatpush3.bf16.msra.mxu0 (!%p237_p2), %v575_v2 }
   0xd   : > { %s699_s25 = smov (!%p266_p3, %s515_s25), 1  ;;  %555 = vmatpush3.bf16.msra.mxu1 %v577_v4 }
   0xe   : > { %s520_s11 = sshll.u32 %s699_s25, 3  ;;  %556 = vmatprep.subr.bf16.mxu1 %v590_v1 }
   0xf   : > { %s269_s14 = scalar_lea.vmem %s690_s0, %s520_s11  ;;  %s273_s8 = scalar_lea.vmem %s697_s7, %s520_s11 }
  0x10   : > { %v275_v5 = vld [vmem:[%s269_s14] sm:$0xff] }
  0x11   : > { %v276_v6 = vpack.c.bf16 %v275_v5, %v275_v5  ;;  %557 = vmatpush3.bf16.msra.mxu1 %v578_v7 }
  0x12   : > { %558 = vmatprep.subr.bf16.mxu1 %v590_v1 }
  0x13   : > { %549 = vmatmul.mubr.msk.bf16.vlgmr.msra.gmra.mrb[0].mxu0 %vm300_vm1, %v276_v6 }
  0x15   : > { %559 = vmatpush3.bf16.msra.mxu1 %v579_v8 }
  0xe6   : > { %v338_v10 = vpop.f32.mrb[0].mxu0 }
  0xe7   : > { %v339_v11 = vadd.f32 %v522_v9, %v338_v10  ;;  %v550_v12 = vpop.f32.mrb[1].mxu0 }
  0xe8   : > { %v341_v13 = vpop.f32.mrb[2].mxu0 }
  0xe9   : > { %v344_v14 = vmax.f32 %v339_v11, 0.0  ;;  %v551_v15 = vpop.f32.mrb[3].mxu0 }
  0xeb   : > { %v345_v16 = vpack.c.bf16 %v344_v14, %v344_v14 }
  0xed   : > { %561 = vmatmul.mubr.msk.bf16.vlgmr.msra.gmra.mrb[0].mxu1 %vm378_vm2, %v345_v16 }
 0x1c0   : > { %v416_v17 = vpop.f32.mrb[0].mxu1 }
 0x1c1   : > { %v422_v19 = vadd.f32 %v416_v17, %v275_v5  ;;  %v562_v20 = vpop.f32.mrb[1].mxu1 }
 0x1c2   : > { %v419_v21 = vpop.f32.mrb[2].mxu1 }
 0x1c3   : > { %v563_v22 = vpop.f32.mrb[3].mxu1  ;;  %v430_v23 = vadd.f32 %v531_v18, %v422_v19 }
 0x1c5   : > { %v431_v24 = vsel %vm300_vm1, %v430_v23, 0.0 }
 0x1c6   : > { %432 = vadd.xlane.f32.xlu0 %v431_v24 }
 0x253   : > { %v433_v25 = vpop.xlane.xlu0 %432 }
 0x254   : > { %v435_v26 = vmul.f32 0.03125, %v433_v25 }
 0x256   : > { %v436_v27 = vsub.f32 %v430_v23, %v435_v26 }
 0x258   : > { %v437_v28 = vmul.f32 %v436_v27, %v436_v27 }
 0x25a   : > { %v438_v29 = vsel %vm300_vm1, %v437_v28, 0.0 }
 0x25b   : > { %439 = vadd.xlane.f32.xlu0 %v438_v29 }
 0x2e8   : > { %v440_v30 = vpop.xlane.xlu0 %439 }
 0x2e9   : > { %v441_v31 = vmul.f32 0.03125, %v440_v30 }
 0x2eb   : > { %v442_v32 = vadd.f32 1e-05, %v441_v31 }
 0x2ed   : > { %580 = vrsqrt.f32 %v442_v32 }
 0x2f7   : > { %v581_v33 = vpop.eup %580 }
 0x2f8   : > { %v444_v35 = vmul.f32 %v581_v33, %v436_v27 }
 0x2fa   : > { %v452_v37 = vmul.f32 %v532_v34, %v444_v35 }
 0x2fc   : > { %v460_v38 = vadd.f32 %v533_v36, %v452_v37 }
 0x2fe   : > { %461 = vst.msk [vmem:[%s273_s8] sm:$0xff] %vm300_vm1, %v460_v38 }
 0x2ff PF: > { %s17_s24 = sadd.s32 1, %s588_s24  }
 0x300   : > { %p14_p4 = scmp.ge.s32.totalorder %s17_s24, 4  }
 0x302   :  { %16 = sbr.rel (!%p14_p4) target bundleno = 1 (0x1), region = 78 }

// kernel: transformer_translator_forward.12
= control target key start
LH: loop header
LB: loop body
LE: loop exit
PB: predicated region body
PF: predicated region fallthrough
CT: control target
= control target key end

     0   :  { %s1507_s30 = smov 0   ;;  %s1681_s0 = inlined_call_operand.vmem [shape: f32[2,8,32], index: 0, kind: input, shape index: {}, may-alias: {0,1}]   ;;  %s1682_s1 = inlined_call_operand.vmem [shape: f32[2,8,32], index: 1, kind: input, shape index: {}, may-alias: {0,1}]   ;;  %s1683_s2 = inlined_call_operand.vmem [shape: f32[2,8,8], index: 2, kind: input, shape index: {}]   ;;  %s1684_s3 = inlined_call_operand.vmem [shape: bf16[32,96], index: 3, kind: input, shape index: {}]   ;;  %s1685_s4 = inlined_call_operand.vmem [shape: f32[1,96], index: 4, kind: input, shape index: {}]   ;;  %s1686_s5 = inlined_call_operand.vmem [shape: bf16[4,8,32], index: 5, kind: input, shape index: {}]   ;;  %s1687_s6 = inlined_call_operand.vmem [shape: f32[1,32], index: 6, kind: input, shape index: {}]   ;;  %s1688_s7 = inlined_call_operand.vmem [shape: f32[1,32], index: 7, kind: input, shape index: {}]   ;;  %s1689_s8 = inlined_call_operand.vmem [shape: f32[1,32], index: 8, kind: input, shape index: {}]   ;;  %s1690_s9 = inlined_call_operand.vmem [shape: f32[2,8,32], index: 9, kind: output, shape index: {}]  }
   0x1 LB: > { %s1251_s10 = sadd.s32 4294967295, %s1446_s30   ;;  %p1255_p0 = scmp.ge.s32.totalorder %s1446_s30, 1  ;;  %s1446_s30 = sphi %s1507_s30, %s19_s30  }
   0x2   : > { %p304_p1 = scmp.lt.s32.totalorder %s1446_s30, 3 }
   0x4   : > { %p305_p2 = pnand %p1255_p0, %p304_p1 }
   0x5   : > { %v1420_v0 = vld [vmem:[%s1684_s3] sm:$0xff] (!%p305_p2)   ;;  %s1448_s13 = smov (!%p305_p2), 96   ;;  %v1421_v1 = vld [vmem:[%s1684_s3 + $0x8] sm:$0xff] (!%p305_p2)   ;;  %v1449_v2 = vmov (!%p305_p2), 0.0   ;;  %p346_p3 = scmp.lt.s32.totalorder (!%p305_p2), %s1251_s10, 1  ;;  %vm1450_vm0 = vmmov (!%p305_p2), 0  }
   0x6   : > { %308 = sbr.rel (%p305_p2) target bundleno = 3039 (0xbdf), region = 56  ;;  %434 = vrot.lane.b32.xlu0 (!%p305_p2), %v1420_v0, %s1448_s13  ;;  %1323 = vmatprep.subr.bf16.mxu1 (!%p305_p2), %v1449_v2  ;;  %v1260_v3 = vld [vmem:[%s1685_s4] ss:$0 sm:$0xff] (!%p305_p2)  ;;  %vm390_vm1 = vcmask (!%p305_p2), 261120   ;;  %s1451_s25 = smov (!%p305_p2), 120   ;;  %vm489_vm2 = vcmask (!%p305_p2), 64512  }
   0x7   : > { %1315 = vmatprep.subr.bf16.mxu0 (!%p305_p2), %v1449_v2  ;;  %1327 = vmatprep.mubr.msk.bf16.mxu1 (!%p305_p2), %vm1450_vm0, %v1449_v2  ;;  %s1452_s29 = smov (!%p305_p2), 112   ;;  %vm556_vm3 = vcmask (!%p305_p2), 1043456   ;;  %v1269_v58 = vld [vmem:[%s1686_s5 + $0x4] sm:$0xf] (!%p305_p2)  ;;  %s1454_s15 = smov (!%p305_p2), 104  }
   0x8   : > { %1316 = vmatpush3.bf16.msra.mxu0 (!%p305_p2), %v1420_v0  ;;  %1319 = vmatprep.mubr.msk.bf16.mxu0 (!%p305_p2), %vm1450_vm0, %v1449_v2  ;;  %v722_v59 = vsel (!%p305_p2), %vm556_vm3, %v1269_v58, 0  ;;  %v601_v0 = vld [vmem:[%s1686_s5] sm:$0xf] (!%p305_p2)  ;;  %s1455_s16 = smov (!%p305_p2), 80   ;;  %s1456_s20 = smov (!%p305_p2), 72  }
   0x9   : > { %1317 = vmatprep.subr.bf16.mxu0 (!%p305_p2), %v1449_v2  ;;  %440 = vrot.lane.b32.xlu1 (!%p305_p2), %v1260_v3, %s1448_s13 }
   0xa   : > { %436 = vrot.lane.b32.xlu0 (!%p305_p2), %v1421_v1, %s1448_s13 }
   0xc   : > { %1318 = vmatpush3.bf16.msra.mxu0 (!%p305_p2), %v1421_v1 }
   0xd   : > { %s1692_s10 = smov (!%p346_p3, %s1251_s10), 1  ;;  %1331 = vmatprep.subr.bf16.mxu0 %v1449_v2 }
   0xe   : > { %s1534_s18 = sshll.u32 %s1692_s10, 3  ;;  %s1453_s10 = smov 88  }
   0xf   : > { %s349_s21 = scalar_lea.vmem %s1681_s0, %s1534_s18  ;;  %s353_s24 = scalar_lea.vmem %s1682_s1, %s1534_s18 }
  0x10   : > { %v1540_v4 = vld [vmem:[%s349_s21] sm:$0xff]  ;;  %s357_s28 = scalar_lea.vmem %s1683_s2, %s1534_s18  ;;  %s361_s11 = scalar_lea.vmem %s1690_s9, %s1534_s18 }
  0x11   : > { %v370_v5 = vpack.c.bf16 %v1540_v4, %v1540_v4  ;;  %v364_v7 = vld [vmem:[%s353_s24] sm:$0xff] }
  0x12   : > { %v371_v9 = vpack.c.bf16 %v364_v7, %v364_v7  ;;  %v1579_v28 = vld [vmem:[%s357_s28] sm:$0xff] }
  0x13   : > { %1320 = vmatmul.mubr.msk.bf16.vlgmr.msra.gmra.mrb[0].mxu0 %vm390_vm1, %v370_v5  ;;  %v768_v5 = vsel %vm556_vm3, %v601_v0, 0 }
  0x14   : > { %1333 = vmatprep.mubr.msk.bf16.mxu0 %vm1450_vm0, %v1449_v2 }
  0x78   : > { %v435_v6 = vpop.permute.xlu0 %434 }
  0x79   : > { %1324 = vmatpush3.bf16.msra.mxu1 %v435_v6 }
  0x7a   : > { %1325 = vmatprep.subr.bf16.mxu1 %v1449_v2 }
  0x7b   : > { %v441_v16 = vpop.permute.xlu1 %440 }
  0x7c   : > { %v437_v8 = vpop.permute.xlu0 %436 }
  0x7d   : > { %1326 = vmatpush3.bf16.msra.mxu1 %v437_v8 }
  0x7e   : > { %1337 = vmatprep.subr.bf16.mxu1 %v1449_v2 }
  0x80   : > { %1328 = vmatmul.mubr.msk.bf16.vlgmr.msra.gmra.mrb[0].mxu1 %vm390_vm1, %v371_v9 }
  0x81   : > { %1339 = vmatprep.mubr.msk.bf16.mxu1 %vm1450_vm0, %v1449_v2 }
  0xe6   : > { %v428_v10 = vpop.f32.mrb[0].mxu0 }
  0xe7   : > { %v429_v11 = vadd.f32 %v1260_v3, %v428_v10  ;;  %v1321_v12 = vpop.f32.mrb[1].mxu0 }
  0xe8   : > { %v431_v13 = vpop.f32.mrb[2].mxu0 }
  0xe9   : > { %v1557_v14 = vpack.c.bf16 %v429_v11, %v429_v11  ;;  %v1322_v15 = vpop.f32.mrb[3].mxu0 }
  0xeb   : > { %603 = vrot.lane.b32.xlu0 %v1557_v14, %s1451_s25 }
 0x153   : > { %v480_v17 = vpop.f32.mrb[0].mxu1 }
 0x154   : > { %v481_v18 = vadd.f32 %v480_v17, %v441_v16  ;;  %v1329_v19 = vpop.f32.mrb[1].mxu1 }
 0x155   : > { %v483_v20 = vpop.f32.mrb[2].mxu1 }
 0x156   : > { %v1560_v21 = vpack.c.bf16 %v481_v18, %v481_v18  ;;  %v1330_v22 = vpop.f32.mrb[3].mxu1 }
 0x158   : > { %605 = vrot.lane.b32.xlu1 %v1560_v21, %s1451_s25  ;;  %v494_v23 = vsel %vm489_vm2, %v1560_v21, 0 }
 0x159   : > { %1332 = vmatpush3.bf16.xpose.msra.mxu0 %v494_v23 }
 0x15a   : > { %1343 = vmatprep.subr.bf16.mxu0 %v1449_v2 }
 0x15d   : > { %v604_v26 = vpop.permute.xlu0 %603 }
 0x160   : > { %1334 = vmatmul.mubr.msk.bf16.vlgmr.msra.gmra.mrb[4].mxu0 %vm489_vm2, %v1557_v14 }
 0x161   : > { %1345 = vmatprep.mubr.msk.bf16.mxu0 %vm1450_vm0, %v1449_v2 }
 0x1ca   : > { %v606_v24 = vpop.permute.xlu1 %605 }
 0x1cb   : > { %v611_v25 = vsel %vm489_vm2, %v606_v24, 0 }
 0x1cc   : > { %1344 = vmatpush3.bf16.xpose.msra.mxu0 %v611_v25 }
 0x1cd   : > { %1355 = vmatprep.subr.bf16.mxu0 %v1449_v2 }
 0x1d3   : > { %1346 = vmatmul.mubr.msk.bf16.vlgmr.msra.gmra.mrb[8].mxu0 %vm489_vm2, %v604_v26 }
 0x1d4   : > { %1357 = vmatprep.mubr.msk.bf16.mxu0 %vm1450_vm0, %v1449_v2  ;;  %1356 = vmatpush3.bf16.msra.mxu0 %v722_v59 }
 0x1d5   : > { %1367 = vmatprep.subr.bf16.mxu0 %v1449_v2 }
 0x233   : > { %v530_v27 = vpop.f32.mrb[4].mxu0 }
 0x234   : > { %v536_v29 = vmul.f32 0.35355338, %v530_v27  ;;  %v1335_v30 = vpop.f32.mrb[5].mxu0 }
 0x235   : > { %v533_v31 = vpop.f32.mrb[6].mxu0 }
 0x236   : > { %v1336_v32 = vpop.f32.mrb[7].mxu0  ;;  %v537_v33 = vadd.f32 %v536_v29, %v1579_v28 }
 0x238   : > { %v538_v34 = vsel %vm489_vm2, %v537_v33, -inf }
 0x239   : > { %539 = vmax.xlane.f32.xlu1 %v538_v34 }
 0x2a6   : > { %v647_v35 = vpop.f32.mrb[8].mxu0 }
 0x2a7   : > { %v653_v36 = vmul.f32 0.35355338, %v647_v35  ;;  %v1347_v37 = vpop.f32.mrb[9].mxu0 }
 0x2a8   : > { %v650_v38 = vpop.f32.mrb[10].mxu0 }
 0x2a9   : > { %v1348_v39 = vpop.f32.mrb[11].mxu0  ;;  %v654_v40 = vadd.f32 %v653_v36, %v1579_v28 }
 0x2ab   : > { %v655_v41 = vsel %vm489_vm2, %v654_v40, -inf }
 0x2ac   : > { %656 = vmax.xlane.f32.xlu0 %v655_v41 }
 0x2c6   : > { %v540_v42 = vpop.xlane.xlu1 %539 }
 0x2c7   : > { %v541_v43 = vsub.f32 %v537_v33, %v540_v42 }
 0x2c9   : > { %v542_v44 = vmul.f32 1.442695, %v541_v43 }
 0x2cb   : > { %1422 = vpow2.f32 %v542_v44 }
 0x2d5   : > { %v1423_v45 = vpop.eup %1422 }
 0x2d6   : > { %v544_v46 = vsel %vm489_vm2, %v1423_v45, 0.0 }
 0x2d7   : > { %545 = vadd.xlane.f32.xlu0 %v544_v46 }
 0x2ed   : > { %551 = vrot.lane.b32.xlu0 %v1560_v21, %s1448_s13 }
 0x2f1   : > { %810 = vrot.lane.b32.xlu0 %v1557_v14, %s1452_s29 }
 0x339   : > { %v657_v47 = vpop.xlane.xlu0 %656 }
 0x33a   : > { %v658_v48 = vsub.f32 %v654_v40, %v657_v47 }
 0x33c   : > { %v659_v49 = vmul.f32 1.442695, %v658_v48 }
 0x33e   : > { %1424 = vpow2.f32 %v659_v49 }
 0x348   : > { %v1425_v50 = vpop.eup %1424 }
 0x349   : > { %v661_v51 = vsel %vm489_vm2, %v1425_v50, 0.0 }
 0x34a   : > { %662 = vadd.xlane.f32.xlu1 %v661_v51  ;;  %v1274_v51 = vld [vmem:[%s1686_s5 + $0x8] sm:$0xf] }
 0x35b   : > { %667 = vrot.lane.b32.xlu1 %v1560_v21, %s1453_s10 }
 0x35f   : > { %812 = vrot.lane.b32.xlu1 %v1560_v21, %s1452_s29 }
 0x364   : > { %v546_v52 = vpop.xlane.xlu0 %545 }
 0x365   : > { %1426 = vrcp.f32 %v546_v52  ;;  %v929_v52 = vsel %vm556_vm3, %v1274_v51, 0 }
 0x368   : > { %v552_v53 = vpop.permute.xlu0 %551 }
 0x369   : > { %v558_v54 = vsel %vm556_vm3, %v552_v53, 0 }
 0x36a   : > { %1338 = vmatpush3.bf16.msra.mxu1 %v558_v54 }
 0x36b   : > { %1349 = vmatprep.subr.bf16.mxu1 %v1449_v2 }
 0x36c   : > { %v811_v19 = vpop.permute.xlu0 %810 }
 0x36f   : > { %v1427_v55 = vpop.eup %1426 }
 0x370   : > { %v548_v56 = vmul.f32 %v1427_v55, %v1423_v45 }
 0x372   : > { %v549_v57 = vpack.c.bf16 %v548_v56, %v548_v56 }
 0x374   : > { %1340 = vmatmul.mubr.msk.bf16.vlgmr.msra.gmra.mrb[4].mxu1 %vm489_vm2, %v549_v57 }
 0x375   : > { %1351 = vmatprep.mubr.msk.bf16.mxu1 %vm1450_vm0, %v1449_v2 }
 0x3d7   : > { %v663_v60 = vpop.xlane.xlu1 %662 }
 0x3d8   : > { %1428 = vrcp.f32 %v663_v60 }
 0x3db   : > { %v668_v61 = vpop.permute.xlu1 %667 }
 0x3dc   : > { %v673_v62 = vsel %vm556_vm3, %v668_v61, 0 }
 0x3dd   : > { %1350 = vmatpush3.bf16.msra.mxu1 %v673_v62 }
 0x3de   : > { %1361 = vmatprep.subr.bf16.mxu1 %v1449_v2 }
 0x3df   : > { %v813_v11 = vpop.permute.xlu1 %812 }
 0x3e0   : > { %v818_v17 = vsel %vm489_vm2, %v813_v11, 0 }
 0x3e2   : > { %v1429_v63 = vpop.eup %1428 }
 0x3e3   : > { %v665_v1 = vmul.f32 %v1429_v63, %v1425_v50 }
 0x3e5   : > { %v666_v3 = vpack.c.bf16 %v665_v1, %v665_v1 }
 0x3e7   : > { %1352 = vmatmul.mubr.msk.bf16.vlgmr.msra.gmra.mrb[8].mxu1 %vm489_vm2, %v666_v3 }
 0x3e8   : > { %1362 = vmatpush3.bf16.msra.mxu1 %v768_v5  ;;  %1363 = vmatprep.mubr.msk.bf16.mxu1 %vm1450_vm0, %v1449_v2 }
 0x3e9   : > { %1373 = vmatprep.subr.bf16.mxu1 %v1449_v2 }
 0x447   : > { %v594_v6 = vpop.f32.mrb[4].mxu1 }
 0x448   : > { %v600_v7 = vpack.c.bf16 %v594_v6, %v594_v6  ;;  %v1341_v8 = vpop.f32.mrb[5].mxu1 }
 0x449   : > { %v597_v9 = vpop.f32.mrb[6].mxu1 }
 0x44a   : > { %v1342_v10 = vpop.f32.mrb[7].mxu1  ;;  %1364 = vmatmul.mubr.msk.bf16.vlgmr.msra.gmra.mrb[12].mxu1 %vm489_vm2, %v600_v7 }
 0x44b   : > { %1375 = vmatprep.mubr.msk.bf16.mxu1 %vm1450_vm0, %v1449_v2 }
 0x4ba   : > { %v709_v12 = vpop.f32.mrb[8].mxu1 }
 0x4bb   : > { %v715_v13 = vpack.c.bf16 %v709_v12, %v709_v12  ;;  %v1353_v15 = vpop.f32.mrb[9].mxu1 }
 0x4bc   : > { %v712_v16 = vpop.f32.mrb[10].mxu1 }
 0x4bd   : > { %v1354_v18 = vpop.f32.mrb[11].mxu1  ;;  %1358 = vmatmul.mubr.msk.bf16.vlgmr.msra.gmra.mrb[12].mxu0 %vm489_vm2, %v715_v13 }
 0x4be   : > { %1368 = vmatpush3.bf16.xpose.msra.mxu0 %v818_v17  ;;  %1369 = vmatprep.mubr.msk.bf16.mxu0 %vm1450_vm0, %v1449_v2 }
 0x4bf   : > { %1379 = vmatprep.subr.bf16.mxu0 %v1449_v2 }
 0x4c5   : > { %1370 = vmatmul.mubr.msk.bf16.vlgmr.msra.gmra.mrb[16].mxu0 %vm489_vm2, %v811_v19 }
 0x4c6   : > { %1381 = vmatprep.mubr.msk.bf16.mxu0 %vm1450_vm0, %v1449_v2  ;;  %1380 = vmatpush3.bf16.msra.mxu0 %v929_v52 }
 0x4c7   : > { %1391 = vmatprep.subr.bf16.mxu0 %v1449_v2 }
 0x51d   : > { %v804_v20 = vpop.f32.mrb[12].mxu1 }
 0x51e   : > { %v1365_v22 = vpop.f32.mrb[13].mxu1 }
 0x51f   : > { %v807_v23 = vpop.f32.mrb[14].mxu1 }
 0x520   : > { %v1366_v24 = vpop.f32.mrb[15].mxu1 }
 0x590   : > { %v758_v25 = vpop.f32.mrb[12].mxu0 }
 0x591   : > { %v1623_v26 = vadd.f32 %v804_v20, %v758_v25  ;;  %v1359_v27 = vpop.f32.mrb[13].mxu0 }
 0x592   : > { %v761_v29 = vpop.f32.mrb[14].mxu0 }
 0x593   : > { %v1360_v30 = vpop.f32.mrb[15].mxu0 }
 0x594   : > { %v1280_v30 = vld [vmem:[%s1687_s6] ss:$0 sm:$0xff] }
 0x598   : > { %v854_v31 = vpop.f32.mrb[16].mxu0 }
 0x599   : > { %v860_v32 = vmul.f32 0.35355338, %v854_v31  ;;  %v1371_v33 = vpop.f32.mrb[17].mxu0 }
 0x59a   : > { %v857_v34 = vpop.f32.mrb[18].mxu0 }
 0x59b   : > { %v1372_v35 = vpop.f32.mrb[19].mxu0  ;;  %v861_v36 = vadd.f32 %v860_v32, %v1579_v28 }
 0x59d   : > { %v862_v37 = vsel %vm489_vm2, %v861_v36, -inf }
 0x59e   : > { %863 = vmax.xlane.f32.xlu1 %v862_v37 }
 0x5af   : > { %974 = vrot.lane.b32.xlu1 %v1560_v21, %s1454_s15 }
 0x5b3   : > { %972 = vrot.lane.b32.xlu1 %v1557_v14, %s1454_s15 }
 0x62b   : > { %v864_v38 = vpop.xlane.xlu1 %863 }
 0x62c   : > { %v865_v39 = vsub.f32 %v861_v36, %v864_v38 }
 0x62e   : > { %v866_v40 = vmul.f32 1.442695, %v865_v39 }
 0x62f   : > { %v975_v47 = vpop.permute.xlu1 %974 }
 0x630   : > { %1430 = vpow2.f32 %v866_v40  ;;  %v980_v49 = vsel %vm489_vm2, %v975_v47, 0 }
 0x633   : > { %v973_v50 = vpop.permute.xlu1 %972 }
 0x63a   : > { %v1431_v41 = vpop.eup %1430 }
 0x63b   : > { %v868_v42 = vsel %vm489_vm2, %v1431_v41, 0.0 }
 0x63c   : > { %869 = vadd.xlane.f32.xlu0 %v868_v42 }
 0x652   : > { %874 = vrot.lane.b32.xlu0 %v1560_v21, %s1455_s16 }
 0x6c9   : > { %v870_v43 = vpop.xlane.xlu0 %869 }
 0x6ca   : > { %1432 = vrcp.f32 %v870_v43 }
 0x6cd   : > { %v875_v44 = vpop.permute.xlu0 %874 }
 0x6ce   : > { %v880_v45 = vsel %vm556_vm3, %v875_v44, 0 }
 0x6cf   : > { %1374 = vmatpush3.bf16.msra.mxu1 %v880_v45  ;;  %v1282_v45 = vld [vmem:[%s1689_s8] ss:$0 sm:$0xff] }
 0x6d0   : > { %1385 = vmatprep.subr.bf16.mxu1 %v1449_v2 }
 0x6d4   : > { %v1433_v14 = vpop.eup %1432 }
 0x6d5   : > { %v872_v46 = vmul.f32 %v1433_v14, %v1431_v41 }
 0x6d7   : > { %v873_v48 = vpack.c.bf16 %v872_v46, %v872_v46 }
 0x6d9   : > { %1376 = vmatmul.mubr.msk.bf16.vlgmr.msra.gmra.mrb[16].mxu1 %vm489_vm2, %v873_v48 }
 0x6da   : > { %1386 = vmatpush3.bf16.xpose.msra.mxu1 %v980_v49  ;;  %1387 = vmatprep.mubr.msk.bf16.mxu1 %vm1450_vm0, %v1449_v2 }
 0x6db   : > { %1397 = vmatprep.subr.bf16.mxu1 %v1449_v2 }
 0x6e1   : > { %1388 = vmatmul.mubr.msk.bf16.vlgmr.msra.gmra.mrb[20].mxu1 %vm489_vm2, %v973_v50 }
 0x6e2   : > { %1399 = vmatprep.mubr.msk.bf16.mxu1 %vm1450_vm0, %v1449_v2 }
 0x7ac   : > { %v916_v53 = vpop.f32.mrb[16].mxu1 }
 0x7ad   : > { %v922_v54 = vpack.c.bf16 %v916_v53, %v916_v53  ;;  %v1377_v55 = vpop.f32.mrb[17].mxu1 }
 0x7ae   : > { %v919_v56 = vpop.f32.mrb[18].mxu1 }
 0x7af   : > { %v1378_v57 = vpop.f32.mrb[19].mxu1  ;;  %1382 = vmatmul.mubr.msk.bf16.vlgmr.msra.gmra.mrb[20].mxu0 %vm489_vm2, %v922_v54 }
 0x7b0   : > { %1393 = vmatprep.mubr.msk.bf16.mxu0 %vm1450_vm0, %v1449_v2 }
 0x7b4   : > { %v1016_v58 = vpop.f32.mrb[20].mxu1 }
 0x7b5   : > { %v1022_v59 = vmul.f32 0.35355338, %v1016_v58  ;;  %v1389_v60 = vpop.f32.mrb[21].mxu1 }
 0x7b6   : > { %v1019_v61 = vpop.f32.mrb[22].mxu1 }
 0x7b7   : > { %v1390_v62 = vpop.f32.mrb[23].mxu1  ;;  %v1023_v63 = vadd.f32 %v1022_v59, %v1579_v28  ;;  %v1278_v28 = vld [vmem:[%s1686_s5 + $0xc] sm:$0xf] }
 0x7b8   : > { %v1091_v9 = vsel %vm556_vm3, %v1278_v28, 0 }
 0x7b9   : > { %v1024_v0 = vsel %vm489_vm2, %v1023_v63, -inf  ;;  %1398 = vmatpush3.bf16.msra.mxu1 %v1091_v9 }
 0x7ba   : > { %1025 = vmax.xlane.f32.xlu0 %v1024_v0 }
 0x7d0   : > { %1036 = vrot.lane.b32.xlu0 %v1560_v21, %s1456_s20 }
 0x847   : > { %v1026_v1 = vpop.xlane.xlu0 %1025 }
 0x848   : > { %v1027_v3 = vsub.f32 %v1023_v63, %v1026_v1 }
 0x84a   : > { %v1028_v5 = vmul.f32 1.442695, %v1027_v3 }
 0x84b   : > { %v1037_v6 = vpop.permute.xlu0 %1036 }
 0x84c   : > { %1434 = vpow2.f32 %v1028_v5  ;;  %v1042_v2 = vsel %vm556_vm3, %v1037_v6, 0 }
 0x84d   : > { %1392 = vmatpush3.bf16.msra.mxu0 %v1042_v2 }
 0x856   : > { %v1435_v7 = vpop.eup %1434 }
 0x857   : > { %v1030_v8 = vsel %vm489_vm2, %v1435_v7, 0.0 }
 0x858   : > { %1031 = vadd.xlane.f32.xlu1 %v1030_v8 }
 0x882   : > { %v965_v21 = vpop.f32.mrb[20].mxu0 }
 0x883   : > { %v971_v10 = vadd.f32 %v965_v21, %v1623_v26  ;;  %v1383_v11 = vpop.f32.mrb[21].mxu0 }
 0x884   : > { %v968_v12 = vpop.f32.mrb[22].mxu0 }
 0x885   : > { %v1384_v13 = vpop.f32.mrb[23].mxu0 }
 0x8e5   : > { %v1032_v15 = vpop.xlane.xlu1 %1031 }
 0x8e6   : > { %1436 = vrcp.f32 %v1032_v15 }
 0x8f0   : > { %v1437_v16 = vpop.eup %1436 }
 0x8f1   : > { %v1034_v17 = vmul.f32 %v1437_v16, %v1435_v7 }
 0x8f3   : > { %v1035_v18 = vpack.c.bf16 %v1034_v17, %v1034_v17 }
 0x8f5   : > { %1394 = vmatmul.mubr.msk.bf16.vlgmr.msra.gmra.mrb[24].mxu0 %vm489_vm2, %v1035_v18 }
 0x9c8   : > { %v1078_v19 = vpop.f32.mrb[24].mxu0 }
 0x9c9   : > { %v1084_v20 = vpack.c.bf16 %v1078_v19, %v1078_v19  ;;  %v1395_v22 = vpop.f32.mrb[25].mxu0 }
 0x9ca   : > { %v1081_v23 = vpop.f32.mrb[26].mxu0 }
 0x9cb   : > { %v1396_v24 = vpop.f32.mrb[27].mxu0  ;;  %1400 = vmatmul.mubr.msk.bf16.vlgmr.msra.gmra.mrb[24].mxu1 %vm489_vm2, %v1084_v20 }
 0xa9e   : > { %v1127_v25 = vpop.f32.mrb[24].mxu1 }
 0xa9f   : > { %v1133_v27 = vadd.f32 %v1127_v25, %v971_v10  ;;  %v1401_v26 = vpop.f32.mrb[25].mxu1 }
 0xaa0   : > { %v1130_v29 = vpop.f32.mrb[26].mxu1 }
 0xaa1   : > { %v1134_v31 = vadd.f32 %v1133_v27, %v1540_v4  ;;  %v1402_v32 = vpop.f32.mrb[27].mxu1  ;;  %v1281_v4 = vld [vmem:[%s1688_s7] ss:$0 sm:$0xff] }
 0xaa3   : > { %v1142_v33 = vadd.f32 %v1280_v30, %v1134_v31 }
 0xaa5   : > { %v1143_v34 = vsel %vm390_vm1, %v1142_v33, 0.0 }
 0xaa6   : > { %1144 = vadd.xlane.f32.xlu1 %v1143_v34 }
 0xb33   : > { %v1145_v35 = vpop.xlane.xlu1 %1144 }
 0xb34   : > { %v1147_v36 = vmul.f32 0.03125, %v1145_v35 }
 0xb36   : > { %v1148_v37 = vsub.f32 %v1142_v33, %v1147_v36 }
 0xb38   : > { %v1149_v38 = vmul.f32 %v1148_v37, %v1148_v37 }
 0xb3a   : > { %v1150_v39 = vsel %vm390_vm1, %v1149_v38, 0.0 }
 0xb3b   : > { %1151 = vadd.xlane.f32.xlu1 %v1150_v39 }
 0xbc8   : > { %v1152_v40 = vpop.xlane.xlu1 %1151 }
 0xbc9   : > { %v1153_v41 = vmul.f32 0.03125, %v1152_v40 }
 0xbcb   : > { %v1154_v42 = vadd.f32 1e-05, %v1153_v41 }
 0xbcd   : > { %1438 = vrsqrt.f32 %v1154_v42 }
 0xbd7   : > { %v1439_v43 = vpop.eup %1438 }
 0xbd8   : > { %v1156_v44 = vmul.f32 %v1439_v43, %v1148_v37 }
 0xbda   : > { %v1164_v14 = vmul.f32 %v1281_v4, %v1156_v44 }
 0xbdc   : > { %v1172_v46 = vadd.f32 %v1282_v45, %v1164_v14 }
 0xbde   : > { %1173 = vst.msk [vmem:[%s361_s11] sm:$0xff] %vm390_vm1, %v1172_v46 }
 0xbdf PF: > { %s19_s30 = sadd.s32 1, %s1446_s30  }
 0xbe0   : > { %p16_p4 = scmp.ge.s32.totalorder %s19_s30, 4  }
 0xbe2   :  { %18 = sbr.rel (!%p16_p4) target bundleno = 1 (0x1), region = 95 }

// kernel: transformer_translator_forward.17
= control target key start
LH: loop header
LB: loop body
LE: loop exit
PB: predicated region body
PF: predicated region fallthrough
CT: control target
= control target key end

     0   :  { %s1511_s30 = smov 0   ;;  %s1683_s0 = inlined_call_operand.vmem [shape: f32[2,6,32], index: 0, kind: input, shape index: {}, may-alias: {0,1}]   ;;  %s1684_s1 = inlined_call_operand.vmem [shape: f32[2,6,32], index: 1, kind: input, shape index: {}, may-alias: {0,1}]   ;;  %s1685_s2 = inlined_call_operand.vmem [shape: f32[2,6,6], index: 2, kind: input, shape index: {}]   ;;  %s1686_s3 = inlined_call_operand.vmem [shape: bf16[32,96], index: 3, kind: input, shape index: {}]   ;;  %s1687_s4 = inlined_call_operand.vmem [shape: f32[1,96], index: 4, kind: input, shape index: {}]   ;;  %s1688_s5 = inlined_call_operand.vmem [shape: bf16[4,8,32], index: 5, kind: input, shape index: {}]   ;;  %s1689_s6 = inlined_call_operand.vmem [shape: f32[1,32], index: 6, kind: input, shape index: {}]   ;;  %s1690_s7 = inlined_call_operand.vmem [shape: f32[1,32], index: 7, kind: input, shape index: {}]   ;;  %s1691_s8 = inlined_call_operand.vmem [shape: f32[1,32], index: 8, kind: input, shape index: {}]   ;;  %s1692_s9 = inlined_call_operand.vmem [shape: f32[2,6,32], index: 9, kind: output, shape index: {}]  }
   0x1 LB: > { %s1255_s10 = sadd.s32 4294967295, %s1450_s30   ;;  %p1259_p0 = scmp.ge.s32.totalorder %s1450_s30, 1  ;;  %s1450_s30 = sphi %s1511_s30, %s19_s30  }
   0x2   : > { %p304_p1 = scmp.lt.s32.totalorder %s1450_s30, 3 }
   0x4   : > { %p305_p2 = pnand %p1259_p0, %p304_p1 }
   0x5   : > { %v1424_v0 = vld [vmem:[%s1686_s3] sm:$0xff] (!%p305_p2)   ;;  %s1452_s13 = smov (!%p305_p2), 96   ;;  %v1425_v1 = vld [vmem:[%s1686_s3 + $0x8] sm:$0xff] (!%p305_p2)   ;;  %v1453_v2 = vmov (!%p305_p2), 0.0   ;;  %p346_p3 = scmp.lt.s32.totalorder (!%p305_p2), %s1255_s10, 1  ;;  %vm1454_vm0 = vmmov (!%p305_p2), 0  }
   0x6   : > { %308 = sbr.rel (%p305_p2) target bundleno = 3039 (0xbdf), region = 56  ;;  %434 = vrot.lane.b32.xlu0 (!%p305_p2), %v1424_v0, %s1452_s13  ;;  %1327 = vmatprep.subr.bf16.mxu1 (!%p305_p2), %v1453_v2  ;;  %v1264_v3 = vld [vmem:[%s1687_s4] ss:$0 sm:$0xff] (!%p305_p2)  ;;  %vm390_vm1 = vcmask (!%p305_p2), 261120   ;;  %s1455_s25 = smov (!%p305_p2), 120   ;;  %vm489_vm2 = vcmask (!%p305_p2), 64512  }
   0x7   : > { %1319 = vmatprep.subr.bf16.mxu0 (!%p305_p2), %v1453_v2  ;;  %1331 = vmatprep.mubr.msk.bf16.mxu1 (!%p305_p2), %vm1454_vm0, %v1453_v2  ;;  %vm538_vm3 = vcmask (!%p305_p2), 46080   ;;  %s1456_s29 = smov (!%p305_p2), 112   ;;  %vm558_vm4 = vcmask (!%p305_p2), 1042432   ;;  %vm554_vm5 = vcmask (!%p305_p2), 48128   ;;  %vm723_vm6 = vcmask (!%p305_p2), 1043456   ;;  %s1458_s15 = smov (!%p305_p2), 104  }
   0x8   : > { %1320 = vmatpush3.bf16.msra.mxu0 (!%p305_p2), %v1424_v0  ;;  %1323 = vmatprep.mubr.msk.bf16.mxu0 (!%p305_p2), %vm1454_vm0, %v1453_v2  ;;  %v1273_v58 = vld [vmem:[%s1688_s5 + $0x4] sm:$0xf] (!%p305_p2)  ;;  %v603_v0 = vld [vmem:[%s1688_s5] sm:$0xf] (!%p305_p2)  ;;  %s1459_s16 = smov (!%p305_p2), 80   ;;  %s1460_s20 = smov (!%p305_p2), 72  }
   0x9   : > { %1321 = vmatprep.subr.bf16.mxu0 (!%p305_p2), %v1453_v2  ;;  %440 = vrot.lane.b32.xlu1 (!%p305_p2), %v1264_v3, %s1452_s13  ;;  %v725_v59 = vsel (!%p305_p2), %vm723_vm6, %v1273_v58, 0  ;;  %vm1146_vm7 = vcmask (!%p305_p2), 259072  }
   0xa   : > { %436 = vrot.lane.b32.xlu0 (!%p305_p2), %v1425_v1, %s1452_s13 }
   0xc   : > { %1322 = vmatpush3.bf16.msra.mxu0 (!%p305_p2), %v1425_v1 }
   0xd   : > { %s1694_s10 = smov (!%p346_p3, %s1255_s10), 1  ;;  %1335 = vmatprep.subr.bf16.mxu0 %v1453_v2 }
   0xe   : > { %s1538_s18 = sshll.u32 %s1694_s10, 3  ;;  %s1457_s10 = smov 88  }
   0xf   : > { %s349_s21 = scalar_lea.vmem %s1683_s0, %s1538_s18  ;;  %s353_s24 = scalar_lea.vmem %s1684_s1, %s1538_s18 }
  0x10   : > { %v1544_v4 = vld [vmem:[%s349_s21] sm:$0x3f]  ;;  %s357_s28 = scalar_lea.vmem %s1685_s2, %s1538_s18  ;;  %s361_s11 = scalar_lea.vmem %s1692_s9, %s1538_s18 }
  0x11   : > { %v370_v5 = vpack.c.bf16 %v1544_v4, %v1544_v4  ;;  %v364_v7 = vld [vmem:[%s353_s24] sm:$0x3f] }
  0x12   : > { %v371_v9 = vpack.c.bf16 %v364_v7, %v364_v7  ;;  %v1581_v28 = vld [vmem:[%s357_s28] sm:$0x3f] }
  0x13   : > { %1324 = vmatmul.mubr.msk.bf16.vlgmr.msra.gmra.mrb[0].mxu0 %vm390_vm1, %v370_v5  ;;  %v771_v5 = vsel %vm723_vm6, %v603_v0, 0 }
  0x14   : > { %1337 = vmatprep.mubr.msk.bf16.mxu0 %vm1454_vm0, %v1453_v2 }
  0x78   : > { %v435_v6 = vpop.permute.xlu0 %434 }
  0x79   : > { %1328 = vmatpush3.bf16.msra.mxu1 %v435_v6 }
  0x7a   : > { %1329 = vmatprep.subr.bf16.mxu1 %v1453_v2 }
  0x7b   : > { %v441_v16 = vpop.permute.xlu1 %440 }
  0x7c   : > { %v437_v8 = vpop.permute.xlu0 %436 }
  0x7d   : > { %1330 = vmatpush3.bf16.msra.mxu1 %v437_v8 }
  0x7e   : > { %1341 = vmatprep.subr.bf16.mxu1 %v1453_v2 }
  0x80   : > { %1332 = vmatmul.mubr.msk.bf16.vlgmr.msra.gmra.mrb[0].mxu1 %vm390_vm1, %v371_v9 }
  0x81   : > { %1343 = vmatprep.mubr.msk.bf16.mxu1 %vm1454_vm0, %v1453_v2 }
  0xe6   : > { %v428_v10 = vpop.f32.mrb[0].mxu0 }
  0xe7   : > { %v429_v11 = vadd.f32 %v1264_v3, %v428_v10  ;;  %v1325_v12 = vpop.f32.mrb[1].mxu0 }
  0xe8   : > { %v431_v13 = vpop.f32.mrb[2].mxu0 }
  0xe9   : > { %v1559_v14 = vpack.c.bf16 %v429_v11, %v429_v11  ;;  %v1326_v15 = vpop.f32.mrb[3].mxu0 }
  0xeb   : > { %605 = vrot.lane.b32.xlu0 %v1559_v14, %s1455_s25 }
 0x153   : > { %v480_v17 = vpop.f32.mrb[0].mxu1 }
 0x154   : > { %v481_v18 = vadd.f32 %v480_v17, %v441_v16  ;;  %v1333_v19 = vpop.f32.mrb[1].mxu1 }
 0x155   : > { %v483_v20 = vpop.f32.mrb[2].mxu1 }
 0x156   : > { %v1562_v21 = vpack.c.bf16 %v481_v18, %v481_v18  ;;  %v1334_v22 = vpop.f32.mrb[3].mxu1 }
 0x158   : > { %607 = vrot.lane.b32.xlu1 %v1562_v21, %s1455_s25  ;;  %v494_v23 = vsel %vm489_vm2, %v1562_v21, 0 }
 0x159   : > { %1336 = vmatpush3.bf16.xpose.msra.mxu0 %v494_v23 }
 0x15a   : > { %1347 = vmatprep.subr.bf16.mxu0 %v1453_v2 }
 0x15d   : > { %v606_v26 = vpop.permute.xlu0 %605 }
 0x160   : > { %1338 = vmatmul.mubr.msk.bf16.vlgmr.msra.gmra.mrb[4].mxu0 %vm489_vm2, %v1559_v14 }
 0x161   : > { %1349 = vmatprep.mubr.msk.bf16.mxu0 %vm1454_vm0, %v1453_v2 }
 0x1ca   : > { %v608_v24 = vpop.permute.xlu1 %607 }
 0x1cb   : > { %v613_v25 = vsel %vm489_vm2, %v608_v24, 0 }
 0x1cc   : > { %1348 = vmatpush3.bf16.xpose.msra.mxu0 %v613_v25 }
 0x1cd   : > { %1359 = vmatprep.subr.bf16.mxu0 %v1453_v2 }
 0x1d3   : > { %1350 = vmatmul.mubr.msk.bf16.vlgmr.msra.gmra.mrb[8].mxu0 %vm489_vm2, %v606_v26 }
 0x1d4   : > { %1361 = vmatprep.mubr.msk.bf16.mxu0 %vm1454_vm0, %v1453_v2  ;;  %1360 = vmatpush3.bf16.msra.mxu0 %v725_v59 }
 0x1d5   : > { %1371 = vmatprep.subr.bf16.mxu0 %v1453_v2 }
 0x233   : > { %v530_v27 = vpop.f32.mrb[4].mxu0 }
 0x234   : > { %v536_v29 = vmul.f32 0.35355338, %v530_v27  ;;  %v1339_v30 = vpop.f32.mrb[5].mxu0 }
 0x235   : > { %v533_v31 = vpop.f32.mrb[6].mxu0 }
 0x236   : > { %v1340_v32 = vpop.f32.mrb[7].mxu0  ;;  %v537_v33 = vadd.f32 %v536_v29, %v1581_v28 }
 0x238   : > { %v539_v34 = vsel %vm538_vm3, %v537_v33, -inf }
 0x239   : > { %540 = vmax.xlane.f32.xlu1 %v539_v34 }
 0x2a6   : > { %v649_v35 = vpop.f32.mrb[8].mxu0 }
 0x2a7   : > { %v655_v36 = vmul.f32 0.35355338, %v649_v35  ;;  %v1351_v37 = vpop.f32.mrb[9].mxu0 }
 0x2a8   : > { %v652_v38 = vpop.f32.mrb[10].mxu0 }
 0x2a9   : > { %v1352_v39 = vpop.f32.mrb[11].mxu0  ;;  %v656_v40 = vadd.f32 %v655_v36, %v1581_v28 }
 0x2ab   : > { %v657_v41 = vsel %vm538_vm3, %v656_v40, -inf }
 0x2ac   : > { %658 = vmax.xlane.f32.xlu0 %v657_v41 }
 0x2c6   : > { %v541_v42 = vpop.xlane.xlu1 %540 }
 0x2c7   : > { %v542_v43 = vsub.f32 %v537_v33, %v541_v42 }
 0x2c9   : > { %v543_v44 = vmul.f32 1.442695, %v542_v43 }
 0x2cb   : > { %1426 = vpow2.f32 %v543_v44 }
 0x2d5   : > { %v1427_v45 = vpop.eup %1426 }
 0x2d6   : > { %v545_v46 = vsel %vm538_vm3, %v1427_v45, 0.0 }
 0x2d7   : > { %546 = vadd.xlane.f32.xlu0 %v545_v46 }
 0x2ed   : > { %552 = vrot.lane.b32.xlu0 %v1562_v21, %s1452_s13 }
 0x2f1   : > { %813 = vrot.lane.b32.xlu0 %v1559_v14, %s1456_s29 }
 0x339   : > { %v659_v47 = vpop.xlane.xlu0 %658 }
 0x33a   : > { %v660_v48 = vsub.f32 %v656_v40, %v659_v47 }
 0x33c   : > { %v661_v49 = vmul.f32 1.442695, %v660_v48 }
 0x33e   : > { %1428 = vpow2.f32 %v661_v49 }
 0x348   : > { %v1429_v50 = vpop.eup %1428 }
 0x349   : > { %v663_v51 = vsel %vm538_vm3, %v1429_v50, 0.0 }
 0x34a   : > { %664 = vadd.xlane.f32.xlu1 %v663_v51  ;;  %v1278_v51 = vld [vmem:[%s1688_s5 + $0x8] sm:$0xf] }
 0x35b   : > { %669 = vrot.lane.b32.xlu1 %v1562_v21, %s1457_s10 }
 0x35f   : > { %815 = vrot.lane.b32.xlu1 %v1562_v21, %s1456_s29 }
 0x364   : > { %v547_v52 = vpop.xlane.xlu0 %546 }
 0x365   : > { %1430 = vrcp.f32 %v547_v52  ;;  %v932_v52 = vsel %vm723_vm6, %v1278_v51, 0 }
 0x368   : > { %v553_v53 = vpop.permute.xlu0 %552 }
 0x369   : > { %v560_v54 = vsel %vm558_vm4, %v553_v53, 0 }
 0x36a   : > { %1342 = vmatpush3.bf16.msra.mxu1 %v560_v54 }
 0x36b   : > { %1353 = vmatprep.subr.bf16.mxu1 %v1453_v2 }
 0x36c   : > { %v814_v19 = vpop.permute.xlu0 %813 }
 0x36f   : > { %v1431_v55 = vpop.eup %1430 }
 0x370   : > { %v549_v56 = vmul.f32 %v1431_v55, %v1427_v45 }
 0x372   : > { %v550_v57 = vpack.c.bf16 %v549_v56, %v549_v56 }
 0x374   : > { %1344 = vmatmul.mubr.msk.bf16.vlgmr.msra.gmra.mrb[4].mxu1 %vm554_vm5, %v550_v57 }
 0x375   : > { %1355 = vmatprep.mubr.msk.bf16.mxu1 %vm1454_vm0, %v1453_v2 }
 0x3d7   : > { %v665_v60 = vpop.xlane.xlu1 %664 }
 0x3d8   : > { %1432 = vrcp.f32 %v665_v60 }
 0x3db   : > { %v670_v61 = vpop.permute.xlu1 %669 }
 0x3dc   : > { %v675_v62 = vsel %vm558_vm4, %v670_v61, 0 }
 0x3dd   : > { %1354 = vmatpush3.bf16.msra.mxu1 %v675_v62 }
 0x3de   : > { %1365 = vmatprep.subr.bf16.mxu1 %v1453_v2 }
 0x3df   : > { %v816_v11 = vpop.permute.xlu1 %815 }
 0x3e0   : > { %v821_v17 = vsel %vm489_vm2, %v816_v11, 0 }
 0x3e2   : > { %v1433_v63 = vpop.eup %1432 }
 0x3e3   : > { %v667_v1 = vmul.f32 %v1433_v63, %v1429_v50 }
 0x3e5   : > { %v668_v3 = vpack.c.bf16 %v667_v1, %v667_v1 }
 0x3e7   : > { %1356 = vmatmul.mubr.msk.bf16.vlgmr.msra.gmra.mrb[8].mxu1 %vm554_vm5, %v668_v3 }
 0x3e8   : > { %1366 = vmatpush3.bf16.msra.mxu1 %v771_v5  ;;  %1367 = vmatprep.mubr.msk.bf16.mxu1 %vm1454_vm0, %v1453_v2 }
 0x3e9   : > { %1377 = vmatprep.subr.bf16.mxu1 %v1453_v2 }
 0x447   : > { %v596_v6 = vpop.f32.mrb[4].mxu1 }
 0x448   : > { %v602_v7 = vpack.c.bf16 %v596_v6, %v596_v6  ;;  %v1345_v8 = vpop.f32.mrb[5].mxu1 }
 0x449   : > { %v599_v9 = vpop.f32.mrb[6].mxu1 }
 0x44a   : > { %v1346_v10 = vpop.f32.mrb[7].mxu1  ;;  %1368 = vmatmul.mubr.msk.bf16.vlgmr.msra.gmra.mrb[12].mxu1 %vm489_vm2, %v602_v7 }
 0x44b   : > { %1379 = vmatprep.mubr.msk.bf16.mxu1 %vm1454_vm0, %v1453_v2 }
 0x4ba   : > { %v711_v12 = vpop.f32.mrb[8].mxu1 }
 0x4bb   : > { %v717_v13 = vpack.c.bf16 %v711_v12, %v711_v12  ;;  %v1357_v15 = vpop.f32.mrb[9].mxu1 }
 0x4bc   : > { %v714_v16 = vpop.f32.mrb[10].mxu1 }
 0x4bd   : > { %v1358_v18 = vpop.f32.mrb[11].mxu1  ;;  %1362 = vmatmul.mubr.msk.bf16.vlgmr.msra.gmra.mrb[12].mxu0 %vm489_vm2, %v717_v13 }
 0x4be   : > { %1372 = vmatpush3.bf16.xpose.msra.mxu0 %v821_v17  ;;  %1373 = vmatprep.mubr.msk.bf16.mxu0 %vm1454_vm0, %v1453_v2 }
 0x4bf   : > { %1383 = vmatprep.subr.bf16.mxu0 %v1453_v2 }
 0x4c5   : > { %1374 = vmatmul.mubr.msk.bf16.vlgmr.msra.gmra.mrb[16].mxu0 %vm489_vm2, %v814_v19 }
 0x4c6   : > { %1385 = vmatprep.mubr.msk.bf16.mxu0 %vm1454_vm0, %v1453_v2  ;;  %1384 = vmatpush3.bf16.msra.mxu0 %v932_v52 }
 0x4c7   : > { %1395 = vmatprep.subr.bf16.mxu0 %v1453_v2 }
 0x51d   : > { %v807_v20 = vpop.f32.mrb[12].mxu1 }
 0x51e   : > { %v1369_v22 = vpop.f32.mrb[13].mxu1 }
 0x51f   : > { %v810_v23 = vpop.f32.mrb[14].mxu1 }
 0x520   : > { %v1370_v24 = vpop.f32.mrb[15].mxu1 }
 0x590   : > { %v761_v25 = vpop.f32.mrb[12].mxu0 }
 0x591   : > { %v1625_v26 = vadd.f32 %v807_v20, %v761_v25  ;;  %v1363_v27 = vpop.f32.mrb[13].mxu0 }
 0x592   : > { %v764_v29 = vpop.f32.mrb[14].mxu0 }
 0x593   : > { %v1364_v30 = vpop.f32.mrb[15].mxu0 }
 0x594   : > { %v1284_v30 = vld [vmem:[%s1689_s6] ss:$0 sm:$0xff] }
 0x598   : > { %v857_v31 = vpop.f32.mrb[16].mxu0 }
 0x599   : > { %v863_v32 = vmul.f32 0.35355338, %v857_v31  ;;  %v1375_v33 = vpop.f32.mrb[17].mxu0 }
 0x59a   : > { %v860_v34 = vpop.f32.mrb[18].mxu0 }
 0x59b   : > { %v1376_v35 = vpop.f32.mrb[19].mxu0  ;;  %v864_v36 = vadd.f32 %v863_v32, %v1581_v28 }
 0x59d   : > { %v865_v37 = vsel %vm538_vm3, %v864_v36, -inf }
 0x59e   : > { %866 = vmax.xlane.f32.xlu1 %v865_v37 }
 0x5af   : > { %977 = vrot.lane.b32.xlu1 %v1562_v21, %s1458_s15 }
 0x5b3   : > { %975 = vrot.lane.b32.xlu1 %v1559_v14, %s1458_s15 }
 0x62b   : > { %v867_v38 = vpop.xlane.xlu1 %866 }
 0x62c   : > { %v868_v39 = vsub.f32 %v864_v36, %v867_v38 }
 0x62e   : > { %v869_v40 = vmul.f32 1.442695, %v868_v39 }
 0x62f   : > { %v978_v47 = vpop.permute.xlu1 %977 }
 0x630   : > { %1434 = vpow2.f32 %v869_v40  ;;  %v983_v49 = vsel %vm489_vm2, %v978_v47, 0 }
 0x633   : > { %v976_v50 = vpop.permute.xlu1 %975 }
 0x63a   : > { %v1435_v41 = vpop.eup %1434 }
 0x63b   : > { %v871_v42 = vsel %vm538_vm3, %v1435_v41, 0.0 }
 0x63c   : > { %872 = vadd.xlane.f32.xlu0 %v871_v42 }
 0x652   : > { %877 = vrot.lane.b32.xlu0 %v1562_v21, %s1459_s16 }
 0x6c9   : > { %v873_v43 = vpop.xlane.xlu0 %872 }
 0x6ca   : > { %1436 = vrcp.f32 %v873_v43 }
 0x6cd   : > { %v878_v44 = vpop.permute.xlu0 %877 }
 0x6ce   : > { %v883_v45 = vsel %vm558_vm4, %v878_v44, 0 }
 0x6cf   : > { %1378 = vmatpush3.bf16.msra.mxu1 %v883_v45  ;;  %v1286_v45 = vld [vmem:[%s1691_s8] ss:$0 sm:$0xff] }
 0x6d0   : > { %1389 = vmatprep.subr.bf16.mxu1 %v1453_v2 }
 0x6d4   : > { %v1437_v14 = vpop.eup %1436 }
 0x6d5   : > { %v875_v46 = vmul.f32 %v1437_v14, %v1435_v41 }
 0x6d7   : > { %v876_v48 = vpack.c.bf16 %v875_v46, %v875_v46 }
 0x6d9   : > { %1380 = vmatmul.mubr.msk.bf16.vlgmr.msra.gmra.mrb[16].mxu1 %vm554_vm5, %v876_v48 }
 0x6da   : > { %1390 = vmatpush3.bf16.xpose.msra.mxu1 %v983_v49  ;;  %1391 = vmatprep.mubr.msk.bf16.mxu1 %vm1454_vm0, %v1453_v2 }
 0x6db   : > { %1401 = vmatprep.subr.bf16.mxu1 %v1453_v2 }
 0x6e1   : > { %1392 = vmatmul.mubr.msk.bf16.vlgmr.msra.gmra.mrb[20].mxu1 %vm489_vm2, %v976_v50 }
 0x6e2   : > { %1403 = vmatprep.mubr.msk.bf16.mxu1 %vm1454_vm0, %v1453_v2 }
 0x7ac   : > { %v919_v53 = vpop.f32.mrb[16].mxu1 }
 0x7ad   : > { %v925_v54 = vpack.c.bf16 %v919_v53, %v919_v53  ;;  %v1381_v55 = vpop.f32.mrb[17].mxu1 }
 0x7ae   : > { %v922_v56 = vpop.f32.mrb[18].mxu1 }
 0x7af   : > { %v1382_v57 = vpop.f32.mrb[19].mxu1  ;;  %1386 = vmatmul.mubr.msk.bf16.vlgmr.msra.gmra.mrb[20].mxu0 %vm489_vm2, %v925_v54 }
 0x7b0   : > { %1397 = vmatprep.mubr.msk.bf16.mxu0 %vm1454_vm0, %v1453_v2 }
 0x7b4   : > { %v1019_v58 = vpop.f32.mrb[20].mxu1 }
 0x7b5   : > { %v1025_v59 = vmul.f32 0.35355338, %v1019_v58  ;;  %v1393_v60 = vpop.f32.mrb[21].mxu1 }
 0x7b6   : > { %v1022_v61 = vpop.f32.mrb[22].mxu1 }
 0x7b7   : > { %v1394_v62 = vpop.f32.mrb[23].mxu1  ;;  %v1026_v63 = vadd.f32 %v1025_v59, %v1581_v28  ;;  %v1282_v28 = vld [vmem:[%s1688_s5 + $0xc] sm:$0xf] }
 0x7b8   : > { %v1094_v9 = vsel %vm723_vm6, %v1282_v28, 0 }
 0x7b9   : > { %v1027_v0 = vsel %vm538_vm3, %v1026_v63, -inf  ;;  %1402 = vmatpush3.bf16.msra.mxu1 %v1094_v9 }
 0x7ba   : > { %1028 = vmax.xlane.f32.xlu0 %v1027_v0 }
 0x7d0   : > { %1039 = vrot.lane.b32.xlu0 %v1562_v21, %s1460_s20 }
 0x847   : > { %v1029_v1 = vpop.xlane.xlu0 %1028 }
 0x848   : > { %v1030_v3 = vsub.f32 %v1026_v63, %v1029_v1 }
 0x84a   : > { %v1031_v5 = vmul.f32 1.442695, %v1030_v3 }
 0x84b   : > { %v1040_v6 = vpop.permute.xlu0 %1039 }
 0x84c   : > { %1438 = vpow2.f32 %v1031_v5  ;;  %v1045_v2 = vsel %vm558_vm4, %v1040_v6, 0 }
 0x84d   : > { %1396 = vmatpush3.bf16.msra.mxu0 %v1045_v2 }
 0x856   : > { %v1439_v7 = vpop.eup %1438 }
 0x857   : > { %v1033_v8 = vsel %vm538_vm3, %v1439_v7, 0.0 }
 0x858   : > { %1034 = vadd.xlane.f32.xlu1 %v1033_v8 }
 0x882   : > { %v968_v21 = vpop.f32.mrb[20].mxu0 }
 0x883   : > { %v974_v10 = vadd.f32 %v968_v21, %v1625_v26  ;;  %v1387_v11 = vpop.f32.mrb[21].mxu0 }
 0x884   : > { %v971_v12 = vpop.f32.mrb[22].mxu0 }
 0x885   : > { %v1388_v13 = vpop.f32.mrb[23].mxu0 }
 0x8e5   : > { %v1035_v15 = vpop.xlane.xlu1 %1034 }
 0x8e6   : > { %1440 = vrcp.f32 %v1035_v15 }
 0x8f0   : > { %v1441_v16 = vpop.eup %1440 }
 0x8f1   : > { %v1037_v17 = vmul.f32 %v1441_v16, %v1439_v7 }
 0x8f3   : > { %v1038_v18 = vpack.c.bf16 %v1037_v17, %v1037_v17 }
 0x8f5   : > { %1398 = vmatmul.mubr.msk.bf16.vlgmr.msra.gmra.mrb[24].mxu0 %vm554_vm5, %v1038_v18 }
 0x9c8   : > { %v1081_v19 = vpop.f32.mrb[24].mxu0 }
 0x9c9   : > { %v1087_v20 = vpack.c.bf16 %v1081_v19, %v1081_v19  ;;  %v1399_v22 = vpop.f32.mrb[25].mxu0 }
 0x9ca   : > { %v1084_v23 = vpop.f32.mrb[26].mxu0 }
 0x9cb   : > { %v1400_v24 = vpop.f32.mrb[27].mxu0  ;;  %1404 = vmatmul.mubr.msk.bf16.vlgmr.msra.gmra.mrb[24].mxu1 %vm489_vm2, %v1087_v20 }
 0xa9e   : > { %v1130_v25 = vpop.f32.mrb[24].mxu1 }
 0xa9f   : > { %v1136_v27 = vadd.f32 %v1130_v25, %v974_v10  ;;  %v1405_v26 = vpop.f32.mrb[25].mxu1 }
 0xaa0   : > { %v1133_v29 = vpop.f32.mrb[26].mxu1 }
 0xaa1   : > { %v1137_v31 = vadd.f32 %v1136_v27, %v1544_v4  ;;  %v1406_v32 = vpop.f32.mrb[27].mxu1  ;;  %v1285_v4 = vld [vmem:[%s1690_s7] ss:$0 sm:$0xff] }
 0xaa3   : > { %v1145_v33 = vadd.f32 %v1284_v30, %v1137_v31 }
 0xaa5   : > { %v1147_v34 = vsel %vm1146_vm7, %v1145_v33, 0.0 }
 0xaa6   : > { %1148 = vadd.xlane.f32.xlu1 %v1147_v34 }
 0xb33   : > { %v1149_v35 = vpop.xlane.xlu1 %1148 }
 0xb34   : > { %v1151_v36 = vmul.f32 0.03125, %v1149_v35 }
 0xb36   : > { %v1152_v37 = vsub.f32 %v1145_v33, %v1151_v36 }
 0xb38   : > { %v1153_v38 = vmul.f32 %v1152_v37, %v1152_v37 }
 0xb3a   : > { %v1154_v39 = vsel %vm1146_vm7, %v1153_v38, 0.0 }
 0xb3b   : > { %1155 = vadd.xlane.f32.xlu1 %v1154_v39 }
 0xbc8   : > { %v1156_v40 = vpop.xlane.xlu1 %1155 }
 0xbc9   : > { %v1157_v41 = vmul.f32 0.03125, %v1156_v40 }
 0xbcb   : > { %v1158_v42 = vadd.f32 1e-05, %v1157_v41 }
 0xbcd   : > { %1442 = vrsqrt.f32 %v1158_v42 }
 0xbd7   : > { %v1443_v43 = vpop.eup %1442 }
 0xbd8   : > { %v1160_v44 = vmul.f32 %v1443_v43, %v1152_v37 }
 0xbda   : > { %v1168_v14 = vmul.f32 %v1285_v4, %v1160_v44 }
 0xbdc   : > { %v1176_v46 = vadd.f32 %v1286_v45, %v1168_v14 }
 0xbde   : > { %1177 = vst.msk [vmem:[%s361_s11] sm:$0x3f] %vm1146_vm7, %v1176_v46 }
 0xbdf PF: > { %s19_s30 = sadd.s32 1, %s1450_s30  }
 0xbe0   : > { %p16_p4 = scmp.ge.s32.totalorder %s19_s30, 4  }
 0xbe2   :  { %18 = sbr.rel (!%p16_p4) target bundleno = 1 (0x1), region = 95 }

// kernel: transformer_translator_forward.19
= control target key start
LH: loop header
LB: loop body
LE: loop exit
PB: predicated region body
PF: predicated region fallthrough
CT: control target
= control target key end

     0   :  { %s633_s24 = smov 0   ;;  %s690_s0 = inlined_call_operand.vmem [shape: f32[2,6,32], index: 0, kind: input, shape index: {}]   ;;  %s691_s1 = inlined_call_operand.vmem [shape: bf16[32,64], index: 1, kind: input, shape index: {}]   ;;  %s692_s2 = inlined_call_operand.vmem [shape: f32[1,64], index: 2, kind: input, shape index: {}]   ;;  %s693_s3 = inlined_call_operand.vmem [shape: bf16[64,32], index: 3, kind: input, shape index: {}]   ;;  %s694_s4 = inlined_call_operand.vmem [shape: f32[1,32], index: 4, kind: input, shape index: {}]   ;;  %s695_s5 = inlined_call_operand.vmem [shape: f32[1,32], index: 5, kind: input, shape index: {}]   ;;  %s696_s6 = inlined_call_operand.vmem [shape: f32[1,32], index: 6, kind: input, shape index: {}]   ;;  %s697_s7 = inlined_call_operand.vmem [shape: f32[2,6,32], index: 7, kind: output, shape index: {}]  }
   0x1 LB: > { %s516_s25 = sadd.s32 4294967295, %s589_s24   ;;  %p520_p0 = scmp.ge.s32.totalorder %s589_s24, 1  ;;  %s589_s24 = sphi %s633_s24, %s17_s24  }
   0x2   : > { %p236_p1 = scmp.lt.s32.totalorder %s589_s24, 3 }
   0x4   : > { %p237_p2 = pnand %p520_p0, %p236_p1 }
   0x5   : > { %v575_v0 = vld [vmem:[%s691_s1] sm:$0xff] (!%p237_p2)   ;;  %v591_v1 = vmov (!%p237_p2), 0.0   ;;  %v576_v2 = vld [vmem:[%s691_s1 + $0x8] sm:$0xff] (!%p237_p2)   ;;  %vm592_vm0 = vmmov (!%p237_p2), 0   ;;  %p266_p3 = scmp.lt.s32.totalorder (!%p237_p2), %s516_s25, 1  ;;  %vm300_vm1 = vcmask (!%p237_p2), 261120  }
   0x6   : > { %240 = sbr.rel (%p237_p2) target bundleno = 767 (0x2ff), region = 48  ;;  %545 = vmatprep.subr.bf16.mxu0 (!%p237_p2), %v591_v1  ;;  %553 = vmatprep.subr.bf16.mxu1 (!%p237_p2), %v591_v1  ;;  %v577_v3 = vld [vmem:[%s693_s3] sm:$0xff] (!%p237_p2)   ;;  %v578_v4 = vld [vmem:[%s693_s3 + $0x8] sm:$0xff] (!%p237_p2)   ;;  %v579_v7 = vld [vmem:[%s693_s3 + $0x10] sm:$0xff] (!%p237_p2)   ;;  %vm378_vm2 = vcmask (!%p237_p2), 523264   ;;  %vm431_vm3 = vcmask (!%p237_p2), 259072  }
   0x7   : > { %546 = vmatpush3.bf16.msra.mxu0 (!%p237_p2), %v575_v0  ;;  %549 = vmatprep.mubr.msk.bf16.mxu0 (!%p237_p2), %vm592_vm0, %v591_v1  ;;  %v580_v8 = vld [vmem:[%s693_s3 + $0x18] sm:$0xff] (!%p237_p2)   ;;  %v523_v9 = vld [vmem:[%s692_s2] ss:$0 sm:$0xff] (!%p237_p2) }
   0x8   : > { %547 = vmatprep.subr.bf16.mxu0 (!%p237_p2), %v591_v1  ;;  %561 = vmatprep.mubr.msk.bf16.mxu1 (!%p237_p2), %vm592_vm0, %v591_v1  ;;  %v532_v18 = vld [vmem:[%s694_s4] ss:$0 sm:$0xff] (!%p237_p2) }
   0x9   : > { %554 = vmatpush3.bf16.msra.mxu1 (!%p237_p2), %v577_v3  ;;  %v533_v34 = vld [vmem:[%s695_s5] ss:$0 sm:$0xff] (!%p237_p2) }
   0xa   : > { %555 = vmatprep.subr.bf16.mxu1 (!%p237_p2), %v591_v1  ;;  %v534_v36 = vld [vmem:[%s696_s6] ss:$0 sm:$0xff] (!%p237_p2) }
   0xb   : > { %548 = vmatpush3.bf16.msra.mxu0 (!%p237_p2), %v576_v2 }
   0xd   : > { %s699_s25 = smov (!%p266_p3, %s516_s25), 1  ;;  %556 = vmatpush3.bf16.msra.mxu1 %v578_v4 }
   0xe   : > { %s521_s11 = sshll.u32 %s699_s25, 3  ;;  %557 = vmatprep.subr.bf16.mxu1 %v591_v1 }
   0xf   : > { %s269_s14 = scalar_lea.vmem %s690_s0, %s521_s11  ;;  %s273_s8 = scalar_lea.vmem %s697_s7, %s521_s11 }
  0x10   : > { %v275_v5 = vld [vmem:[%s269_s14] sm:$0x3f] }
  0x11   : > { %v276_v6 = vpack.c.bf16 %v275_v5, %v275_v5  ;;  %558 = vmatpush3.bf16.msra.mxu1 %v579_v7 }
  0x12   : > { %559 = vmatprep.subr.bf16.mxu1 %v591_v1 }
  0x13   : > { %550 = vmatmul.mubr.msk.bf16.vlgmr.msra.gmra.mrb[0].mxu0 %vm300_vm1, %v276_v6 }
  0x15   : > { %560 = vmatpush3.bf16.msra.mxu1 %v580_v8 }
  0xe6   : > { %v338_v10 = vpop.f32.mrb[0].mxu0 }
  0xe7   : > { %v339_v11 = vadd.f32 %v523_v9, %v338_v10  ;;  %v551_v12 = vpop.f32.mrb[1].mxu0 }
  0xe8   : > { %v341_v13 = vpop.f32.mrb[2].mxu0 }
  0xe9   : > { %v344_v14 = vmax.f32 %v339_v11, 0.0  ;;  %v552_v15 = vpop.f32.mrb[3].mxu0 }
  0xeb   : > { %v345_v16 = vpack.c.bf16 %v344_v14, %v344_v14 }
  0xed   : > { %562 = vmatmul.mubr.msk.bf16.vlgmr.msra.gmra.mrb[0].mxu1 %vm378_vm2, %v345_v16 }
 0x1c0   : > { %v416_v17 = vpop.f32.mrb[0].mxu1 }
 0x1c1   : > { %v422_v19 = vadd.f32 %v416_v17, %v275_v5  ;;  %v563_v20 = vpop.f32.mrb[1].mxu1 }
 0x1c2   : > { %v419_v21 = vpop.f32.mrb[2].mxu1 }
 0x1c3   : > { %v564_v22 = vpop.f32.mrb[3].mxu1  ;;  %v430_v23 = vadd.f32 %v532_v18, %v422_v19 }
 0x1c5   : > { %v432_v24 = vsel %vm431_vm3, %v430_v23, 0.0 }
 0x1c6   : > { %433 = vadd.xlane.f32.xlu0 %v432_v24 }
 0x253   : > { %v434_v25 = vpop.xlane.xlu0 %433 }
 0x254   : > { %v436_v26 = vmul.f32 0.03125, %v434_v25 }
 0x256   : > { %v437_v27 = vsub.f32 %v430_v23, %v436_v26 }
 0x258   : > { %v438_v28 = vmul.f32 %v437_v27, %v437_v27 }
 0x25a   : > { %v439_v29 = vsel %vm431_vm3, %v438_v28, 0.0 }
 0x25b   : > { %440 = vadd.xlane.f32.xlu0 %v439_v29 }
 0x2e8   : > { %v441_v30 = vpop.xlane.xlu0 %440 }
 0x2e9   : > { %v442_v31 = vmul.f32 0.03125, %v441_v30 }
 0x2eb   : > { %v443_v32 = vadd.f32 1e-05, %v442_v31 }
 0x2ed   : > { %581 = vrsqrt.f32 %v443_v32 }
 0x2f7   : > { %v582_v33 = vpop.eup %581 }
 0x2f8   : > { %v445_v35 = vmul.f32 %v582_v33, %v437_v27 }
 0x2fa   : > { %v453_v37 = vmul.f32 %v533_v34, %v445_v35 }
 0x2fc   : > { %v461_v38 = vadd.f32 %v534_v36, %v453_v37 }
 0x2fe   : > { %462 = vst.msk [vmem:[%s273_s8] sm:$0x3f] %vm431_vm3, %v461_v38 }
 0x2ff PF: > { %s17_s24 = sadd.s32 1, %s589_s24  }
 0x300   : > { %p14_p4 = scmp.ge.s32.totalorder %s17_s24, 4  }
 0x302   :  { %16 = sbr.rel (!%p14_p4) target bundleno = 1 (0x1), region = 78 }

// kernel: transformer_translator_forward.18
= control target key start
LH: loop header
LB: loop body
LE: loop exit
PB: predicated region body
PF: predicated region fallthrough
CT: control target
= control target key end

     0   :  { %s1509_s30 = smov 0   ;;  %s1681_s0 = inlined_call_operand.vmem [shape: f32[2,6,32], index: 0, kind: input, shape index: {}]   ;;  %s1682_s1 = inlined_call_operand.vmem [shape: f32[2,8,32], index: 1, kind: input, shape index: {}]   ;;  %s1683_s2 = inlined_call_operand.vmem [shape: f32[2,6,8], index: 2, kind: input, shape index: {}]   ;;  %s1684_s3 = inlined_call_operand.vmem [shape: bf16[32,96], index: 3, kind: input, shape index: {}]   ;;  %s1685_s4 = inlined_call_operand.vmem [shape: f32[1,96], index: 4, kind: input, shape index: {}]   ;;  %s1686_s5 = inlined_call_operand.vmem [shape: bf16[4,8,32], index: 5, kind: input, shape index: {}]   ;;  %s1687_s6 = inlined_call_operand.vmem [shape: f32[1,32], index: 6, kind: input, shape index: {}]   ;;  %s1688_s7 = inlined_call_operand.vmem [shape: f32[1,32], index: 7, kind: input, shape index: {}]   ;;  %s1689_s8 = inlined_call_operand.vmem [shape: f32[1,32], index: 8, kind: input, shape index: {}]   ;;  %s1690_s9 = inlined_call_operand.vmem [shape: f32[2,6,32], index: 9, kind: output, shape index: {}]  }
   0x1 LB: > { %s1253_s10 = sadd.s32 4294967295, %s1448_s30   ;;  %p1257_p0 = scmp.ge.s32.totalorder %s1448_s30, 1  ;;  %s1448_s30 = sphi %s1509_s30, %s19_s30  }
   0x2   : > { %p304_p1 = scmp.lt.s32.totalorder %s1448_s30, 3 }
   0x4   : > { %p305_p2 = pnand %p1257_p0, %p304_p1 }
   0x5   : > { %v1422_v0 = vld [vmem:[%s1684_s3] sm:$0xff] (!%p305_p2)   ;;  %s1450_s13 = smov (!%p305_p2), 96   ;;  %v1423_v1 = vld [vmem:[%s1684_s3 + $0x8] sm:$0xff] (!%p305_p2)   ;;  %v1451_v2 = vmov (!%p305_p2), 0.0   ;;  %p346_p3 = scmp.lt.s32.totalorder (!%p305_p2), %s1253_s10, 1  ;;  %vm1452_vm0 = vmmov (!%p305_p2), 0  }
   0x6   : > { %308 = sbr.rel (%p305_p2) target bundleno = 3039 (0xbdf), region = 56  ;;  %434 = vrot.lane.b32.xlu0 (!%p305_p2), %v1422_v0, %s1450_s13  ;;  %1325 = vmatprep.subr.bf16.mxu1 (!%p305_p2), %v1451_v2  ;;  %v1262_v3 = vld [vmem:[%s1685_s4] ss:$0 sm:$0xff] (!%p305_p2)  ;;  %vm390_vm1 = vcmask (!%p305_p2), 261120   ;;  %s1453_s25 = smov (!%p305_p2), 120   ;;  %vm489_vm2 = vcmask (!%p305_p2), 64512  }
   0x7   : > { %1317 = vmatprep.subr.bf16.mxu0 (!%p305_p2), %v1451_v2  ;;  %1329 = vmatprep.mubr.msk.bf16.mxu1 (!%p305_p2), %vm1452_vm0, %v1451_v2  ;;  %vm538_vm3 = vcmask (!%p305_p2), 62464   ;;  %s1454_s29 = smov (!%p305_p2), 112   ;;  %vm557_vm4 = vcmask (!%p305_p2), 1043456   ;;  %v1271_v58 = vld [vmem:[%s1686_s5 + $0x4] sm:$0xf] (!%p305_p2)  ;;  %s1456_s15 = smov (!%p305_p2), 104  }
   0x8   : > { %1318 = vmatpush3.bf16.msra.mxu0 (!%p305_p2), %v1422_v0  ;;  %1321 = vmatprep.mubr.msk.bf16.mxu0 (!%p305_p2), %vm1452_vm0, %v1451_v2  ;;  %v723_v59 = vsel (!%p305_p2), %vm557_vm4, %v1271_v58, 0  ;;  %v602_v0 = vld [vmem:[%s1686_s5] sm:$0xf] (!%p305_p2)  ;;  %s1457_s16 = smov (!%p305_p2), 80   ;;  %s1458_s20 = smov (!%p305_p2), 72   ;;  %vm1144_vm5 = vcmask (!%p305_p2), 259072  }
   0x9   : > { %1319 = vmatprep.subr.bf16.mxu0 (!%p305_p2), %v1451_v2  ;;  %440 = vrot.lane.b32.xlu1 (!%p305_p2), %v1262_v3, %s1450_s13 }
   0xa   : > { %436 = vrot.lane.b32.xlu0 (!%p305_p2), %v1423_v1, %s1450_s13 }
   0xc   : > { %1320 = vmatpush3.bf16.msra.mxu0 (!%p305_p2), %v1423_v1 }
   0xd   : > { %s1692_s10 = smov (!%p346_p3, %s1253_s10), 1  ;;  %1333 = vmatprep.subr.bf16.mxu0 %v1451_v2 }
   0xe   : > { %s1536_s18 = sshll.u32 %s1692_s10, 3  ;;  %s1455_s10 = smov 88  }
   0xf   : > { %s349_s21 = scalar_lea.vmem %s1681_s0, %s1536_s18  ;;  %s353_s24 = scalar_lea.vmem %s1682_s1, %s1536_s18 }
  0x10   : > { %v1542_v4 = vld [vmem:[%s349_s21] sm:$0x3f]  ;;  %s357_s28 = scalar_lea.vmem %s1683_s2, %s1536_s18  ;;  %s361_s11 = scalar_lea.vmem %s1690_s9, %s1536_s18 }
  0x11   : > { %v370_v5 = vpack.c.bf16 %v1542_v4, %v1542_v4  ;;  %v364_v7 = vld [vmem:[%s353_s24] sm:$0xff] }
  0x12   : > { %v371_v9 = vpack.c.bf16 %v364_v7, %v364_v7  ;;  %v1579_v28 = vld [vmem:[%s357_s28] sm:$0x3f] }
  0x13   : > { %1322 = vmatmul.mubr.msk.bf16.vlgmr.msra.gmra.mrb[0].mxu0 %vm390_vm1, %v370_v5  ;;  %v769_v5 = vsel %vm557_vm4, %v602_v0, 0 }
  0x14   : > { %1335 = vmatprep.mubr.msk.bf16.mxu0 %vm1452_vm0, %v1451_v2 }
  0x78   : > { %v435_v6 = vpop.permute.xlu0 %434 }
  0x79   : > { %1326 = vmatpush3.bf16.msra.mxu1 %v435_v6 }
  0x7a   : > { %1327 = vmatprep.subr.bf16.mxu1 %v1451_v2 }
  0x7b   : > { %v441_v16 = vpop.permute.xlu1 %440 }
  0x7c   : > { %v437_v8 = vpop.permute.xlu0 %436 }
  0x7d   : > { %1328 = vmatpush3.bf16.msra.mxu1 %v437_v8 }
  0x7e   : > { %1339 = vmatprep.subr.bf16.mxu1 %v1451_v2 }
  0x80   : > { %1330 = vmatmul.mubr.msk.bf16.vlgmr.msra.gmra.mrb[0].mxu1 %vm390_vm1, %v371_v9 }
  0x81   : > { %1341 = vmatprep.mubr.msk.bf16.mxu1 %vm1452_vm0, %v1451_v2 }
  0xe6   : > { %v428_v10 = vpop.f32.mrb[0].mxu0 }
  0xe7   : > { %v429_v11 = vadd.f32 %v1262_v3, %v428_v10  ;;  %v1323_v12 = vpop.f32.mrb[1].mxu0 }
  0xe8   : > { %v431_v13 = vpop.f32.mrb[2].mxu0 }
  0xe9   : > { %v1557_v14 = vpack.c.bf16 %v429_v11, %v429_v11  ;;  %v1324_v15 = vpop.f32.mrb[3].mxu0 }
  0xeb   : > { %604 = vrot.lane.b32.xlu0 %v1557_v14, %s1453_s25 }
 0x153   : > { %v480_v17 = vpop.f32.mrb[0].mxu1 }
 0x154   : > { %v481_v18 = vadd.f32 %v480_v17, %v441_v16  ;;  %v1331_v19 = vpop.f32.mrb[1].mxu1 }
 0x155   : > { %v483_v20 = vpop.f32.mrb[2].mxu1 }
 0x156   : > { %v1560_v21 = vpack.c.bf16 %v481_v18, %v481_v18  ;;  %v1332_v22 = vpop.f32.mrb[3].mxu1 }
 0x158   : > { %606 = vrot.lane.b32.xlu1 %v1560_v21, %s1453_s25  ;;  %v494_v23 = vsel %vm489_vm2, %v1560_v21, 0 }
 0x159   : > { %1334 = vmatpush3.bf16.xpose.msra.mxu0 %v494_v23 }
 0x15a   : > { %1345 = vmatprep.subr.bf16.mxu0 %v1451_v2 }
 0x15d   : > { %v605_v26 = vpop.permute.xlu0 %604 }
 0x160   : > { %1336 = vmatmul.mubr.msk.bf16.vlgmr.msra.gmra.mrb[4].mxu0 %vm489_vm2, %v1557_v14 }
 0x161   : > { %1347 = vmatprep.mubr.msk.bf16.mxu0 %vm1452_vm0, %v1451_v2 }
 0x1ca   : > { %v607_v24 = vpop.permute.xlu1 %606 }
 0x1cb   : > { %v612_v25 = vsel %vm489_vm2, %v607_v24, 0 }
 0x1cc   : > { %1346 = vmatpush3.bf16.xpose.msra.mxu0 %v612_v25 }
 0x1cd   : > { %1357 = vmatprep.subr.bf16.mxu0 %v1451_v2 }
 0x1d3   : > { %1348 = vmatmul.mubr.msk.bf16.vlgmr.msra.gmra.mrb[8].mxu0 %vm489_vm2, %v605_v26 }
 0x1d4   : > { %1359 = vmatprep.mubr.msk.bf16.mxu0 %vm1452_vm0, %v1451_v2  ;;  %1358 = vmatpush3.bf16.msra.mxu0 %v723_v59 }
 0x1d5   : > { %1369 = vmatprep.subr.bf16.mxu0 %v1451_v2 }
 0x233   : > { %v530_v27 = vpop.f32.mrb[4].mxu0 }
 0x234   : > { %v536_v29 = vmul.f32 0.35355338, %v530_v27  ;;  %v1337_v30 = vpop.f32.mrb[5].mxu0 }
 0x235   : > { %v533_v31 = vpop.f32.mrb[6].mxu0 }
 0x236   : > { %v1338_v32 = vpop.f32.mrb[7].mxu0  ;;  %v537_v33 = vadd.f32 %v536_v29, %v1579_v28 }
 0x238   : > { %v539_v34 = vsel %vm538_vm3, %v537_v33, -inf }
 0x239   : > { %540 = vmax.xlane.f32.xlu1 %v539_v34 }
 0x2a6   : > { %v648_v35 = vpop.f32.mrb[8].mxu0 }
 0x2a7   : > { %v654_v36 = vmul.f32 0.35355338, %v648_v35  ;;  %v1349_v37 = vpop.f32.mrb[9].mxu0 }
 0x2a8   : > { %v651_v38 = vpop.f32.mrb[10].mxu0 }
 0x2a9   : > { %v1350_v39 = vpop.f32.mrb[11].mxu0  ;;  %v655_v40 = vadd.f32 %v654_v36, %v1579_v28 }
 0x2ab   : > { %v656_v41 = vsel %vm538_vm3, %v655_v40, -inf }
 0x2ac   : > { %657 = vmax.xlane.f32.xlu0 %v656_v41 }
 0x2c6   : > { %v541_v42 = vpop.xlane.xlu1 %540 }
 0x2c7   : > { %v542_v43 = vsub.f32 %v537_v33, %v541_v42 }
 0x2c9   : > { %v543_v44 = vmul.f32 1.442695, %v542_v43 }
 0x2cb   : > { %1424 = vpow2.f32 %v543_v44 }
 0x2d5   : > { %v1425_v45 = vpop.eup %1424 }
 0x2d6   : > { %v545_v46 = vsel %vm538_vm3, %v1425_v45, 0.0 }
 0x2d7   : > { %546 = vadd.xlane.f32.xlu0 %v545_v46 }
 0x2ed   : > { %552 = vrot.lane.b32.xlu0 %v1560_v21, %s1450_s13 }
 0x2f1   : > { %811 = vrot.lane.b32.xlu0 %v1557_v14, %s1454_s29 }
 0x339   : > { %v658_v47 = vpop.xlane.xlu0 %657 }
 0x33a   : > { %v659_v48 = vsub.f32 %v655_v40, %v658_v47 }
 0x33c   : > { %v660_v49 = vmul.f32 1.442695, %v659_v48 }
 0x33e   : > { %1426 = vpow2.f32 %v660_v49 }
 0x348   : > { %v1427_v50 = vpop.eup %1426 }
 0x349   : > { %v662_v51 = vsel %vm538_vm3, %v1427_v50, 0.0 }
 0x34a   : > { %663 = vadd.xlane.f32.xlu1 %v662_v51  ;;  %v1276_v51 = vld [vmem:[%s1686_s5 + $0x8] sm:$0xf] }
 0x35b   : > { %668 = vrot.lane.b32.xlu1 %v1560_v21, %s1455_s10 }
 0x35f   : > { %813 = vrot.lane.b32.xlu1 %v1560_v21, %s1454_s29 }
 0x364   : > { %v547_v52 = vpop.xlane.xlu0 %546 }
 0x365   : > { %1428 = vrcp.f32 %v547_v52  ;;  %v930_v52 = vsel %vm557_vm4, %v1276_v51, 0 }
 0x368   : > { %v553_v53 = vpop.permute.xlu0 %552 }
 0x369   : > { %v559_v54 = vsel %vm557_vm4, %v553_v53, 0 }
 0x36a   : > { %1340 = vmatpush3.bf16.msra.mxu1 %v559_v54 }
 0x36b   : > { %1351 = vmatprep.subr.bf16.mxu1 %v1451_v2 }
 0x36c   : > { %v812_v19 = vpop.permute.xlu0 %811 }
 0x36f   : > { %v1429_v55 = vpop.eup %1428 }
 0x370   : > { %v549_v56 = vmul.f32 %v1429_v55, %v1425_v45 }
 0x372   : > { %v550_v57 = vpack.c.bf16 %v549_v56, %v549_v56 }
 0x374   : > { %1342 = vmatmul.mubr.msk.bf16.vlgmr.msra.gmra.mrb[4].mxu1 %vm489_vm2, %v550_v57 }
 0x375   : > { %1353 = vmatprep.mubr.msk.bf16.mxu1 %vm1452_vm0, %v1451_v2 }
 0x3d7   : > { %v664_v60 = vpop.xlane.xlu1 %663 }
 0x3d8   : > { %1430 = vrcp.f32 %v664_v60 }
 0x3db   : > { %v669_v61 = vpop.permute.xlu1 %668 }
 0x3dc   : > { %v674_v62 = vsel %vm557_vm4, %v669_v61, 0 }
 0x3dd   : > { %1352 = vmatpush3.bf16.msra.mxu1 %v674_v62 }
 0x3de   : > { %1363 = vmatprep.subr.bf16.mxu1 %v1451_v2 }
 0x3df   : > { %v814_v11 = vpop.permute.xlu1 %813 }
 0x3e0   : > { %v819_v17 = vsel %vm489_vm2, %v814_v11, 0 }
 0x3e2   : > { %v1431_v63 = vpop.eup %1430 }
 0x3e3   : > { %v666_v1 = vmul.f32 %v1431_v63, %v1427_v50 }
 0x3e5   : > { %v667_v3 = vpack.c.bf16 %v666_v1, %v666_v1 }
 0x3e7   : > { %1354 = vmatmul.mubr.msk.bf16.vlgmr.msra.gmra.mrb[8].mxu1 %vm489_vm2, %v667_v3 }
 0x3e8   : > { %1364 = vmatpush3.bf16.msra.mxu1 %v769_v5  ;;  %1365 = vmatprep.mubr.msk.bf16.mxu1 %vm1452_vm0, %v1451_v2 }
 0x3e9   : > { %1375 = vmatprep.subr.bf16.mxu1 %v1451_v2 }
 0x447   : > { %v595_v6 = vpop.f32.mrb[4].mxu1 }
 0x448   : > { %v601_v7 = vpack.c.bf16 %v595_v6, %v595_v6  ;;  %v1343_v8 = vpop.f32.mrb[5].mxu1 }
 0x449   : > { %v598_v9 = vpop.f32.mrb[6].mxu1 }
 0x44a   : > { %v1344_v10 = vpop.f32.mrb[7].mxu1  ;;  %1366 = vmatmul.mubr.msk.bf16.vlgmr.msra.gmra.mrb[12].mxu1 %vm489_vm2, %v601_v7 }
 0x44b   : > { %1377 = vmatprep.mubr.msk.bf16.mxu1 %vm1452_vm0, %v1451_v2 }
 0x4ba   : > { %v710_v12 = vpop.f32.mrb[8].mxu1 }
 0x4bb   : > { %v716_v13 = vpack.c.bf16 %v710_v12, %v710_v12  ;;  %v1355_v15 = vpop.f32.mrb[9].mxu1 }
 0x4bc   : > { %v713_v16 = vpop.f32.mrb[10].mxu1 }
 0x4bd   : > { %v1356_v18 = vpop.f32.mrb[11].mxu1  ;;  %1360 = vmatmul.mubr.msk.bf16.vlgmr.msra.gmra.mrb[12].mxu0 %vm489_vm2, %v716_v13 }
 0x4be   : > { %1370 = vmatpush3.bf16.xpose.msra.mxu0 %v819_v17  ;;  %1371 = vmatprep.mubr.msk.bf16.mxu0 %vm1452_vm0, %v1451_v2 }
 0x4bf   : > { %1381 = vmatprep.subr.bf16.mxu0 %v1451_v2 }
 0x4c5   : > { %1372 = vmatmul.mubr.msk.bf16.vlgmr.msra.gmra.mrb[16].mxu0 %vm489_vm2, %v812_v19 }
 0x4c6   : > { %1383 = vmatprep.mubr.msk.bf16.mxu0 %vm1452_vm0, %v1451_v2  ;;  %1382 = vmatpush3.bf16.msra.mxu0 %v930_v52 }
 0x4c7   : > { %1393 = vmatprep.subr.bf16.mxu0 %v1451_v2 }
 0x51d   : > { %v805_v20 = vpop.f32.mrb[12].mxu1 }
 0x51e   : > { %v1367_v22 = vpop.f32.mrb[13].mxu1 }
 0x51f   : > { %v808_v23 = vpop.f32.mrb[14].mxu1 }
 0x520   : > { %v1368_v24 = vpop.f32.mrb[15].mxu1 }
 0x590   : > { %v759_v25 = vpop.f32.mrb[12].mxu0 }
 0x591   : > { %v1623_v26 = vadd.f32 %v805_v20, %v759_v25  ;;  %v1361_v27 = vpop.f32.mrb[13].mxu0 }
 0x592   : > { %v762_v29 = vpop.f32.mrb[14].mxu0 }
 0x593   : > { %v1362_v30 = vpop.f32.mrb[15].mxu0 }
 0x594   : > { %v1282_v30 = vld [vmem:[%s1687_s6] ss:$0 sm:$0xff] }
 0x598   : > { %v855_v31 = vpop.f32.mrb[16].mxu0 }
 0x599   : > { %v861_v32 = vmul.f32 0.35355338, %v855_v31  ;;  %v1373_v33 = vpop.f32.mrb[17].mxu0 }
 0x59a   : > { %v858_v34 = vpop.f32.mrb[18].mxu0 }
 0x59b   : > { %v1374_v35 = vpop.f32.mrb[19].mxu0  ;;  %v862_v36 = vadd.f32 %v861_v32, %v1579_v28 }
 0x59d   : > { %v863_v37 = vsel %vm538_vm3, %v862_v36, -inf }
 0x59e   : > { %864 = vmax.xlane.f32.xlu1 %v863_v37 }
 0x5af   : > { %975 = vrot.lane.b32.xlu1 %v1560_v21, %s1456_s15 }
 0x5b3   : > { %973 = vrot.lane.b32.xlu1 %v1557_v14, %s1456_s15 }
 0x62b   : > { %v865_v38 = vpop.xlane.xlu1 %864 }
 0x62c   : > { %v866_v39 = vsub.f32 %v862_v36, %v865_v38 }
 0x62e   : > { %v867_v40 = vmul.f32 1.442695, %v866_v39 }
 0x62f   : > { %v976_v47 = vpop.permute.xlu1 %975 }
 0x630   : > { %1432 = vpow2.f32 %v867_v40  ;;  %v981_v49 = vsel %vm489_vm2, %v976_v47, 0 }
 0x633   : > { %v974_v50 = vpop.permute.xlu1 %973 }
 0x63a   : > { %v1433_v41 = vpop.eup %1432 }
 0x63b   : > { %v869_v42 = vsel %vm538_vm3, %v1433_v41, 0.0 }
 0x63c   : > { %870 = vadd.xlane.f32.xlu0 %v869_v42 }
 0x652   : > { %875 = vrot.lane.b32.xlu0 %v1560_v21, %s1457_s16 }
 0x6c9   : > { %v871_v43 = vpop.xlane.xlu0 %870 }
 0x6ca   : > { %1434 = vrcp.f32 %v871_v43 }
 0x6cd   : > { %v876_v44 = vpop.permute.xlu0 %875 }
 0x6ce   : > { %v881_v45 = vsel %vm557_vm4, %v876_v44, 0 }
 0x6cf   : > { %1376 = vmatpush3.bf16.msra.mxu1 %v881_v45  ;;  %v1284_v45 = vld [vmem:[%s1689_s8] ss:$0 sm:$0xff] }
 0x6d0   : > { %1387 = vmatprep.subr.bf16.mxu1 %v1451_v2 }
 0x6d4   : > { %v1435_v14 = vpop.eup %1434 }
 0x6d5   : > { %v873_v46 = vmul.f32 %v1435_v14, %v1433_v41 }
 0x6d7   : > { %v874_v48 = vpack.c.bf16 %v873_v46, %v873_v46 }
 0x6d9   : > { %1378 = vmatmul.mubr.msk.bf16.vlgmr.msra.gmra.mrb[16].mxu1 %vm489_vm2, %v874_v48 }
 0x6da   : > { %1388 = vmatpush3.bf16.xpose.msra.mxu1 %v981_v49  ;;  %1389 = vmatprep.mubr.msk.bf16.mxu1 %vm1452_vm0, %v1451_v2 }
 0x6db   : > { %1399 = vmatprep.subr.bf16.mxu1 %v1451_v2 }
 0x6e1   : > { %1390 = vmatmul.mubr.msk.bf16.vlgmr.msra.gmra.mrb[20].mxu1 %vm489_vm2, %v974_v50 }
 0x6e2   : > { %1401 = vmatprep.mubr.msk.bf16.mxu1 %vm1452_vm0, %v1451_v2 }
 0x7ac   : > { %v917_v53 = vpop.f32.mrb[16].mxu1 }
 0x7ad   : > { %v923_v54 = vpack.c.bf16 %v917_v53, %v917_v53  ;;  %v1379_v55 = vpop.f32.mrb[17].mxu1 }
 0x7ae   : > { %v920_v56 = vpop.f32.mrb[18].mxu1 }
 0x7af   : > { %v1380_v57 = vpop.f32.mrb[19].mxu1  ;;  %1384 = vmatmul.mubr.msk.bf16.vlgmr.msra.gmra.mrb[20].mxu0 %vm489_vm2, %v923_v54 }
 0x7b0   : > { %1395 = vmatprep.mubr.msk.bf16.mxu0 %vm1452_vm0, %v1451_v2 }
 0x7b4   : > { %v1017_v58 = vpop.f32.mrb[20].mxu1 }
 0x7b5   : > { %v1023_v59 = vmul.f32 0.35355338, %v1017_v58  ;;  %v1391_v60 = vpop.f32.mrb[21].mxu1 }
 0x7b6   : > { %v1020_v61 = vpop.f32.mrb[22].mxu1 }
 0x7b7   : > { %v1392_v62 = vpop.f32.mrb[23].mxu1  ;;  %v1024_v63 = vadd.f32 %v1023_v59, %v1579_v28  ;;  %v1280_v28 = vld [vmem:[%s1686_s5 + $0xc] sm:$0xf] }
 0x7b8   : > { %v1092_v9 = vsel %vm557_vm4, %v1280_v28, 0 }
 0x7b9   : > { %v1025_v0 = vsel %vm538_vm3, %v1024_v63, -inf  ;;  %1400 = vmatpush3.bf16.msra.mxu1 %v1092_v9 }
 0x7ba   : > { %1026 = vmax.xlane.f32.xlu0 %v1025_v0 }
 0x7d0   : > { %1037 = vrot.lane.b32.xlu0 %v1560_v21, %s1458_s20 }
 0x847   : > { %v1027_v1 = vpop.xlane.xlu0 %1026 }
 0x848   : > { %v1028_v3 = vsub.f32 %v1024_v63, %v1027_v1 }
 0x84a   : > { %v1029_v5 = vmul.f32 1.442695, %v1028_v3 }
 0x84b   : > { %v1038_v6 = vpop.permute.xlu0 %1037 }
 0x84c   : > { %1436 = vpow2.f32 %v1029_v5  ;;  %v1043_v2 = vsel %vm557_vm4, %v1038_v6, 0 }
 0x84d   : > { %1394 = vmatpush3.bf16.msra.mxu0 %v1043_v2 }
 0x856   : > { %v1437_v7 = vpop.eup %1436 }
 0x857   : > { %v1031_v8 = vsel %vm538_vm3, %v1437_v7, 0.0 }
 0x858   : > { %1032 = vadd.xlane.f32.xlu1 %v1031_v8 }
 0x882   : > { %v966_v21 = vpop.f32.mrb[20].mxu0 }
 0x883   : > { %v972_v10 = vadd.f32 %v966_v21, %v1623_v26  ;;  %v1385_v11 = vpop.f32.mrb[21].mxu0 }
 0x884   : > { %v969_v12 = vpop.f32.mrb[22].mxu0 }
 0x885   : > { %v1386_v13 = vpop.f32.mrb[23].mxu0 }
 0x8e5   : > { %v1033_v15 = vpop.xlane.xlu1 %1032 }
 0x8e6   : > { %1438 = vrcp.f32 %v1033_v15 }
 0x8f0   : > { %v1439_v16 = vpop.eup %1438 }
 0x8f1   : > { %v1035_v17 = vmul.f32 %v1439_v16, %v1437_v7 }
 0x8f3   : > { %v1036_v18 = vpack.c.bf16 %v1035_v17, %v1035_v17 }
 0x8f5   : > { %1396 = vmatmul.mubr.msk.bf16.vlgmr.msra.gmra.mrb[24].mxu0 %vm489_vm2, %v1036_v18 }
 0x9c8   : > { %v1079_v19 = vpop.f32.mrb[24].mxu0 }
 0x9c9   : > { %v1085_v20 = vpack.c.bf16 %v1079_v19, %v1079_v19  ;;  %v1397_v22 = vpop.f32.mrb[25].mxu0 }
 0x9ca   : > { %v1082_v23 = vpop.f32.mrb[26].mxu0 }
 0x9cb   : > { %v1398_v24 = vpop.f32.mrb[27].mxu0  ;;  %1402 = vmatmul.mubr.msk.bf16.vlgmr.msra.gmra.mrb[24].mxu1 %vm489_vm2, %v1085_v20 }
 0xa9e   : > { %v1128_v25 = vpop.f32.mrb[24].mxu1 }
 0xa9f   : > { %v1134_v27 = vadd.f32 %v1128_v25, %v972_v10  ;;  %v1403_v26 = vpop.f32.mrb[25].mxu1 }
 0xaa0   : > { %v1131_v29 = vpop.f32.mrb[26].mxu1 }
 0xaa1   : > { %v1135_v31 = vadd.f32 %v1134_v27, %v1542_v4  ;;  %v1404_v32 = vpop.f32.mrb[27].mxu1  ;;  %v1283_v4 = vld [vmem:[%s1688_s7] ss:$0 sm:$0xff] }
 0xaa3   : > { %v1143_v33 = vadd.f32 %v1282_v30, %v1135_v31 }
 0xaa5   : > { %v1145_v34 = vsel %vm1144_vm5, %v1143_v33, 0.0 }
 0xaa6   : > { %1146 = vadd.xlane.f32.xlu1 %v1145_v34 }
 0xb33   : > { %v1147_v35 = vpop.xlane.xlu1 %1146 }
 0xb34   : > { %v1149_v36 = vmul.f32 0.03125, %v1147_v35 }
 0xb36   : > { %v1150_v37 = vsub.f32 %v1143_v33, %v1149_v36 }
 0xb38   : > { %v1151_v38 = vmul.f32 %v1150_v37, %v1150_v37 }
 0xb3a   : > { %v1152_v39 = vsel %vm1144_vm5, %v1151_v38, 0.0 }
 0xb3b   : > { %1153 = vadd.xlane.f32.xlu1 %v1152_v39 }
 0xbc8   : > { %v1154_v40 = vpop.xlane.xlu1 %1153 }
 0xbc9   : > { %v1155_v41 = vmul.f32 0.03125, %v1154_v40 }
 0xbcb   : > { %v1156_v42 = vadd.f32 1e-05, %v1155_v41 }
 0xbcd   : > { %1440 = vrsqrt.f32 %v1156_v42 }
 0xbd7   : > { %v1441_v43 = vpop.eup %1440 }
 0xbd8   : > { %v1158_v44 = vmul.f32 %v1441_v43, %v1150_v37 }
 0xbda   : > { %v1166_v14 = vmul.f32 %v1283_v4, %v1158_v44 }
 0xbdc   : > { %v1174_v46 = vadd.f32 %v1284_v45, %v1166_v14 }
 0xbde   : > { %1175 = vst.msk [vmem:[%s361_s11] sm:$0x3f] %vm1144_vm5, %v1174_v46 }
 0xbdf PF: > { %s19_s30 = sadd.s32 1, %s1448_s30  }
 0xbe0   : > { %p16_p4 = scmp.ge.s32.totalorder %s19_s30, 4  }
 0xbe2   :  { %18 = sbr.rel (!%p16_p4) target bundleno = 1 (0x1), region = 95 }

// kernel: transformer_translator_forward.23
= control target key start
LH: loop header
LB: loop body
LE: loop exit
PB: predicated region body
PF: predicated region fallthrough
CT: control target
= control target key end

     0   :  { %s455_s18 = smov 0   ;;  %s494_s0 = inlined_call_operand.vmem [shape: f32[2,6,32], index: 0, kind: input, shape index: {}]   ;;  %s495_s1 = inlined_call_operand.vmem [shape: f32[1,32], index: 1, kind: input, shape index: {}]   ;;  %s496_s2 = inlined_call_operand.vmem [shape: f32[1,32], index: 2, kind: input, shape index: {}]   ;;  %s497_s3 = inlined_call_operand.vmem [shape: bf16[32,128], index: 3, kind: input, shape index: {}]   ;;  %s498_s4 = inlined_call_operand.vmem [shape: f32[1,128], index: 4, kind: input, shape index: {}]   ;;  %s499_s5 = inlined_call_operand.vmem [shape: f32[2,6,128], index: 5, kind: output, shape index: {}]  }
   0x1 LB: > { %s375_s19 = sadd.s32 4294967295, %s421_s18   ;;  %p379_p0 = scmp.ge.s32.totalorder %s421_s18, 1  ;;  %s421_s18 = sphi %s455_s18, %s15_s18  }
   0x2   : > { %p186_p1 = scmp.lt.s32.totalorder %s421_s18, 3 }
   0x4   : > { %p187_p2 = pnand %p379_p0, %p186_p1 }
   0x5   : > { %p212_p3 = scmp.lt.s32.totalorder (!%p187_p2), %s375_s19, 1  ;;  %vm222_vm0 = vcmask (!%p187_p2), 259072   ;;  %v411_v7 = vld [vmem:[%s497_s3] sm:$0xff] (!%p187_p2)   ;;  %v423_v8 = vmov (!%p187_p2), 0.0   ;;  %v412_v9 = vld [vmem:[%s497_s3 + $0x8] sm:$0xff] (!%p187_p2)   ;;  %vm424_vm1 = vmmov (!%p187_p2), 0  }
   0x6   : > { %190 = sbr.rel (%p187_p2) target bundleno = 547 (0x223), region = 40  ;;  %393 = vmatprep.subr.bf16.mxu0 (!%p187_p2), %v423_v8  ;;  %397 = vmatprep.mubr.msk.bf16.mxu0 (!%p187_p2), %vm424_vm1, %v423_v8  ;;  %v382_v14 = vld [vmem:[%s495_s1] ss:$0 sm:$0xff] (!%p187_p2)  ;;  %vm277_vm2 = vcmask (!%p187_p2), 261120  }
   0x7   : > { %394 = vmatpush3.bf16.msra.mxu0 (!%p187_p2), %v411_v7  ;;  %v383_v16 = vld [vmem:[%s496_s2] ss:$0 sm:$0xff] (!%p187_p2) }
   0x8   : > { %395 = vmatprep.subr.bf16.mxu0 (!%p187_p2), %v423_v8  ;;  %v384_v20 = vld [vmem:[%s498_s4] ss:$0 sm:$0xff] (!%p187_p2) }
   0xb   : > { %396 = vmatpush3.bf16.msra.mxu0 (!%p187_p2), %v412_v9 }
   0xd   : > { %s501_s19 = smov (!%p212_p3, %s375_s19), 1 }
   0xe   : > { %s380_s20 = sshll.u32 %s501_s19, 3 }
   0xf   : > { %s215_s23 = scalar_lea.vmem %s494_s0, %s380_s20  ;;  %s219_s11 = scalar_lea.vmem %s499_s5, %s380_s20 }
  0x10   : > { %v221_v0 = vld [vmem:[%s215_s23] sm:$0x3f] }
  0x11   : > { %v223_v1 = vsel %vm222_vm0, %v221_v0, 0.0 }
  0x12   : > { %224 = vadd.xlane.f32.xlu0 %v223_v1 }
  0x9f   : > { %v225_v2 = vpop.xlane.xlu0 %224 }
  0xa0   : > { %v227_v3 = vmul.f32 0.03125, %v225_v2 }
  0xa2   : > { %v228_v4 = vsub.f32 %v221_v0, %v227_v3 }
  0xa4   : > { %v229_v5 = vmul.f32 %v228_v4, %v228_v4 }
  0xa6   : > { %v230_v6 = vsel %vm222_vm0, %v229_v5, 0.0 }
  0xa7   : > { %231 = vadd.xlane.f32.xlu0 %v230_v6 }
 0x134   : > { %v232_v10 = vpop.xlane.xlu0 %231 }
 0x135   : > { %v233_v11 = vmul.f32 0.03125, %v232_v10 }
 0x137   : > { %v234_v12 = vadd.f32 1e-05, %v233_v11 }
 0x139   : > { %413 = vrsqrt.f32 %v234_v12 }
 0x143   : > { %v414_v13 = vpop.eup %413 }
 0x144   : > { %v236_v15 = vmul.f32 %v414_v13, %v228_v4 }
 0x146   : > { %v244_v17 = vmul.f32 %v382_v14, %v236_v15 }
 0x148   : > { %v252_v18 = vadd.f32 %v383_v16, %v244_v17 }
 0x14a   : > { %v253_v19 = vpack.c.bf16 %v252_v18, %v252_v18 }
 0x14c   : > { %398 = vmatmul.mubr.msk.bf16.vlgmr.msra.gmra.mrb[0].mxu0 %vm277_vm2, %v253_v19 }
 0x21f   : > { %v315_v21 = vpop.f32.mrb[0].mxu0 }
 0x220   : > { %v316_v22 = vadd.f32 %v384_v20, %v315_v21  ;;  %v399_v23 = vpop.f32.mrb[1].mxu0 }
 0x221   : > { %v318_v24 = vpop.f32.mrb[2].mxu0 }
 0x222   : > { %321 = vst [vmem:[%s219_s11] sm:$0x3f] %v316_v22  ;;  %v400_v25 = vpop.f32.mrb[3].mxu0 }
 0x223 PF: > { %s15_s18 = sadd.s32 1, %s421_s18  }
 0x224   : > { %p12_p4 = scmp.ge.s32.totalorder %s15_s18, 4  }
 0x226   :  { %14 = sbr.rel (!%p12_p4) target bundleno = 1 (0x1), region = 70 }

</bundles_post_ra>
